<compile_context>
chip_gen: v5e
topology: v5e:2x2
jax: 0.10.0
libtpu: 0.0.40
codegen_flags: <defaults>
</compile_context>

<pallas_src>
import jax
import jax.numpy as jnp
from jax import lax
from jax.experimental import pallas as pl
from jax.experimental.pallas import tpu as pltpu


def _round_up(x, m):
    return ((x + m - 1) // m) * m


def _largest_divisor_leq(n, target):
    for d in range(min(n, max(1, target)), 0, -1):
        if n % d == 0:
            return d
    return 1


def _pick_t_chunk(T, Bp, G, bytes_per=2, budget=2 << 20):
    """Largest divisor of T whose gx chunk (T_chunk, Bp, G) stays under `budget` bytes."""
    per_step = max(1, Bp * G * bytes_per)
    return _largest_divisor_leq(T, budget // per_step)


_VMEM_LIMIT = 32 * 1024 * 1024  # safe on v5e/v6e (128 MiB phys) and v7x (64 MiB phys)


# ----------------------------------------------------------------------------
# Pallas kernels
# ----------------------------------------------------------------------------
def input_proj_kernel(x_ref, w_ref, b_ref, o_ref):
    """gates_x = x @ W_ih^T + (b_ih + b_hh) for a block of rows (all timesteps hoisted).

    x_ref: (rows, D) bf16, w_ref: (D, 4*Hp) bf16, b_ref: (1, 4*Hp) f32, o_ref: (rows, 4*Hp) bf16.
    """
    o_ref[...] = (
        jnp.dot(x_ref[...], w_ref[...], preferred_element_type=jnp.float32)
        + b_ref[...]
    ).astype(o_ref.dtype)


def _lstm_chunk_scan(gx_ref, whh, h0, c0, out_ref=None):
    """Sequential LSTM recurrence over one T-chunk; (h, c) carried in vregs (f32).

    gx_ref: (Tc, B, 4*Hp) bf16 pre-activations (bias folded in), gate order (i, f, o, g).
    whh:    (Hp, 4*Hp) bf16 value (loaded once by the caller -> resident across the chunk).
    """
    Tc = gx_ref.shape[0]
    Hp = whh.shape[0]

    def step(t, carry):
        h, c = carry
        # Only the recurrent bf16 matmul is on the per-step critical path.
        gates = gx_ref[t].astype(jnp.float32) + jnp.dot(
            h.astype(jnp.bfloat16), whh, preferred_element_type=jnp.float32
        )
        # Gate order (i, f, o, g): one contiguous sigmoid + one tanh, lane-aligned slices.
        sig = jax.nn.sigmoid(gates[:, : 3 * Hp])
        i = sig[:, 0 * Hp:1 * Hp]
        f = sig[:, 1 * Hp:2 * Hp]
        o = sig[:, 2 * Hp:3 * Hp]
        g = jnp.tanh(gates[:, 3 * Hp:4 * Hp])
        c_new = f * c + i * g                      # cell state stays f32
        h_new = o * jnp.tanh(c_new)
        if out_ref is not None:
            out_ref[t] = h_new.astype(out_ref.dtype)
        return (h_new, c_new)

    # Full unroll for short chunks, modest unroll otherwise (LLO scheduler visibility).
    unroll = True if Tc <= 16 else 8
    return lax.fori_loop(0, Tc, step, (h0, c0), unroll=unroll)


def lstm_seq_kernel(gx_ref, whh_ref, out_ref, h_sc, c_sc):
    """Non-final layer: emits the hidden sequence chunk (feeds the next layer)."""
    @pl.when(pl.program_id(0) == 0)
    def _():
        h_sc[...] = jnp.zeros_like(h_sc)
        c_sc[...] = jnp.zeros_like(c_sc)

    whh = whh_ref[...]                              # hoisted: one load per chunk
    h, c = _lstm_chunk_scan(gx_ref, whh, h_sc[...], c_sc[...], out_ref)
    h_sc[...] = h
    c_sc[...] = c


def lstm_last_fc_kernel(gx_ref, whh_ref, wfc_ref, bfc_ref, out_ref, h_sc, c_sc):
    """Last layer fused with the final Linear; only (B_pad, O_pad) is ever written."""
    @pl.when(pl.program_id(0) == 0)
    def _():
        h_sc[...] = jnp.zeros_like(h_sc)
        c_sc[...] = jnp.zeros_like(c_sc)

    whh = whh_ref[...]
    h, c = _lstm_chunk_scan(gx_ref, whh, h_sc[...], c_sc[...], None)
    h_sc[...] = h
    c_sc[...] = c

    @pl.when(pl.program_id(0) == pl.num_programs(0) - 1)
    def _():
        out_ref[...] = (
            jnp.dot(h_sc[...].astype(jnp.bfloat16), wfc_ref[...],
                    preferred_element_type=jnp.float32)
            + bfc_ref[...]
        ).astype(out_ref.dtype)


# ----------------------------------------------------------------------------
# pallas_call wrappers
# ----------------------------------------------------------------------------
def input_proj_pallas(x2d, wih_t, bias2d):
    N, D = x2d.shape
    G = wih_t.shape[1]
    row_tile = 512 if N >= 512 else N               # N is a multiple of 8 (B padded)
    N_pad = _round_up(N, row_tile)
    if N_pad != N:
        x2d = jnp.pad(x2d, ((0, N_pad - N), (0, 0)))
    out = pl.pallas_call(
        input_proj_kernel,
        out_shape=jax.ShapeDtypeStruct((N_pad, G), jnp.bfloat16),
        grid=(N_pad // row_tile,),
        in_specs=[
            pl.BlockSpec((row_tile, D), lambda r: (r, 0)),
            pl.BlockSpec((D, G), lambda r: (0, 0)),
            pl.BlockSpec((1, G), lambda r: (0, 0)),
        ],
        out_specs=pl.BlockSpec((row_tile, G), lambda r: (r, 0)),
        compiler_params=pltpu.CompilerParams(
            dimension_semantics=("parallel",),
            vmem_limit_bytes=_VMEM_LIMIT),
    )(x2d, wih_t, bias2d)
    return out[:N] if N_pad != N else out


def lstm_seq_pallas(gx, whh_t):
    T, Bp, G = gx.shape
    Hp = whh_t.shape[0]
    t_chunk = _pick_t_chunk(T, Bp, G)
    return pl.pallas_call(
        lstm_seq_kernel,
        out_shape=jax.ShapeDtypeStruct((T, Bp, Hp), jnp.bfloat16),
        grid=(T // t_chunk,),
        in_specs=[
            pl.BlockSpec((t_chunk, Bp, G), lambda t: (t, 0, 0)),
            pl.BlockSpec((Hp, G), lambda t: (0, 0)),
        ],
        out_specs=pl.BlockSpec((t_chunk, Bp, Hp), lambda t: (t, 0, 0)),
        scratch_shapes=[pltpu.VMEM((Bp, Hp), jnp.float32),
                        pltpu.VMEM((Bp, Hp), jnp.float32)],
        compiler_params=pltpu.CompilerParams(
            dimension_semantics=("arbitrary",),
            vmem_limit_bytes=_VMEM_LIMIT),
    )(gx, whh_t)


def lstm_last_fc_pallas(gx, whh_t, wfc_t, bfc2d):
    T, Bp, G = gx.shape
    Hp = whh_t.shape[0]
    Op = wfc_t.shape[1]
    t_chunk = _pick_t_chunk(T, Bp, G)
    return pl.pallas_call(
        lstm_last_fc_kernel,
        out_shape=jax.ShapeDtypeStruct((Bp, Op), jnp.float32),
        grid=(T // t_chunk,),
        in_specs=[
            pl.BlockSpec((t_chunk, Bp, G), lambda t: (t, 0, 0)),
            pl.BlockSpec((Hp, G), lambda t: (0, 0)),
            pl.BlockSpec((Hp, Op), lambda t: (0, 0)),
            pl.BlockSpec((1, Op), lambda t: (0, 0)),
        ],
        out_specs=pl.BlockSpec((Bp, Op), lambda t: (0, 0)),
        scratch_shapes=[pltpu.VMEM((Bp, Hp), jnp.float32),
                        pltpu.VMEM((Bp, Hp), jnp.float32)],
        compiler_params=pltpu.CompilerParams(
            dimension_semantics=("arbitrary",),
            vmem_limit_bytes=_VMEM_LIMIT),
    )(gx, whh_t, wfc_t, bfc2d)


# ----------------------------------------------------------------------------
# Forward pass (matches PyTorch LSTM(batch_first=True) + Linear on out[:, -1, :])
# ----------------------------------------------------------------------------
@jax.jit
def _forward_padded(x, layer_params, wfc_t, bfc2d):
    """x: (B, T, input_dim) batch_first. Returns padded FC output (B_pad, O_pad) f32."""
    B, T, _ = x.shape
    B_pad = _round_up(max(B, 1), 8)                 # sublane-pad the batch
    if B_pad != B:
        x = jnp.pad(x, ((0, B_pad - B), (0, 0), (0, 0)))
    h_seq = jnp.transpose(x, (1, 0, 2)).astype(jnp.bfloat16)     # (T, B_pad, D)
    n_layers = len(layer_params)
    out_p = None
    for idx, (wih_t, whh_t, bias2d) in enumerate(layer_params):
        T_, Bp, D = h_seq.shape
        # Hoisted input projection: one tiled (T*B_pad, D) x (D, 4*Hp) bf16 MXU matmul.
        gx = input_proj_pallas(h_seq.reshape(T_ * Bp, D), wih_t, bias2d)
        gx = gx.reshape(T_, Bp, -1)                              # (T, B_pad, 4*Hp) bf16
        if idx + 1 < n_layers:
            h_seq = lstm_seq_pallas(gx, whh_t)                   # (T, B_pad, Hp) bf16
        else:
            out_p = lstm_last_fc_pallas(gx, whh_t, wfc_t, bfc2d)  # (B_pad, O_pad) f32
    return out_p


def lstm_forward(x, prepared):
    out_p = _forward_padded(x, prepared["layers"], prepared["wfc_t"], prepared["bfc"])
    return out_p[: x.shape[0], : prepared["output_dim"]]


# ----------------------------------------------------------------------------
# Parameter preparation: gate-reorder + lane-pad + bf16-cast PyTorch-layout weights
# ----------------------------------------------------------------------------
_GATE_PERM = (0, 1, 3, 2)   # PyTorch (i, f, g, o) -> kernel (i, f, o, g)


def _reorder_pad_gates(a, H, Hp, axis):
    """Reorder the 4*H gate axis to (i,f,o,g) and pad each gate to Hp lanes."""
    chunks = jnp.split(a, 4, axis=axis)
    chunks = [chunks[p] for p in _GATE_PERM]
    if Hp != H:
        widths = [(0, 0)] * a.ndim
        widths[axis] = (0, Hp - H)
        chunks = [jnp.pad(c, widths) for c in chunks]
    return jnp.concatenate(chunks, axis=axis)


def prepare_params(params, hidden_dim, output_dim):
    """Zero padding is exact: padded gate pre-activations are 0 -> g=tanh(0)=0 and c=0,
    so padded cell/hidden lanes stay exactly 0 every timestep (also exact in bf16)."""
    H, O = hidden_dim, output_dim
    Hp = _round_up(H, 128)
    Op = _round_up(O, 128)
    layers = []
    for li, (wih, whh, bih, bhh) in enumerate(params["layers"]):
        wih_t = _reorder_pad_gates(wih.T, H, Hp, axis=1)             # (D_in, 4*Hp)
        if li > 0 and Hp != H:       # layers > 0 consume padded hidden states
            wih_t = jnp.pad(wih_t, ((0, Hp - H), (0, 0)))            # (Hp, 4*Hp)
        whh_t = _reorder_pad_gates(whh.T, H, Hp, axis=1)             # (H, 4*Hp)
        if Hp != H:
            whh_t = jnp.pad(whh_t, ((0, Hp - H), (0, 0)))            # (Hp, 4*Hp)
        bias = _reorder_pad_gates((bih + bhh)[None, :], H, Hp, axis=1)  # (1, 4*Hp)
        layers.append((wih_t.astype(jnp.bfloat16),
                       whh_t.astype(jnp.bfloat16),
                       bias.astype(jnp.float32)))
    wfc_t = jnp.pad(params["w_fc"].T, ((0, Hp - H), (0, Op - O))).astype(jnp.bfloat16)
    bfc = jnp.pad(params["b_fc"], (0, Op - O))[None, :].astype(jnp.float32)
    return {"layers": tuple(layers), "wfc_t": wfc_t, "bfc": bfc, "output_dim": O}


# ----------------------------------------------------------------------------
# Deterministic parameter init (PyTorch-style uniform(-1/sqrt(H), 1/sqrt(H)))
# ----------------------------------------------------------------------------
def init_params(key, input_dim, hidden_dim, num_layers, output_dim):
    params = {"layers": []}
    bound = 1.0 / jnp.sqrt(hidden_dim)
    for layer in range(num_layers):
        d_in = input_dim if layer == 0 else hidden_dim
        key, k1, k2, k3, k4 = jax.random.split(key, 5)
        wih = jax.random.uniform(k1, (4 * hidden_dim, d_in), jnp.float32, -bound, bound)
        whh = jax.random.uniform(k2, (4 * hidden_dim, hidden_dim), jnp.float32, -bound, bound)
        bih = jax.random.uniform(k3, (4 * hidden_dim,), jnp.float32, -bound, bound)
        bhh = jax.random.uniform(k4, (4 * hidden_dim,), jnp.float32, -bound, bound)
        params["layers"].append((wih, whh, bih, bhh))
    key, k5, k6 = jax.random.split(key, 3)
    params["w_fc"] = jax.random.uniform(k5, (output_dim, hidden_dim), jnp.float32, -bound, bound)
    params["b_fc"] = jax.random.uniform(k6, (output_dim,), jnp.float32, -bound, bound)
    return params


# ----------------------------------------------------------------------------
# Pure-JAX f32 reference (PyTorch gate order), for correctness check
# ----------------------------------------------------------------------------
def lstm_forward_ref(x, params):
    B, T, _ = x.shape
    h_seq = jnp.transpose(x, (1, 0, 2)).astype(jnp.float32)
    for (wih, whh, bih, bhh) in params["layers"]:
        H = whh.shape[1]
        h0 = jnp.zeros((B, H), jnp.float32)
        c0 = jnp.zeros((B, H), jnp.float32)

        def step(carry, x_t, wih=wih, whh=whh, bih=bih, bhh=bhh, H=H):
            h, c = carry
            gates = x_t @ wih.T + bih + h @ whh.T + bhh
            i = jax.nn.sigmoid(gates[:, 0 * H:1 * H])
            f = jax.nn.sigmoid(gates[:, 1 * H:2 * H])
            g = jnp.tanh(gates[:, 2 * H:3 * H])
            o = jax.nn.sigmoid(gates[:, 3 * H:4 * H])
            c = f * c + i * g
            h = o * jnp.tanh(c)
            return (h, c), h

        _, h_seq = jax.lax.scan(step, (h0, c0), h_seq)
    return h_seq[-1] @ params["w_fc"].T + params["b_fc"]


# ----------------------------------------------------------------------------
if __name__ == "__main__":
    input_dim, hidden_dim, num_layers, output_dim = 4, 32, 2, 4
    batch, seq = 2, 8

    key = jax.random.PRNGKey(0)
    key, pkey, xkey = jax.random.split(key, 3)
    params = init_params(pkey, input_dim, hidden_dim, num_layers, output_dim)
    x = jax.random.normal(xkey, (batch, seq, input_dim), jnp.float32)

    prepared = prepare_params(params, hidden_dim, output_dim)

    out = jax.block_until_ready(lstm_forward(x, prepared))
    ref = jax.block_until_ready(lstm_forward_ref(x, params))

    assert out.shape == (batch, output_dim)
    max_err = float(jnp.max(jnp.abs(out - ref)))
    # bf16 MXU operands -> relaxed tolerance vs the f32 reference.
    assert jnp.allclose(out, ref, atol=5e-2, rtol=5e-2), (max_err, out, ref)
    print("KERNEL_OK")
</pallas_src>

<mosaic_0001>
module attributes {stable_mosaic.version = 11 : i64} {
  func.func @input_proj_kernel(%arg0: i32, %arg1: memref<64x4xbf16, #tpu.memory_space<vmem>>, %arg2: memref<4x512xbf16, #tpu.memory_space<vmem>>, %arg3: memref<1x512xf32, #tpu.memory_space<vmem>>, %arg4: memref<64x512xbf16, #tpu.memory_space<vmem>>) attributes {dimension_semantics = [#tpu.dimension_semantics<parallel>], iteration_bounds = array<i64: 1>, scalar_prefetch = 0 : i64, scratch_operands = 0 : i64, tpu.core_type = #tpu.core_type<tc>, window_params = [{transform_indices = @transform_0, window_bounds = array<i64: 64, 4>}, {pipeline_mode = #tpu.pipeline_mode<synchronous>, transform_indices = @transform_1, window_bounds = array<i64: 4, 512>}, {pipeline_mode = #tpu.pipeline_mode<synchronous>, transform_indices = @transform_2, window_bounds = array<i64: 1, 512>}, {transform_indices = @transform_3, window_bounds = array<i64: 64, 512>}]} {
    %c0 = arith.constant 0 : index
    %c0_0 = arith.constant 0 : index
    %0 = vector.load %arg1[%c0, %c0_0] : memref<64x4xbf16, #tpu.memory_space<vmem>>, vector<64x4xbf16>
    %c0_1 = arith.constant 0 : index
    %c0_2 = arith.constant 0 : index
    %1 = vector.load %arg2[%c0_1, %c0_2] : memref<4x512xbf16, #tpu.memory_space<vmem>>, vector<4x512xbf16>
    %cst = arith.constant dense<0.000000e+00> : vector<64x512xf32>
    %2 = tpu.matmul %0, %1, %cst {dimension_numbers = #tpu.dot_dimension_numbers<[1], [0], [0], [1], [0, 0, 1, 1], [], []>} : vector<64x4xbf16>, vector<4x512xbf16>, vector<64x512xf32> -> vector<64x512xf32>
    %c0_3 = arith.constant 0 : index
    %c0_4 = arith.constant 0 : index
    %3 = vector.load %arg3[%c0_3, %c0_4] : memref<1x512xf32, #tpu.memory_space<vmem>>, vector<1x512xf32>
    %4 = vector.broadcast %3 : vector<1x512xf32> to vector<64x512xf32>
    %5 = arith.addf %2, %4 : vector<64x512xf32>
    %6 = arith.truncf %5 : vector<64x512xf32> to vector<64x512xbf16>
    %c0_5 = arith.constant 0 : index
    %c0_6 = arith.constant 0 : index
    %7 = vector.load %arg4[%c0_5, %c0_6] : memref<64x512xbf16, #tpu.memory_space<vmem>>, vector<64x512xbf16>
    tpu.vector_store %arg4[%c0_5, %c0_6], %6 {strides = array<i32>} : memref<64x512xbf16, #tpu.memory_space<vmem>>, vector<64x512xbf16>,
    return
  }
  func.func @transform_0(%arg0: i32) -> (i32, i32) {
    %c0_i32 = arith.constant 0 : i32
    %c0_i32_0 = arith.constant 0 : i32
    return %arg0, %c0_i32 : i32, i32
  }
  func.func @transform_1(%arg0: i32) -> (i32, i32) {
    %c0_i32 = arith.constant 0 : i32
    %c0_i32_0 = arith.constant 0 : i32
    %c0_i32_1 = arith.constant 0 : i32
    return %c0_i32, %c0_i32_0 : i32, i32
  }
  func.func @transform_2(%arg0: i32) -> (i32, i32) {
    %c0_i32 = arith.constant 0 : i32
    %c0_i32_0 = arith.constant 0 : i32
    %c0_i32_1 = arith.constant 0 : i32
    return %c0_i32, %c0_i32_0 : i32, i32
  }
  func.func @transform_3(%arg0: i32) -> (i32, i32) {
    %c0_i32 = arith.constant 0 : i32
    %c0_i32_0 = arith.constant 0 : i32
    return %arg0, %c0_i32 : i32, i32
  }
}

module attributes {stable_mosaic.version = 11 : i64} {
  func.func @input_proj_kernel(%arg0: i32, %arg1: memref<64x128xbf16, #tpu.memory_space<vmem>>, %arg2: memref<128x512xbf16, #tpu.memory_space<vmem>>, %arg3: memref<1x512xf32, #tpu.memory_space<vmem>>, %arg4: memref<64x512xbf16, #tpu.memory_space<vmem>>) attributes {dimension_semantics = [#tpu.dimension_semantics<parallel>], iteration_bounds = array<i64: 1>, scalar_prefetch = 0 : i64, scratch_operands = 0 : i64, tpu.core_type = #tpu.core_type<tc>, window_params = [{transform_indices = @transform_0, window_bounds = array<i64: 64, 128>}, {pipeline_mode = #tpu.pipeline_mode<synchronous>, transform_indices = @transform_1, window_bounds = array<i64: 128, 512>}, {pipeline_mode = #tpu.pipeline_mode<synchronous>, transform_indices = @transform_2, window_bounds = array<i64: 1, 512>}, {transform_indices = @transform_3, window_bounds = array<i64: 64, 512>}]} {
    %c0 = arith.constant 0 : index
    %c0_0 = arith.constant 0 : index
    %0 = vector.load %arg1[%c0, %c0_0] : memref<64x128xbf16, #tpu.memory_space<vmem>>, vector<64x128xbf16>
    %c0_1 = arith.constant 0 : index
    %c0_2 = arith.constant 0 : index
    %1 = vector.load %arg2[%c0_1, %c0_2] : memref<128x512xbf16, #tpu.memory_space<vmem>>, vector<128x512xbf16>
    %cst = arith.constant dense<0.000000e+00> : vector<64x512xf32>
    %2 = tpu.matmul %0, %1, %cst {dimension_numbers = #tpu.dot_dimension_numbers<[1], [0], [0], [1], [0, 0, 1, 1], [], []>} : vector<64x128xbf16>, vector<128x512xbf16>, vector<64x512xf32> -> vector<64x512xf32>
    %c0_3 = arith.constant 0 : index
    %c0_4 = arith.constant 0 : index
    %3 = vector.load %arg3[%c0_3, %c0_4] : memref<1x512xf32, #tpu.memory_space<vmem>>, vector<1x512xf32>
    %4 = vector.broadcast %3 : vector<1x512xf32> to vector<64x512xf32>
    %5 = arith.addf %2, %4 : vector<64x512xf32>
    %6 = arith.truncf %5 : vector<64x512xf32> to vector<64x512xbf16>
    %c0_5 = arith.constant 0 : index
    %c0_6 = arith.constant 0 : index
    %7 = vector.load %arg4[%c0_5, %c0_6] : memref<64x512xbf16, #tpu.memory_space<vmem>>, vector<64x512xbf16>
    tpu.vector_store %arg4[%c0_5, %c0_6], %6 {strides = array<i32>} : memref<64x512xbf16, #tpu.memory_space<vmem>>, vector<64x512xbf16>,
    return
  }
  func.func @transform_0(%arg0: i32) -> (i32, i32) {
    %c0_i32 = arith.constant 0 : i32
    %c0_i32_0 = arith.constant 0 : i32
    return %arg0, %c0_i32 : i32, i32
  }
  func.func @transform_1(%arg0: i32) -> (i32, i32) {
    %c0_i32 = arith.constant 0 : i32
    %c0_i32_0 = arith.constant 0 : i32
    %c0_i32_1 = arith.constant 0 : i32
    return %c0_i32, %c0_i32_0 : i32, i32
  }
  func.func @transform_2(%arg0: i32) -> (i32, i32) {
    %c0_i32 = arith.constant 0 : i32
    %c0_i32_0 = arith.constant 0 : i32
    %c0_i32_1 = arith.constant 0 : i32
    return %c0_i32, %c0_i32_0 : i32, i32
  }
  func.func @transform_3(%arg0: i32) -> (i32, i32) {
    %c0_i32 = arith.constant 0 : i32
    %c0_i32_0 = arith.constant 0 : i32
    return %arg0, %c0_i32 : i32, i32
  }
}

module attributes {stable_mosaic.version = 11 : i64} {
  func.func @lstm_seq_kernel(%arg0: i32, %arg1: memref<8x8x512xbf16, #tpu.memory_space<vmem>>, %arg2: memref<128x512xbf16, #tpu.memory_space<vmem>>, %arg3: memref<8x8x128xbf16, #tpu.memory_space<vmem>>, %arg4: memref<8x128xf32, #tpu.memory_space<vmem>>, %arg5: memref<8x128xf32, #tpu.memory_space<vmem>>) attributes {dimension_semantics = [#tpu.dimension_semantics<arbitrary>], iteration_bounds = array<i64: 1>, scalar_prefetch = 0 : i64, scratch_operands = 2 : i64, tpu.core_type = #tpu.core_type<tc>, window_params = [{transform_indices = @transform_0, window_bounds = array<i64: 8, 8, 512>}, {pipeline_mode = #tpu.pipeline_mode<synchronous>, transform_indices = @transform_1, window_bounds = array<i64: 128, 512>}, {transform_indices = @transform_2, window_bounds = array<i64: 8, 8, 128>}]} {
    %c0_i32 = arith.constant 0 : i32
    %0 = arith.cmpi eq, %arg0, %c0_i32 : i32
    %1 = arith.extui %0 : i1 to i32
    %c0_i32_0 = arith.constant 0 : i32
    %2 = arith.cmpi ne, %1, %c0_i32_0 : i32
    scf.if %2 {
      %cst_58 = arith.constant 0.000000e+00 : f32
      %232 = vector.broadcast %cst_58 : f32 to vector<8x128xf32>
      %c0_59 = arith.constant 0 : index
      %c0_60 = arith.constant 0 : index
      %233 = vector.load %arg4[%c0_59, %c0_60] : memref<8x128xf32, #tpu.memory_space<vmem>>, vector<8x128xf32>
      tpu.vector_store %arg4[%c0_59, %c0_60], %232 {strides = array<i32>} : memref<8x128xf32, #tpu.memory_space<vmem>>, vector<8x128xf32>,
      %cst_61 = arith.constant 0.000000e+00 : f32
      %234 = vector.broadcast %cst_61 : f32 to vector<8x128xf32>
      %c0_62 = arith.constant 0 : index
      %c0_63 = arith.constant 0 : index
      %235 = vector.load %arg5[%c0_62, %c0_63] : memref<8x128xf32, #tpu.memory_space<vmem>>, vector<8x128xf32>
      tpu.vector_store %arg5[%c0_62, %c0_63], %234 {strides = array<i32>} : memref<8x128xf32, #tpu.memory_space<vmem>>, vector<8x128xf32>,
    } else {
    }
    %c0 = arith.constant 0 : index
    %c0_1 = arith.constant 0 : index
    %3 = vector.load %arg2[%c0, %c0_1] : memref<128x512xbf16, #tpu.memory_space<vmem>>, vector<128x512xbf16>
    %c0_2 = arith.constant 0 : index
    %c0_3 = arith.constant 0 : index
    %4 = vector.load %arg4[%c0_2, %c0_3] : memref<8x128xf32, #tpu.memory_space<vmem>>, vector<8x128xf32>
    %c0_4 = arith.constant 0 : index
    %c0_5 = arith.constant 0 : index
    %5 = vector.load %arg5[%c0_4, %c0_5] : memref<8x128xf32, #tpu.memory_space<vmem>>, vector<8x128xf32>
    %c0_i32_6 = arith.constant 0 : i32
    %6 = arith.index_cast %c0_i32_6 : i32 to index
    %c0_7 = arith.constant 0 : index
    %c0_8 = arith.constant 0 : index
    %7 = vector.load %arg1[%6, %c0_7, %c0_8] : memref<8x8x512xbf16, #tpu.memory_space<vmem>>, vector<1x8x512xbf16>
    %8 = vector.shape_cast %7 : vector<1x8x512xbf16> to vector<8x512xbf16>
    %9 = arith.extf %8 : vector<8x512xbf16> to vector<8x512xf32>
    %10 = arith.truncf %4 : vector<8x128xf32> to vector<8x128xbf16>
    %cst = arith.constant dense<0.000000e+00> : vector<8x512xf32>
    %11 = tpu.matmul %10, %3, %cst {dimension_numbers = #tpu.dot_dimension_numbers<[1], [0], [0], [1], [0, 0, 1, 1], [], []>} : vector<8x128xbf16>, vector<128x512xbf16>, vector<8x512xf32> -> vector<8x512xf32>
    %12 = arith.addf %9, %11 : vector<8x512xf32>
    %13 = vector.extract_strided_slice %12 {offsets = [0, 0], sizes = [8, 384], strides = [1, 1]} : vector<8x512xf32> to vector<8x384xf32>
    %14 = arith.negf %13 : vector<8x384xf32>
    %15 = math.exp %14 : vector<8x384xf32>
    %cst_9 = arith.constant 1.000000e+00 : f32
    %16 = vector.broadcast %cst_9 : f32 to vector<8x384xf32>
    %17 = arith.addf %16, %15 : vector<8x384xf32>
    %18 = arith.divf %16, %17 : vector<8x384xf32>
    %19 = vector.extract_strided_slice %18 {offsets = [0, 0], sizes = [8, 128], strides = [1, 1]} : vector<8x384xf32> to vector<8x128xf32>
    %20 = vector.extract_strided_slice %18 {offsets = [0, 128], sizes = [8, 128], strides = [1, 1]} : vector<8x384xf32> to vector<8x128xf32>
    %21 = vector.extract_strided_slice %18 {offsets = [0, 256], sizes = [8, 128], strides = [1, 1]} : vector<8x384xf32> to vector<8x128xf32>
    %22 = vector.extract_strided_slice %12 {offsets = [0, 384], sizes = [8, 128], strides = [1, 1]} : vector<8x512xf32> to vector<8x128xf32>
    %23 = math.tanh %22 : vector<8x128xf32>
    %24 = arith.mulf %20, %5 : vector<8x128xf32>
    %25 = arith.mulf %19, %23 : vector<8x128xf32>
    %26 = arith.addf %24, %25 : vector<8x128xf32>
    %27 = math.tanh %26 : vector<8x128xf32>
    %28 = arith.mulf %21, %27 : vector<8x128xf32>
    %29 = arith.truncf %28 : vector<8x128xf32> to vector<8x128xbf16>
    %30 = arith.index_cast %c0_i32_6 : i32 to index
    %c0_10 = arith.constant 0 : index
    %c0_11 = arith.constant 0 : index
    %31 = vector.load %arg3[%30, %c0_10, %c0_11] : memref<8x8x128xbf16, #tpu.memory_space<vmem>>, vector<1x8x128xbf16>
    %32 = vector.shape_cast %31 : vector<1x8x128xbf16> to vector<8x128xbf16>
    %33 = vector.shape_cast %29 : vector<8x128xbf16> to vector<1x8x128xbf16>
    tpu.vector_store %arg3[%30, %c0_10, %c0_11], %33 {strides = array<i32>} : memref<8x8x128xbf16, #tpu.memory_space<vmem>>, vector<1x8x128xbf16>,
    %c1_i32 = arith.constant 1 : i32
    %34 = arith.index_cast %c1_i32 : i32 to index
    %c0_12 = arith.constant 0 : index
    %c0_13 = arith.constant 0 : index
    %35 = vector.load %arg1[%34, %c0_12, %c0_13] : memref<8x8x512xbf16, #tpu.memory_space<vmem>>, vector<1x8x512xbf16>
    %36 = vector.shape_cast %35 : vector<1x8x512xbf16> to vector<8x512xbf16>
    %37 = arith.extf %36 : vector<8x512xbf16> to vector<8x512xf32>
    %38 = arith.truncf %28 : vector<8x128xf32> to vector<8x128xbf16>
    %cst_14 = arith.constant dense<0.000000e+00> : vector<8x512xf32>
    %39 = tpu.matmul %38, %3, %cst_14 {dimension_numbers = #tpu.dot_dimension_numbers<[1], [0], [0], [1], [0, 0, 1, 1], [], []>} : vector<8x128xbf16>, vector<128x512xbf16>, vector<8x512xf32> -> vector<8x512xf32>
    %40 = arith.addf %37, %39 : vector<8x512xf32>
    %41 = vector.extract_strided_slice %40 {offsets = [0, 0], sizes = [8, 384], strides = [1, 1]} : vector<8x512xf32> to vector<8x384xf32>
    %42 = arith.negf %41 : vector<8x384xf32>
    %43 = math.exp %42 : vector<8x384xf32>
    %cst_15 = arith.constant 1.000000e+00 : f32
    %44 = vector.broadcast %cst_15 : f32 to vector<8x384xf32>
    %45 = arith.addf %44, %43 : vector<8x384xf32>
    %46 = arith.divf %44, %45 : vector<8x384xf32>
    %47 = vector.extract_strided_slice %46 {offsets = [0, 0], sizes = [8, 128], strides = [1, 1]} : vector<8x384xf32> to vector<8x128xf32>
    %48 = vector.extract_strided_slice %46 {offsets = [0, 128], sizes = [8, 128], strides = [1, 1]} : vector<8x384xf32> to vector<8x128xf32>
    %49 = vector.extract_strided_slice %46 {offsets = [0, 256], sizes = [8, 128], strides = [1, 1]} : vector<8x384xf32> to vector<8x128xf32>
    %50 = vector.extract_strided_slice %40 {offsets = [0, 384], sizes = [8, 128], strides = [1, 1]} : vector<8x512xf32> to vector<8x128xf32>
    %51 = math.tanh %50 : vector<8x128xf32>
    %52 = arith.mulf %48, %26 : vector<8x128xf32>
    %53 = arith.mulf %47, %51 : vector<8x128xf32>
    %54 = arith.addf %52, %53 : vector<8x128xf32>
    %55 = math.tanh %54 : vector<8x128xf32>
    %56 = arith.mulf %49, %55 : vector<8x128xf32>
    %57 = arith.truncf %56 : vector<8x128xf32> to vector<8x128xbf16>
    %58 = arith.index_cast %c1_i32 : i32 to index
    %c0_16 = arith.constant 0 : index
    %c0_17 = arith.constant 0 : index
    %59 = vector.load %arg3[%58, %c0_16, %c0_17] : memref<8x8x128xbf16, #tpu.memory_space<vmem>>, vector<1x8x128xbf16>
    %60 = vector.shape_cast %59 : vector<1x8x128xbf16> to vector<8x128xbf16>
    %61 = vector.shape_cast %57 : vector<8x128xbf16> to vector<1x8x128xbf16>
    tpu.vector_store %arg3[%58, %c0_16, %c0_17], %61 {strides = array<i32>} : memref<8x8x128xbf16, #tpu.memory_space<vmem>>, vector<1x8x128xbf16>,
    %c2_i32 = arith.constant 2 : i32
    %62 = arith.index_cast %c2_i32 : i32 to index
    %c0_18 = arith.constant 0 : index
    %c0_19 = arith.constant 0 : index
    %63 = vector.load %arg1[%62, %c0_18, %c0_19] : memref<8x8x512xbf16, #tpu.memory_space<vmem>>, vector<1x8x512xbf16>
    %64 = vector.shape_cast %63 : vector<1x8x512xbf16> to vector<8x512xbf16>
    %65 = arith.extf %64 : vector<8x512xbf16> to vector<8x512xf32>
    %66 = arith.truncf %56 : vector<8x128xf32> to vector<8x128xbf16>
    %cst_20 = arith.constant dense<0.000000e+00> : vector<8x512xf32>
    %67 = tpu.matmul %66, %3, %cst_20 {dimension_numbers = #tpu.dot_dimension_numbers<[1], [0], [0], [1], [0, 0, 1, 1], [], []>} : vector<8x128xbf16>, vector<128x512xbf16>, vector<8x512xf32> -> vector<8x512xf32>
    %68 = arith.addf %65, %67 : vector<8x512xf32>
    %69 = vector.extract_strided_slice %68 {offsets = [0, 0], sizes = [8, 384], strides = [1, 1]} : vector<8x512xf32> to vector<8x384xf32>
    %70 = arith.negf %69 : vector<8x384xf32>
    %71 = math.exp %70 : vector<8x384xf32>
    %cst_21 = arith.constant 1.000000e+00 : f32
    %72 = vector.broadcast %cst_21 : f32 to vector<8x384xf32>
    %73 = arith.addf %72, %71 : vector<8x384xf32>
    %74 = arith.divf %72, %73 : vector<8x384xf32>
    %75 = vector.extract_strided_slice %74 {offsets = [0, 0], sizes = [8, 128], strides = [1, 1]} : vector<8x384xf32> to vector<8x128xf32>
    %76 = vector.extract_strided_slice %74 {offsets = [0, 128], sizes = [8, 128], strides = [1, 1]} : vector<8x384xf32> to vector<8x128xf32>
    %77 = vector.extract_strided_slice %74 {offsets = [0, 256], sizes = [8, 128], strides = [1, 1]} : vector<8x384xf32> to vector<8x128xf32>
    %78 = vector.extract_strided_slice %68 {offsets = [0, 384], sizes = [8, 128], strides = [1, 1]} : vector<8x512xf32> to vector<8x128xf32>
    %79 = math.tanh %78 : vector<8x128xf32>
    %80 = arith.mulf %76, %54 : vector<8x128xf32>
    %81 = arith.mulf %75, %79 : vector<8x128xf32>
    %82 = arith.addf %80, %81 : vector<8x128xf32>
    %83 = math.tanh %82 : vector<8x128xf32>
    %84 = arith.mulf %77, %83 : vector<8x128xf32>
    %85 = arith.truncf %84 : vector<8x128xf32> to vector<8x128xbf16>
    %86 = arith.index_cast %c2_i32 : i32 to index
    %c0_22 = arith.constant 0 : index
    %c0_23 = arith.constant 0 : index
    %87 = vector.load %arg3[%86, %c0_22, %c0_23] : memref<8x8x128xbf16, #tpu.memory_space<vmem>>, vector<1x8x128xbf16>
    %88 = vector.shape_cast %87 : vector<1x8x128xbf16> to vector<8x128xbf16>
    %89 = vector.shape_cast %85 : vector<8x128xbf16> to vector<1x8x128xbf16>
    tpu.vector_store %arg3[%86, %c0_22, %c0_23], %89 {strides = array<i32>} : memref<8x8x128xbf16, #tpu.memory_space<vmem>>, vector<1x8x128xbf16>,
    %c3_i32 = arith.constant 3 : i32
    %90 = arith.index_cast %c3_i32 : i32 to index
    %c0_24 = arith.constant 0 : index
    %c0_25 = arith.constant 0 : index
    %91 = vector.load %arg1[%90, %c0_24, %c0_25] : memref<8x8x512xbf16, #tpu.memory_space<vmem>>, vector<1x8x512xbf16>
    %92 = vector.shape_cast %91 : vector<1x8x512xbf16> to vector<8x512xbf16>
    %93 = arith.extf %92 : vector<8x512xbf16> to vector<8x512xf32>
    %94 = arith.truncf %84 : vector<8x128xf32> to vector<8x128xbf16>
    %cst_26 = arith.constant dense<0.000000e+00> : vector<8x512xf32>
    %95 = tpu.matmul %94, %3, %cst_26 {dimension_numbers = #tpu.dot_dimension_numbers<[1], [0], [0], [1], [0, 0, 1, 1], [], []>} : vector<8x128xbf16>, vector<128x512xbf16>, vector<8x512xf32> -> vector<8x512xf32>
    %96 = arith.addf %93, %95 : vector<8x512xf32>
    %97 = vector.extract_strided_slice %96 {offsets = [0, 0], sizes = [8, 384], strides = [1, 1]} : vector<8x512xf32> to vector<8x384xf32>
    %98 = arith.negf %97 : vector<8x384xf32>
    %99 = math.exp %98 : vector<8x384xf32>
    %cst_27 = arith.constant 1.000000e+00 : f32
    %100 = vector.broadcast %cst_27 : f32 to vector<8x384xf32>
    %101 = arith.addf %100, %99 : vector<8x384xf32>
    %102 = arith.divf %100, %101 : vector<8x384xf32>
    %103 = vector.extract_strided_slice %102 {offsets = [0, 0], sizes = [8, 128], strides = [1, 1]} : vector<8x384xf32> to vector<8x128xf32>
    %104 = vector.extract_strided_slice %102 {offsets = [0, 128], sizes = [8, 128], strides = [1, 1]} : vector<8x384xf32> to vector<8x128xf32>
    %105 = vector.extract_strided_slice %102 {offsets = [0, 256], sizes = [8, 128], strides = [1, 1]} : vector<8x384xf32> to vector<8x128xf32>
    %106 = vector.extract_strided_slice %96 {offsets = [0, 384], sizes = [8, 128], strides = [1, 1]} : vector<8x512xf32> to vector<8x128xf32>
    %107 = math.tanh %106 : vector<8x128xf32>
    %108 = arith.mulf %104, %82 : vector<8x128xf32>
    %109 = arith.mulf %103, %107 : vector<8x128xf32>
    %110 = arith.addf %108, %109 : vector<8x128xf32>
    %111 = math.tanh %110 : vector<8x128xf32>
    %112 = arith.mulf %105, %111 : vector<8x128xf32>
    %113 = arith.truncf %112 : vector<8x128xf32> to vector<8x128xbf16>
    %114 = arith.index_cast %c3_i32 : i32 to index
    %c0_28 = arith.constant 0 : index
    %c0_29 = arith.constant 0 : index
    %115 = vector.load %arg3[%114, %c0_28, %c0_29] : memref<8x8x128xbf16, #tpu.memory_space<vmem>>, vector<1x8x128xbf16>
    %116 = vector.shape_cast %115 : vector<1x8x128xbf16> to vector<8x128xbf16>
    %117 = vector.shape_cast %113 : vector<8x128xbf16> to vector<1x8x128xbf16>
    tpu.vector_store %arg3[%114, %c0_28, %c0_29], %117 {strides = array<i32>} : memref<8x8x128xbf16, #tpu.memory_space<vmem>>, vector<1x8x128xbf16>,
    %c4_i32 = arith.constant 4 : i32
    %118 = arith.index_cast %c4_i32 : i32 to index
    %c0_30 = arith.constant 0 : index
    %c0_31 = arith.constant 0 : index
    %119 = vector.load %arg1[%118, %c0_30, %c0_31] : memref<8x8x512xbf16, #tpu.memory_space<vmem>>, vector<1x8x512xbf16>
    %120 = vector.shape_cast %119 : vector<1x8x512xbf16> to vector<8x512xbf16>
    %121 = arith.extf %120 : vector<8x512xbf16> to vector<8x512xf32>
    %122 = arith.truncf %112 : vector<8x128xf32> to vector<8x128xbf16>
    %cst_32 = arith.constant dense<0.000000e+00> : vector<8x512xf32>
    %123 = tpu.matmul %122, %3, %cst_32 {dimension_numbers = #tpu.dot_dimension_numbers<[1], [0], [0], [1], [0, 0, 1, 1], [], []>} : vector<8x128xbf16>, vector<128x512xbf16>, vector<8x512xf32> -> vector<8x512xf32>
    %124 = arith.addf %121, %123 : vector<8x512xf32>
    %125 = vector.extract_strided_slice %124 {offsets = [0, 0], sizes = [8, 384], strides = [1, 1]} : vector<8x512xf32> to vector<8x384xf32>
    %126 = arith.negf %125 : vector<8x384xf32>
    %127 = math.exp %126 : vector<8x384xf32>
    %cst_33 = arith.constant 1.000000e+00 : f32
    %128 = vector.broadcast %cst_33 : f32 to vector<8x384xf32>
    %129 = arith.addf %128, %127 : vector<8x384xf32>
    %130 = arith.divf %128, %129 : vector<8x384xf32>
    %131 = vector.extract_strided_slice %130 {offsets = [0, 0], sizes = [8, 128], strides = [1, 1]} : vector<8x384xf32> to vector<8x128xf32>
    %132 = vector.extract_strided_slice %130 {offsets = [0, 128], sizes = [8, 128], strides = [1, 1]} : vector<8x384xf32> to vector<8x128xf32>
    %133 = vector.extract_strided_slice %130 {offsets = [0, 256], sizes = [8, 128], strides = [1, 1]} : vector<8x384xf32> to vector<8x128xf32>
    %134 = vector.extract_strided_slice %124 {offsets = [0, 384], sizes = [8, 128], strides = [1, 1]} : vector<8x512xf32> to vector<8x128xf32>
    %135 = math.tanh %134 : vector<8x128xf32>
    %136 = arith.mulf %132, %110 : vector<8x128xf32>
    %137 = arith.mulf %131, %135 : vector<8x128xf32>
    %138 = arith.addf %136, %137 : vector<8x128xf32>
    %139 = math.tanh %138 : vector<8x128xf32>
    %140 = arith.mulf %133, %139 : vector<8x128xf32>
    %141 = arith.truncf %140 : vector<8x128xf32> to vector<8x128xbf16>
    %142 = arith.index_cast %c4_i32 : i32 to index
    %c0_34 = arith.constant 0 : index
    %c0_35 = arith.constant 0 : index
    %143 = vector.load %arg3[%142, %c0_34, %c0_35] : memref<8x8x128xbf16, #tpu.memory_space<vmem>>, vector<1x8x128xbf16>
    %144 = vector.shape_cast %143 : vector<1x8x128xbf16> to vector<8x128xbf16>
    %145 = vector.shape_cast %141 : vector<8x128xbf16> to vector<1x8x128xbf16>
    tpu.vector_store %arg3[%142, %c0_34, %c0_35], %145 {strides = array<i32>} : memref<8x8x128xbf16, #tpu.memory_space<vmem>>, vector<1x8x128xbf16>,
    %c5_i32 = arith.constant 5 : i32
    %146 = arith.index_cast %c5_i32 : i32 to index
    %c0_36 = arith.constant 0 : index
    %c0_37 = arith.constant 0 : index
    %147 = vector.load %arg1[%146, %c0_36, %c0_37] : memref<8x8x512xbf16, #tpu.memory_space<vmem>>, vector<1x8x512xbf16>
    %148 = vector.shape_cast %147 : vector<1x8x512xbf16> to vector<8x512xbf16>
    %149 = arith.extf %148 : vector<8x512xbf16> to vector<8x512xf32>
    %150 = arith.truncf %140 : vector<8x128xf32> to vector<8x128xbf16>
    %cst_38 = arith.constant dense<0.000000e+00> : vector<8x512xf32>
    %151 = tpu.matmul %150, %3, %cst_38 {dimension_numbers = #tpu.dot_dimension_numbers<[1], [0], [0], [1], [0, 0, 1, 1], [], []>} : vector<8x128xbf16>, vector<128x512xbf16>, vector<8x512xf32> -> vector<8x512xf32>
    %152 = arith.addf %149, %151 : vector<8x512xf32>
    %153 = vector.extract_strided_slice %152 {offsets = [0, 0], sizes = [8, 384], strides = [1, 1]} : vector<8x512xf32> to vector<8x384xf32>
    %154 = arith.negf %153 : vector<8x384xf32>
    %155 = math.exp %154 : vector<8x384xf32>
    %cst_39 = arith.constant 1.000000e+00 : f32
    %156 = vector.broadcast %cst_39 : f32 to vector<8x384xf32>
    %157 = arith.addf %156, %155 : vector<8x384xf32>
    %158 = arith.divf %156, %157 : vector<8x384xf32>
    %159 = vector.extract_strided_slice %158 {offsets = [0, 0], sizes = [8, 128], strides = [1, 1]} : vector<8x384xf32> to vector<8x128xf32>
    %160 = vector.extract_strided_slice %158 {offsets = [0, 128], sizes = [8, 128], strides = [1, 1]} : vector<8x384xf32> to vector<8x128xf32>
    %161 = vector.extract_strided_slice %158 {offsets = [0, 256], sizes = [8, 128], strides = [1, 1]} : vector<8x384xf32> to vector<8x128xf32>
    %162 = vector.extract_strided_slice %152 {offsets = [0, 384], sizes = [8, 128], strides = [1, 1]} : vector<8x512xf32> to vector<8x128xf32>
    %163 = math.tanh %162 : vector<8x128xf32>
    %164 = arith.mulf %160, %138 : vector<8x128xf32>
    %165 = arith.mulf %159, %163 : vector<8x128xf32>
    %166 = arith.addf %164, %165 : vector<8x128xf32>
    %167 = math.tanh %166 : vector<8x128xf32>
    %168 = arith.mulf %161, %167 : vector<8x128xf32>
    %169 = arith.truncf %168 : vector<8x128xf32> to vector<8x128xbf16>
    %170 = arith.index_cast %c5_i32 : i32 to index
    %c0_40 = arith.constant 0 : index
    %c0_41 = arith.constant 0 : index
    %171 = vector.load %arg3[%170, %c0_40, %c0_41] : memref<8x8x128xbf16, #tpu.memory_space<vmem>>, vector<1x8x128xbf16>
    %172 = vector.shape_cast %171 : vector<1x8x128xbf16> to vector<8x128xbf16>
    %173 = vector.shape_cast %169 : vector<8x128xbf16> to vector<1x8x128xbf16>
    tpu.vector_store %arg3[%170, %c0_40, %c0_41], %173 {strides = array<i32>} : memref<8x8x128xbf16, #tpu.memory_space<vmem>>, vector<1x8x128xbf16>,
    %c6_i32 = arith.constant 6 : i32
    %174 = arith.index_cast %c6_i32 : i32 to index
    %c0_42 = arith.constant 0 : index
    %c0_43 = arith.constant 0 : index
    %175 = vector.load %arg1[%174, %c0_42, %c0_43] : memref<8x8x512xbf16, #tpu.memory_space<vmem>>, vector<1x8x512xbf16>
    %176 = vector.shape_cast %175 : vector<1x8x512xbf16> to vector<8x512xbf16>
    %177 = arith.extf %176 : vector<8x512xbf16> to vector<8x512xf32>
    %178 = arith.truncf %168 : vector<8x128xf32> to vector<8x128xbf16>
    %cst_44 = arith.constant dense<0.000000e+00> : vector<8x512xf32>
    %179 = tpu.matmul %178, %3, %cst_44 {dimension_numbers = #tpu.dot_dimension_numbers<[1], [0], [0], [1], [0, 0, 1, 1], [], []>} : vector<8x128xbf16>, vector<128x512xbf16>, vector<8x512xf32> -> vector<8x512xf32>
    %180 = arith.addf %177, %179 : vector<8x512xf32>
    %181 = vector.extract_strided_slice %180 {offsets = [0, 0], sizes = [8, 384], strides = [1, 1]} : vector<8x512xf32> to vector<8x384xf32>
    %182 = arith.negf %181 : vector<8x384xf32>
    %183 = math.exp %182 : vector<8x384xf32>
    %cst_45 = arith.constant 1.000000e+00 : f32
    %184 = vector.broadcast %cst_45 : f32 to vector<8x384xf32>
    %185 = arith.addf %184, %183 : vector<8x384xf32>
    %186 = arith.divf %184, %185 : vector<8x384xf32>
    %187 = vector.extract_strided_slice %186 {offsets = [0, 0], sizes = [8, 128], strides = [1, 1]} : vector<8x384xf32> to vector<8x128xf32>
    %188 = vector.extract_strided_slice %186 {offsets = [0, 128], sizes = [8, 128], strides = [1, 1]} : vector<8x384xf32> to vector<8x128xf32>
    %189 = vector.extract_strided_slice %186 {offsets = [0, 256], sizes = [8, 128], strides = [1, 1]} : vector<8x384xf32> to vector<8x128xf32>
    %190 = vector.extract_strided_slice %180 {offsets = [0, 384], sizes = [8, 128], strides = [1, 1]} : vector<8x512xf32> to vector<8x128xf32>
    %191 = math.tanh %190 : vector<8x128xf32>
    %192 = arith.mulf %188, %166 : vector<8x128xf32>
    %193 = arith.mulf %187, %191 : vector<8x128xf32>
    %194 = arith.addf %192, %193 : vector<8x128xf32>
    %195 = math.tanh %194 : vector<8x128xf32>
    %196 = arith.mulf %189, %195 : vector<8x128xf32>
    %197 = arith.truncf %196 : vector<8x128xf32> to vector<8x128xbf16>
    %198 = arith.index_cast %c6_i32 : i32 to index
    %c0_46 = arith.constant 0 : index
    %c0_47 = arith.constant 0 : index
    %199 = vector.load %arg3[%198, %c0_46, %c0_47] : memref<8x8x128xbf16, #tpu.memory_space<vmem>>, vector<1x8x128xbf16>
    %200 = vector.shape_cast %199 : vector<1x8x128xbf16> to vector<8x128xbf16>
    %201 = vector.shape_cast %197 : vector<8x128xbf16> to vector<1x8x128xbf16>
    tpu.vector_store %arg3[%198, %c0_46, %c0_47], %201 {strides = array<i32>} : memref<8x8x128xbf16, #tpu.memory_space<vmem>>, vector<1x8x128xbf16>,
    %c7_i32 = arith.constant 7 : i32
    %202 = arith.index_cast %c7_i32 : i32 to index
    %c0_48 = arith.constant 0 : index
    %c0_49 = arith.constant 0 : index
    %203 = vector.load %arg1[%202, %c0_48, %c0_49] : memref<8x8x512xbf16, #tpu.memory_space<vmem>>, vector<1x8x512xbf16>
    %204 = vector.shape_cast %203 : vector<1x8x512xbf16> to vector<8x512xbf16>
    %205 = arith.extf %204 : vector<8x512xbf16> to vector<8x512xf32>
    %206 = arith.truncf %196 : vector<8x128xf32> to vector<8x128xbf16>
    %cst_50 = arith.constant dense<0.000000e+00> : vector<8x512xf32>
    %207 = tpu.matmul %206, %3, %cst_50 {dimension_numbers = #tpu.dot_dimension_numbers<[1], [0], [0], [1], [0, 0, 1, 1], [], []>} : vector<8x128xbf16>, vector<128x512xbf16>, vector<8x512xf32> -> vector<8x512xf32>
    %208 = arith.addf %205, %207 : vector<8x512xf32>
    %209 = vector.extract_strided_slice %208 {offsets = [0, 0], sizes = [8, 384], strides = [1, 1]} : vector<8x512xf32> to vector<8x384xf32>
    %210 = arith.negf %209 : vector<8x384xf32>
    %211 = math.exp %210 : vector<8x384xf32>
    %cst_51 = arith.constant 1.000000e+00 : f32
    %212 = vector.broadcast %cst_51 : f32 to vector<8x384xf32>
    %213 = arith.addf %212, %211 : vector<8x384xf32>
    %214 = arith.divf %212, %213 : vector<8x384xf32>
    %215 = vector.extract_strided_slice %214 {offsets = [0, 0], sizes = [8, 128], strides = [1, 1]} : vector<8x384xf32> to vector<8x128xf32>
    %216 = vector.extract_strided_slice %214 {offsets = [0, 128], sizes = [8, 128], strides = [1, 1]} : vector<8x384xf32> to vector<8x128xf32>
    %217 = vector.extract_strided_slice %214 {offsets = [0, 256], sizes = [8, 128], strides = [1, 1]} : vector<8x384xf32> to vector<8x128xf32>
    %218 = vector.extract_strided_slice %208 {offsets = [0, 384], sizes = [8, 128], strides = [1, 1]} : vector<8x512xf32> to vector<8x128xf32>
    %219 = math.tanh %218 : vector<8x128xf32>
    %220 = arith.mulf %216, %194 : vector<8x128xf32>
    %221 = arith.mulf %215, %219 : vector<8x128xf32>
    %222 = arith.addf %220, %221 : vector<8x128xf32>
    %223 = math.tanh %222 : vector<8x128xf32>
    %224 = arith.mulf %217, %223 : vector<8x128xf32>
    %225 = arith.truncf %224 : vector<8x128xf32> to vector<8x128xbf16>
    %226 = arith.index_cast %c7_i32 : i32 to index
    %c0_52 = arith.constant 0 : index
    %c0_53 = arith.constant 0 : index
    %227 = vector.load %arg3[%226, %c0_52, %c0_53] : memref<8x8x128xbf16, #tpu.memory_space<vmem>>, vector<1x8x128xbf16>
    %228 = vector.shape_cast %227 : vector<1x8x128xbf16> to vector<8x128xbf16>
    %229 = vector.shape_cast %225 : vector<8x128xbf16> to vector<1x8x128xbf16>
    tpu.vector_store %arg3[%226, %c0_52, %c0_53], %229 {strides = array<i32>} : memref<8x8x128xbf16, #tpu.memory_space<vmem>>, vector<1x8x128xbf16>,
    %c8_i32 = arith.constant 8 : i32
    %c0_54 = arith.constant 0 : index
    %c0_55 = arith.constant 0 : index
    %230 = vector.load %arg4[%c0_54, %c0_55] : memref<8x128xf32, #tpu.memory_space<vmem>>, vector<8x128xf32>
    tpu.vector_store %arg4[%c0_54, %c0_55], %224 {strides = array<i32>} : memref<8x128xf32, #tpu.memory_space<vmem>>, vector<8x128xf32>,
    %c0_56 = arith.constant 0 : index
    %c0_57 = arith.constant 0 : index
    %231 = vector.load %arg5[%c0_56, %c0_57] : memref<8x128xf32, #tpu.memory_space<vmem>>, vector<8x128xf32>
    tpu.vector_store %arg5[%c0_56, %c0_57], %222 {strides = array<i32>} : memref<8x128xf32, #tpu.memory_space<vmem>>, vector<8x128xf32>,
    return
  }
  func.func @transform_0(%arg0: i32) -> (i32, i32, i32) {
    %c0_i32 = arith.constant 0 : i32
    %c0_i32_0 = arith.constant 0 : i32
    %c0_i32_1 = arith.constant 0 : i32
    return %arg0, %c0_i32, %c0_i32_0 : i32, i32, i32
  }
  func.func @transform_1(%arg0: i32) -> (i32, i32) {
    %c0_i32 = arith.constant 0 : i32
    %c0_i32_0 = arith.constant 0 : i32
    %c0_i32_1 = arith.constant 0 : i32
    return %c0_i32, %c0_i32_0 : i32, i32
  }
  func.func @transform_2(%arg0: i32) -> (i32, i32, i32) {
    %c0_i32 = arith.constant 0 : i32
    %c0_i32_0 = arith.constant 0 : i32
    %c0_i32_1 = arith.constant 0 : i32
    return %arg0, %c0_i32, %c0_i32_0 : i32, i32, i32
  }
}

module attributes {stable_mosaic.version = 11 : i64} {
  func.func @lstm_last_fc_kernel(%arg0: i32, %arg1: memref<8x8x512xbf16, #tpu.memory_space<vmem>>, %arg2: memref<128x512xbf16, #tpu.memory_space<vmem>>, %arg3: memref<128x128xbf16, #tpu.memory_space<vmem>>, %arg4: memref<1x128xf32, #tpu.memory_space<vmem>>, %arg5: memref<8x128xf32, #tpu.memory_space<vmem>>, %arg6: memref<8x128xf32, #tpu.memory_space<vmem>>, %arg7: memref<8x128xf32, #tpu.memory_space<vmem>>) attributes {dimension_semantics = [#tpu.dimension_semantics<arbitrary>], iteration_bounds = array<i64: 1>, scalar_prefetch = 0 : i64, scratch_operands = 2 : i64, tpu.core_type = #tpu.core_type<tc>, window_params = [{transform_indices = @transform_0, window_bounds = array<i64: 8, 8, 512>}, {pipeline_mode = #tpu.pipeline_mode<synchronous>, transform_indices = @transform_1, window_bounds = array<i64: 128, 512>}, {pipeline_mode = #tpu.pipeline_mode<synchronous>, transform_indices = @transform_2, window_bounds = array<i64: 128, 128>}, {pipeline_mode = #tpu.pipeline_mode<synchronous>, transform_indices = @transform_3, window_bounds = array<i64: 1, 128>}, {pipeline_mode = #tpu.pipeline_mode<synchronous>, transform_indices = @transform_4, window_bounds = array<i64: 8, 128>}]} {
    %c0_i32 = arith.constant 0 : i32
    %0 = arith.cmpi eq, %arg0, %c0_i32 : i32
    %1 = arith.extui %0 : i1 to i32
    %c0_i32_0 = arith.constant 0 : i32
    %2 = arith.cmpi ne, %1, %c0_i32_0 : i32
    scf.if %2 {
      %cst_44 = arith.constant 0.000000e+00 : f32
      %195 = vector.broadcast %cst_44 : f32 to vector<8x128xf32>
      %c0_45 = arith.constant 0 : index
      %c0_46 = arith.constant 0 : index
      %196 = vector.load %arg6[%c0_45, %c0_46] : memref<8x128xf32, #tpu.memory_space<vmem>>, vector<8x128xf32>
      tpu.vector_store %arg6[%c0_45, %c0_46], %195 {strides = array<i32>} : memref<8x128xf32, #tpu.memory_space<vmem>>, vector<8x128xf32>,
      %cst_47 = arith.constant 0.000000e+00 : f32
      %197 = vector.broadcast %cst_47 : f32 to vector<8x128xf32>
      %c0_48 = arith.constant 0 : index
      %c0_49 = arith.constant 0 : index
      %198 = vector.load %arg7[%c0_48, %c0_49] : memref<8x128xf32, #tpu.memory_space<vmem>>, vector<8x128xf32>
      tpu.vector_store %arg7[%c0_48, %c0_49], %197 {strides = array<i32>} : memref<8x128xf32, #tpu.memory_space<vmem>>, vector<8x128xf32>,
    } else {
    }
    %c0 = arith.constant 0 : index
    %c0_1 = arith.constant 0 : index
    %3 = vector.load %arg2[%c0, %c0_1] : memref<128x512xbf16, #tpu.memory_space<vmem>>, vector<128x512xbf16>
    %c0_2 = arith.constant 0 : index
    %c0_3 = arith.constant 0 : index
    %4 = vector.load %arg6[%c0_2, %c0_3] : memref<8x128xf32, #tpu.memory_space<vmem>>, vector<8x128xf32>
    %c0_4 = arith.constant 0 : index
    %c0_5 = arith.constant 0 : index
    %5 = vector.load %arg7[%c0_4, %c0_5] : memref<8x128xf32, #tpu.memory_space<vmem>>, vector<8x128xf32>
    %c0_i32_6 = arith.constant 0 : i32
    %6 = arith.index_cast %c0_i32_6 : i32 to index
    %c0_7 = arith.constant 0 : index
    %c0_8 = arith.constant 0 : index
    %7 = vector.load %arg1[%6, %c0_7, %c0_8] : memref<8x8x512xbf16, #tpu.memory_space<vmem>>, vector<1x8x512xbf16>
    %8 = vector.shape_cast %7 : vector<1x8x512xbf16> to vector<8x512xbf16>
    %9 = arith.extf %8 : vector<8x512xbf16> to vector<8x512xf32>
    %10 = arith.truncf %4 : vector<8x128xf32> to vector<8x128xbf16>
    %cst = arith.constant dense<0.000000e+00> : vector<8x512xf32>
    %11 = tpu.matmul %10, %3, %cst {dimension_numbers = #tpu.dot_dimension_numbers<[1], [0], [0], [1], [0, 0, 1, 1], [], []>} : vector<8x128xbf16>, vector<128x512xbf16>, vector<8x512xf32> -> vector<8x512xf32>
    %12 = arith.addf %9, %11 : vector<8x512xf32>
    %13 = vector.extract_strided_slice %12 {offsets = [0, 0], sizes = [8, 384], strides = [1, 1]} : vector<8x512xf32> to vector<8x384xf32>
    %14 = arith.negf %13 : vector<8x384xf32>
    %15 = math.exp %14 : vector<8x384xf32>
    %cst_9 = arith.constant 1.000000e+00 : f32
    %16 = vector.broadcast %cst_9 : f32 to vector<8x384xf32>
    %17 = arith.addf %16, %15 : vector<8x384xf32>
    %18 = arith.divf %16, %17 : vector<8x384xf32>
    %19 = vector.extract_strided_slice %18 {offsets = [0, 0], sizes = [8, 128], strides = [1, 1]} : vector<8x384xf32> to vector<8x128xf32>
    %20 = vector.extract_strided_slice %18 {offsets = [0, 128], sizes = [8, 128], strides = [1, 1]} : vector<8x384xf32> to vector<8x128xf32>
    %21 = vector.extract_strided_slice %18 {offsets = [0, 256], sizes = [8, 128], strides = [1, 1]} : vector<8x384xf32> to vector<8x128xf32>
    %22 = vector.extract_strided_slice %12 {offsets = [0, 384], sizes = [8, 128], strides = [1, 1]} : vector<8x512xf32> to vector<8x128xf32>
    %23 = math.tanh %22 : vector<8x128xf32>
    %24 = arith.mulf %20, %5 : vector<8x128xf32>
    %25 = arith.mulf %19, %23 : vector<8x128xf32>
    %26 = arith.addf %24, %25 : vector<8x128xf32>
    %27 = math.tanh %26 : vector<8x128xf32>
    %28 = arith.mulf %21, %27 : vector<8x128xf32>
    %c1_i32 = arith.constant 1 : i32
    %29 = arith.index_cast %c1_i32 : i32 to index
    %c0_10 = arith.constant 0 : index
    %c0_11 = arith.constant 0 : index
    %30 = vector.load %arg1[%29, %c0_10, %c0_11] : memref<8x8x512xbf16, #tpu.memory_space<vmem>>, vector<1x8x512xbf16>
    %31 = vector.shape_cast %30 : vector<1x8x512xbf16> to vector<8x512xbf16>
    %32 = arith.extf %31 : vector<8x512xbf16> to vector<8x512xf32>
    %33 = arith.truncf %28 : vector<8x128xf32> to vector<8x128xbf16>
    %cst_12 = arith.constant dense<0.000000e+00> : vector<8x512xf32>
    %34 = tpu.matmul %33, %3, %cst_12 {dimension_numbers = #tpu.dot_dimension_numbers<[1], [0], [0], [1], [0, 0, 1, 1], [], []>} : vector<8x128xbf16>, vector<128x512xbf16>, vector<8x512xf32> -> vector<8x512xf32>
    %35 = arith.addf %32, %34 : vector<8x512xf32>
    %36 = vector.extract_strided_slice %35 {offsets = [0, 0], sizes = [8, 384], strides = [1, 1]} : vector<8x512xf32> to vector<8x384xf32>
    %37 = arith.negf %36 : vector<8x384xf32>
    %38 = math.exp %37 : vector<8x384xf32>
    %cst_13 = arith.constant 1.000000e+00 : f32
    %39 = vector.broadcast %cst_13 : f32 to vector<8x384xf32>
    %40 = arith.addf %39, %38 : vector<8x384xf32>
    %41 = arith.divf %39, %40 : vector<8x384xf32>
    %42 = vector.extract_strided_slice %41 {offsets = [0, 0], sizes = [8, 128], strides = [1, 1]} : vector<8x384xf32> to vector<8x128xf32>
    %43 = vector.extract_strided_slice %41 {offsets = [0, 128], sizes = [8, 128], strides = [1, 1]} : vector<8x384xf32> to vector<8x128xf32>
    %44 = vector.extract_strided_slice %41 {offsets = [0, 256], sizes = [8, 128], strides = [1, 1]} : vector<8x384xf32> to vector<8x128xf32>
    %45 = vector.extract_strided_slice %35 {offsets = [0, 384], sizes = [8, 128], strides = [1, 1]} : vector<8x512xf32> to vector<8x128xf32>
    %46 = math.tanh %45 : vector<8x128xf32>
    %47 = arith.mulf %43, %26 : vector<8x128xf32>
    %48 = arith.mulf %42, %46 : vector<8x128xf32>
    %49 = arith.addf %47, %48 : vector<8x128xf32>
    %50 = math.tanh %49 : vector<8x128xf32>
    %51 = arith.mulf %44, %50 : vector<8x128xf32>
    %c2_i32 = arith.constant 2 : i32
    %52 = arith.index_cast %c2_i32 : i32 to index
    %c0_14 = arith.constant 0 : index
    %c0_15 = arith.constant 0 : index
    %53 = vector.load %arg1[%52, %c0_14, %c0_15] : memref<8x8x512xbf16, #tpu.memory_space<vmem>>, vector<1x8x512xbf16>
    %54 = vector.shape_cast %53 : vector<1x8x512xbf16> to vector<8x512xbf16>
    %55 = arith.extf %54 : vector<8x512xbf16> to vector<8x512xf32>
    %56 = arith.truncf %51 : vector<8x128xf32> to vector<8x128xbf16>
    %cst_16 = arith.constant dense<0.000000e+00> : vector<8x512xf32>
    %57 = tpu.matmul %56, %3, %cst_16 {dimension_numbers = #tpu.dot_dimension_numbers<[1], [0], [0], [1], [0, 0, 1, 1], [], []>} : vector<8x128xbf16>, vector<128x512xbf16>, vector<8x512xf32> -> vector<8x512xf32>
    %58 = arith.addf %55, %57 : vector<8x512xf32>
    %59 = vector.extract_strided_slice %58 {offsets = [0, 0], sizes = [8, 384], strides = [1, 1]} : vector<8x512xf32> to vector<8x384xf32>
    %60 = arith.negf %59 : vector<8x384xf32>
    %61 = math.exp %60 : vector<8x384xf32>
    %cst_17 = arith.constant 1.000000e+00 : f32
    %62 = vector.broadcast %cst_17 : f32 to vector<8x384xf32>
    %63 = arith.addf %62, %61 : vector<8x384xf32>
    %64 = arith.divf %62, %63 : vector<8x384xf32>
    %65 = vector.extract_strided_slice %64 {offsets = [0, 0], sizes = [8, 128], strides = [1, 1]} : vector<8x384xf32> to vector<8x128xf32>
    %66 = vector.extract_strided_slice %64 {offsets = [0, 128], sizes = [8, 128], strides = [1, 1]} : vector<8x384xf32> to vector<8x128xf32>
    %67 = vector.extract_strided_slice %64 {offsets = [0, 256], sizes = [8, 128], strides = [1, 1]} : vector<8x384xf32> to vector<8x128xf32>
    %68 = vector.extract_strided_slice %58 {offsets = [0, 384], sizes = [8, 128], strides = [1, 1]} : vector<8x512xf32> to vector<8x128xf32>
    %69 = math.tanh %68 : vector<8x128xf32>
    %70 = arith.mulf %66, %49 : vector<8x128xf32>
    %71 = arith.mulf %65, %69 : vector<8x128xf32>
    %72 = arith.addf %70, %71 : vector<8x128xf32>
    %73 = math.tanh %72 : vector<8x128xf32>
    %74 = arith.mulf %67, %73 : vector<8x128xf32>
    %c3_i32 = arith.constant 3 : i32
    %75 = arith.index_cast %c3_i32 : i32 to index
    %c0_18 = arith.constant 0 : index
    %c0_19 = arith.constant 0 : index
    %76 = vector.load %arg1[%75, %c0_18, %c0_19] : memref<8x8x512xbf16, #tpu.memory_space<vmem>>, vector<1x8x512xbf16>
    %77 = vector.shape_cast %76 : vector<1x8x512xbf16> to vector<8x512xbf16>
    %78 = arith.extf %77 : vector<8x512xbf16> to vector<8x512xf32>
    %79 = arith.truncf %74 : vector<8x128xf32> to vector<8x128xbf16>
    %cst_20 = arith.constant dense<0.000000e+00> : vector<8x512xf32>
    %80 = tpu.matmul %79, %3, %cst_20 {dimension_numbers = #tpu.dot_dimension_numbers<[1], [0], [0], [1], [0, 0, 1, 1], [], []>} : vector<8x128xbf16>, vector<128x512xbf16>, vector<8x512xf32> -> vector<8x512xf32>
    %81 = arith.addf %78, %80 : vector<8x512xf32>
    %82 = vector.extract_strided_slice %81 {offsets = [0, 0], sizes = [8, 384], strides = [1, 1]} : vector<8x512xf32> to vector<8x384xf32>
    %83 = arith.negf %82 : vector<8x384xf32>
    %84 = math.exp %83 : vector<8x384xf32>
    %cst_21 = arith.constant 1.000000e+00 : f32
    %85 = vector.broadcast %cst_21 : f32 to vector<8x384xf32>
    %86 = arith.addf %85, %84 : vector<8x384xf32>
    %87 = arith.divf %85, %86 : vector<8x384xf32>
    %88 = vector.extract_strided_slice %87 {offsets = [0, 0], sizes = [8, 128], strides = [1, 1]} : vector<8x384xf32> to vector<8x128xf32>
    %89 = vector.extract_strided_slice %87 {offsets = [0, 128], sizes = [8, 128], strides = [1, 1]} : vector<8x384xf32> to vector<8x128xf32>
    %90 = vector.extract_strided_slice %87 {offsets = [0, 256], sizes = [8, 128], strides = [1, 1]} : vector<8x384xf32> to vector<8x128xf32>
    %91 = vector.extract_strided_slice %81 {offsets = [0, 384], sizes = [8, 128], strides = [1, 1]} : vector<8x512xf32> to vector<8x128xf32>
    %92 = math.tanh %91 : vector<8x128xf32>
    %93 = arith.mulf %89, %72 : vector<8x128xf32>
    %94 = arith.mulf %88, %92 : vector<8x128xf32>
    %95 = arith.addf %93, %94 : vector<8x128xf32>
    %96 = math.tanh %95 : vector<8x128xf32>
    %97 = arith.mulf %90, %96 : vector<8x128xf32>
    %c4_i32 = arith.constant 4 : i32
    %98 = arith.index_cast %c4_i32 : i32 to index
    %c0_22 = arith.constant 0 : index
    %c0_23 = arith.constant 0 : index
    %99 = vector.load %arg1[%98, %c0_22, %c0_23] : memref<8x8x512xbf16, #tpu.memory_space<vmem>>, vector<1x8x512xbf16>
    %100 = vector.shape_cast %99 : vector<1x8x512xbf16> to vector<8x512xbf16>
    %101 = arith.extf %100 : vector<8x512xbf16> to vector<8x512xf32>
    %102 = arith.truncf %97 : vector<8x128xf32> to vector<8x128xbf16>
    %cst_24 = arith.constant dense<0.000000e+00> : vector<8x512xf32>
    %103 = tpu.matmul %102, %3, %cst_24 {dimension_numbers = #tpu.dot_dimension_numbers<[1], [0], [0], [1], [0, 0, 1, 1], [], []>} : vector<8x128xbf16>, vector<128x512xbf16>, vector<8x512xf32> -> vector<8x512xf32>
    %104 = arith.addf %101, %103 : vector<8x512xf32>
    %105 = vector.extract_strided_slice %104 {offsets = [0, 0], sizes = [8, 384], strides = [1, 1]} : vector<8x512xf32> to vector<8x384xf32>
    %106 = arith.negf %105 : vector<8x384xf32>
    %107 = math.exp %106 : vector<8x384xf32>
    %cst_25 = arith.constant 1.000000e+00 : f32
    %108 = vector.broadcast %cst_25 : f32 to vector<8x384xf32>
    %109 = arith.addf %108, %107 : vector<8x384xf32>
    %110 = arith.divf %108, %109 : vector<8x384xf32>
    %111 = vector.extract_strided_slice %110 {offsets = [0, 0], sizes = [8, 128], strides = [1, 1]} : vector<8x384xf32> to vector<8x128xf32>
    %112 = vector.extract_strided_slice %110 {offsets = [0, 128], sizes = [8, 128], strides = [1, 1]} : vector<8x384xf32> to vector<8x128xf32>
    %113 = vector.extract_strided_slice %110 {offsets = [0, 256], sizes = [8, 128], strides = [1, 1]} : vector<8x384xf32> to vector<8x128xf32>
    %114 = vector.extract_strided_slice %104 {offsets = [0, 384], sizes = [8, 128], strides = [1, 1]} : vector<8x512xf32> to vector<8x128xf32>
    %115 = math.tanh %114 : vector<8x128xf32>
    %116 = arith.mulf %112, %95 : vector<8x128xf32>
    %117 = arith.mulf %111, %115 : vector<8x128xf32>
    %118 = arith.addf %116, %117 : vector<8x128xf32>
    %119 = math.tanh %118 : vector<8x128xf32>
    %120 = arith.mulf %113, %119 : vector<8x128xf32>
    %c5_i32 = arith.constant 5 : i32
    %121 = arith.index_cast %c5_i32 : i32 to index
    %c0_26 = arith.constant 0 : index
    %c0_27 = arith.constant 0 : index
    %122 = vector.load %arg1[%121, %c0_26, %c0_27] : memref<8x8x512xbf16, #tpu.memory_space<vmem>>, vector<1x8x512xbf16>
    %123 = vector.shape_cast %122 : vector<1x8x512xbf16> to vector<8x512xbf16>
    %124 = arith.extf %123 : vector<8x512xbf16> to vector<8x512xf32>
    %125 = arith.truncf %120 : vector<8x128xf32> to vector<8x128xbf16>
    %cst_28 = arith.constant dense<0.000000e+00> : vector<8x512xf32>
    %126 = tpu.matmul %125, %3, %cst_28 {dimension_numbers = #tpu.dot_dimension_numbers<[1], [0], [0], [1], [0, 0, 1, 1], [], []>} : vector<8x128xbf16>, vector<128x512xbf16>, vector<8x512xf32> -> vector<8x512xf32>
    %127 = arith.addf %124, %126 : vector<8x512xf32>
    %128 = vector.extract_strided_slice %127 {offsets = [0, 0], sizes = [8, 384], strides = [1, 1]} : vector<8x512xf32> to vector<8x384xf32>
    %129 = arith.negf %128 : vector<8x384xf32>
    %130 = math.exp %129 : vector<8x384xf32>
    %cst_29 = arith.constant 1.000000e+00 : f32
    %131 = vector.broadcast %cst_29 : f32 to vector<8x384xf32>
    %132 = arith.addf %131, %130 : vector<8x384xf32>
    %133 = arith.divf %131, %132 : vector<8x384xf32>
    %134 = vector.extract_strided_slice %133 {offsets = [0, 0], sizes = [8, 128], strides = [1, 1]} : vector<8x384xf32> to vector<8x128xf32>
    %135 = vector.extract_strided_slice %133 {offsets = [0, 128], sizes = [8, 128], strides = [1, 1]} : vector<8x384xf32> to vector<8x128xf32>
    %136 = vector.extract_strided_slice %133 {offsets = [0, 256], sizes = [8, 128], strides = [1, 1]} : vector<8x384xf32> to vector<8x128xf32>
    %137 = vector.extract_strided_slice %127 {offsets = [0, 384], sizes = [8, 128], strides = [1, 1]} : vector<8x512xf32> to vector<8x128xf32>
    %138 = math.tanh %137 : vector<8x128xf32>
    %139 = arith.mulf %135, %118 : vector<8x128xf32>
    %140 = arith.mulf %134, %138 : vector<8x128xf32>
    %141 = arith.addf %139, %140 : vector<8x128xf32>
    %142 = math.tanh %141 : vector<8x128xf32>
    %143 = arith.mulf %136, %142 : vector<8x128xf32>
    %c6_i32 = arith.constant 6 : i32
    %144 = arith.index_cast %c6_i32 : i32 to index
    %c0_30 = arith.constant 0 : index
    %c0_31 = arith.constant 0 : index
    %145 = vector.load %arg1[%144, %c0_30, %c0_31] : memref<8x8x512xbf16, #tpu.memory_space<vmem>>, vector<1x8x512xbf16>
    %146 = vector.shape_cast %145 : vector<1x8x512xbf16> to vector<8x512xbf16>
    %147 = arith.extf %146 : vector<8x512xbf16> to vector<8x512xf32>
    %148 = arith.truncf %143 : vector<8x128xf32> to vector<8x128xbf16>
    %cst_32 = arith.constant dense<0.000000e+00> : vector<8x512xf32>
    %149 = tpu.matmul %148, %3, %cst_32 {dimension_numbers = #tpu.dot_dimension_numbers<[1], [0], [0], [1], [0, 0, 1, 1], [], []>} : vector<8x128xbf16>, vector<128x512xbf16>, vector<8x512xf32> -> vector<8x512xf32>
    %150 = arith.addf %147, %149 : vector<8x512xf32>
    %151 = vector.extract_strided_slice %150 {offsets = [0, 0], sizes = [8, 384], strides = [1, 1]} : vector<8x512xf32> to vector<8x384xf32>
    %152 = arith.negf %151 : vector<8x384xf32>
    %153 = math.exp %152 : vector<8x384xf32>
    %cst_33 = arith.constant 1.000000e+00 : f32
    %154 = vector.broadcast %cst_33 : f32 to vector<8x384xf32>
    %155 = arith.addf %154, %153 : vector<8x384xf32>
    %156 = arith.divf %154, %155 : vector<8x384xf32>
    %157 = vector.extract_strided_slice %156 {offsets = [0, 0], sizes = [8, 128], strides = [1, 1]} : vector<8x384xf32> to vector<8x128xf32>
    %158 = vector.extract_strided_slice %156 {offsets = [0, 128], sizes = [8, 128], strides = [1, 1]} : vector<8x384xf32> to vector<8x128xf32>
    %159 = vector.extract_strided_slice %156 {offsets = [0, 256], sizes = [8, 128], strides = [1, 1]} : vector<8x384xf32> to vector<8x128xf32>
    %160 = vector.extract_strided_slice %150 {offsets = [0, 384], sizes = [8, 128], strides = [1, 1]} : vector<8x512xf32> to vector<8x128xf32>
    %161 = math.tanh %160 : vector<8x128xf32>
    %162 = arith.mulf %158, %141 : vector<8x128xf32>
    %163 = arith.mulf %157, %161 : vector<8x128xf32>
    %164 = arith.addf %162, %163 : vector<8x128xf32>
    %165 = math.tanh %164 : vector<8x128xf32>
    %166 = arith.mulf %159, %165 : vector<8x128xf32>
    %c7_i32 = arith.constant 7 : i32
    %167 = arith.index_cast %c7_i32 : i32 to index
    %c0_34 = arith.constant 0 : index
    %c0_35 = arith.constant 0 : index
    %168 = vector.load %arg1[%167, %c0_34, %c0_35] : memref<8x8x512xbf16, #tpu.memory_space<vmem>>, vector<1x8x512xbf16>
    %169 = vector.shape_cast %168 : vector<1x8x512xbf16> to vector<8x512xbf16>
    %170 = arith.extf %169 : vector<8x512xbf16> to vector<8x512xf32>
    %171 = arith.truncf %166 : vector<8x128xf32> to vector<8x128xbf16>
    %cst_36 = arith.constant dense<0.000000e+00> : vector<8x512xf32>
    %172 = tpu.matmul %171, %3, %cst_36 {dimension_numbers = #tpu.dot_dimension_numbers<[1], [0], [0], [1], [0, 0, 1, 1], [], []>} : vector<8x128xbf16>, vector<128x512xbf16>, vector<8x512xf32> -> vector<8x512xf32>
    %173 = arith.addf %170, %172 : vector<8x512xf32>
    %174 = vector.extract_strided_slice %173 {offsets = [0, 0], sizes = [8, 384], strides = [1, 1]} : vector<8x512xf32> to vector<8x384xf32>
    %175 = arith.negf %174 : vector<8x384xf32>
    %176 = math.exp %175 : vector<8x384xf32>
    %cst_37 = arith.constant 1.000000e+00 : f32
    %177 = vector.broadcast %cst_37 : f32 to vector<8x384xf32>
    %178 = arith.addf %177, %176 : vector<8x384xf32>
    %179 = arith.divf %177, %178 : vector<8x384xf32>
    %180 = vector.extract_strided_slice %179 {offsets = [0, 0], sizes = [8, 128], strides = [1, 1]} : vector<8x384xf32> to vector<8x128xf32>
    %181 = vector.extract_strided_slice %179 {offsets = [0, 128], sizes = [8, 128], strides = [1, 1]} : vector<8x384xf32> to vector<8x128xf32>
    %182 = vector.extract_strided_slice %179 {offsets = [0, 256], sizes = [8, 128], strides = [1, 1]} : vector<8x384xf32> to vector<8x128xf32>
    %183 = vector.extract_strided_slice %173 {offsets = [0, 384], sizes = [8, 128], strides = [1, 1]} : vector<8x512xf32> to vector<8x128xf32>
    %184 = math.tanh %183 : vector<8x128xf32>
    %185 = arith.mulf %181, %164 : vector<8x128xf32>
    %186 = arith.mulf %180, %184 : vector<8x128xf32>
    %187 = arith.addf %185, %186 : vector<8x128xf32>
    %188 = math.tanh %187 : vector<8x128xf32>
    %189 = arith.mulf %182, %188 : vector<8x128xf32>
    %c8_i32 = arith.constant 8 : i32
    %c0_38 = arith.constant 0 : index
    %c0_39 = arith.constant 0 : index
    %190 = vector.load %arg6[%c0_38, %c0_39] : memref<8x128xf32, #tpu.memory_space<vmem>>, vector<8x128xf32>
    tpu.vector_store %arg6[%c0_38, %c0_39], %189 {strides = array<i32>} : memref<8x128xf32, #tpu.memory_space<vmem>>, vector<8x128xf32>,
    %c0_40 = arith.constant 0 : index
    %c0_41 = arith.constant 0 : index
    %191 = vector.load %arg7[%c0_40, %c0_41] : memref<8x128xf32, #tpu.memory_space<vmem>>, vector<8x128xf32>
    tpu.vector_store %arg7[%c0_40, %c0_41], %187 {strides = array<i32>} : memref<8x128xf32, #tpu.memory_space<vmem>>, vector<8x128xf32>,
    %c0_i32_42 = arith.constant 0 : i32
    %192 = arith.cmpi eq, %arg0, %c0_i32_42 : i32
    %193 = arith.extui %192 : i1 to i32
    %c0_i32_43 = arith.constant 0 : i32
    %194 = arith.cmpi ne, %193, %c0_i32_43 : i32
    scf.if %194 {
      %c0_44 = arith.constant 0 : index
      %c0_45 = arith.constant 0 : index
      %195 = vector.load %arg6[%c0_44, %c0_45] : memref<8x128xf32, #tpu.memory_space<vmem>>, vector<8x128xf32>
      %196 = arith.truncf %195 : vector<8x128xf32> to vector<8x128xbf16>
      %c0_46 = arith.constant 0 : index
      %c0_47 = arith.constant 0 : index
      %197 = vector.load %arg3[%c0_46, %c0_47] : memref<128x128xbf16, #tpu.memory_space<vmem>>, vector<128x128xbf16>
      %cst_48 = arith.constant dense<0.000000e+00> : vector<8x128xf32>
      %198 = tpu.matmul %196, %197, %cst_48 {dimension_numbers = #tpu.dot_dimension_numbers<[1], [0], [0], [1], [0, 0, 1, 1], [], []>} : vector<8x128xbf16>, vector<128x128xbf16>, vector<8x128xf32> -> vector<8x128xf32>
      %c0_49 = arith.constant 0 : index
      %c0_50 = arith.constant 0 : index
      %199 = vector.load %arg4[%c0_49, %c0_50] : memref<1x128xf32, #tpu.memory_space<vmem>>, vector<1x128xf32>
      %200 = vector.broadcast %199 : vector<1x128xf32> to vector<8x128xf32>
      %201 = arith.addf %198, %200 : vector<8x128xf32>
      %c0_51 = arith.constant 0 : index
      %c0_52 = arith.constant 0 : index
      %202 = vector.load %arg5[%c0_51, %c0_52] : memref<8x128xf32, #tpu.memory_space<vmem>>, vector<8x128xf32>
      tpu.vector_store %arg5[%c0_51, %c0_52], %201 {strides = array<i32>} : memref<8x128xf32, #tpu.memory_space<vmem>>, vector<8x128xf32>,
    } else {
    }
    return
  }
  func.func @transform_0(%arg0: i32) -> (i32, i32, i32) {
    %c0_i32 = arith.constant 0 : i32
    %c0_i32_0 = arith.constant 0 : i32
    %c0_i32_1 = arith.constant 0 : i32
    return %arg0, %c0_i32, %c0_i32_0 : i32, i32, i32
  }
  func.func @transform_1(%arg0: i32) -> (i32, i32) {
    %c0_i32 = arith.constant 0 : i32
    %c0_i32_0 = arith.constant 0 : i32
    %c0_i32_1 = arith.constant 0 : i32
    return %c0_i32, %c0_i32_0 : i32, i32
  }
  func.func @transform_2(%arg0: i32) -> (i32, i32) {
    %c0_i32 = arith.constant 0 : i32
    %c0_i32_0 = arith.constant 0 : i32
    %c0_i32_1 = arith.constant 0 : i32
    return %c0_i32, %c0_i32_0 : i32, i32
  }
  func.func @transform_3(%arg0: i32) -> (i32, i32) {
    %c0_i32 = arith.constant 0 : i32
    %c0_i32_0 = arith.constant 0 : i32
    %c0_i32_1 = arith.constant 0 : i32
    return %c0_i32, %c0_i32_0 : i32, i32
  }
  func.func @transform_4(%arg0: i32) -> (i32, i32) {
    %c0_i32 = arith.constant 0 : i32
    %c0_i32_0 = arith.constant 0 : i32
    %c0_i32_1 = arith.constant 0 : i32
    return %c0_i32, %c0_i32_0 : i32, i32
  }
}

</mosaic_0001>

<bundles_post_ra>
// kernel: _forward_padded.4
= control target key start
LH: loop header
LB: loop body
LE: loop exit
PB: predicated region body
PF: predicated region fallthrough
CT: control target
= control target key end

     0   :  { %vm73_vm0 = vcmask 1041408   ;;  %vm60_vm1 = vcmask 31744   ;;  %s412_s1 = inlined_call_operand.vmem [shape: bf16[4,512], index: 1, kind: input, shape index: {}]   ;;  %s413_s0 = inlined_call_operand.vmem [shape: bf16[64,4], index: 0, kind: input, shape index: {}]   ;;  %s414_s2 = inlined_call_operand.vmem [shape: f32[1,512], index: 2, kind: input, shape index: {}]   ;;  %s415_s3 = inlined_call_operand.vmem [shape: bf16[64,512], index: 3, kind: output, shape index: {}]  }
   0x1   :  { %v23_v0 = vld [vmem:[%s412_s1] sm:$0xff]  ;;  %v267_v10 = vld [vmem:[%s413_s0 + $0x8] sm:$0xff]  ;;  %v268_v11 = vld [vmem:[%s413_s0 + $0x10] sm:$0xff] }
   0x2   :  { %55 = vst [vmem:[#allocation1] ss:$4 sm:$0xff] %v23_v0  ;;  %v266_v6 = vld [vmem:[%s413_s0] sm:$0xff]  ;;  %v269_v12 = vld [vmem:[%s413_s0 + $0x18] sm:$0xff] }
   0x3   :  { %v24_v13 = vld [vmem:[%s414_s2] sm:$0xf] }
   0x4   :  { %v324_v14 = vperm.slane %v24_v13, 0  ;;  %v326_v15 = vperm.slane %v24_v13, 1  ;;  %v330_v21 = vperm.slane %v24_v13, 2  ;;  %v335_v22 = vperm.slane %v24_v13, 3 }
   0x9   :  { %v56_v1 = vld.sshfl [vmem:[#allocation1] sm:$0xff pattern:$0x73625140]  ;;  %v57_v2 = vld.sshfl [vmem:[#allocation1 + $0x8] sm:$0xff pattern:$0x73625140] }
   0xa   :  { %v74_v3 = vsel %vm73_vm0, %v56_v1, 0  ;;  %v76_v4 = vsel %vm73_vm0, %v57_v2, 0  ;;  %v58_v5 = vld.sshfl [vmem:[#allocation1 + $0x10] sm:$0xff pattern:$0x73625140] }
   0xb   :  { %89 = vmatpush.bf16.msra.mxu0 %v74_v3  ;;  %118 = vmatpush.bf16.msra.mxu1 %v76_v4  ;;  %v78_v7 = vsel %vm73_vm0, %v58_v5, 0  ;;  %v59_v8 = vld.sshfl [vmem:[#allocation1 + $0x18] sm:$0xff pattern:$0x73625140] }
   0xc   :  { %147 = vmatpush.bf16.msra.mxu2 %v78_v7  ;;  %v80_v9 = vsel %vm73_vm0, %v59_v8, 0 }
   0xd   :  { %176 = vmatpush.bf16.msra.mxu3 %v80_v9 }
   0xe   :  { %250 = vmatmul.msk.bf16.vlgmr.msra.gmra.mxu0 %vm60_vm1, %v266_v6  ;;  %254 = vmatmul.msk.bf16.vlgmr.msra.gmra.mxu1 %vm60_vm1, %v266_v6 }
   0xf   :  { %258 = vmatmul.msk.bf16.vlgmr.msra.gmra.mxu2 %vm60_vm1, %v266_v6 }
  0x10   :  { %262 = vmatmul.msk.bf16.vlgmr.msra.gmra.mxu3 %vm60_vm1, %v266_v6 }
  0x1e   :  { %251 = vmatmul.msk.bf16.gmra.mxu0 %vm60_vm1, %v267_v10  ;;  %255 = vmatmul.msk.bf16.gmra.mxu1 %vm60_vm1, %v267_v10 }
  0x1f   :  { %259 = vmatmul.msk.bf16.gmra.mxu2 %vm60_vm1, %v267_v10 }
  0x20   :  { %263 = vmatmul.msk.bf16.gmra.mxu3 %vm60_vm1, %v267_v10 }
  0x2e   :  { %252 = vmatmul.msk.bf16.gmra.mxu0 %vm60_vm1, %v268_v11  ;;  %256 = vmatmul.msk.bf16.gmra.mxu1 %vm60_vm1, %v268_v11 }
  0x2f   :  { %260 = vmatmul.msk.bf16.gmra.mxu2 %vm60_vm1, %v268_v11 }
  0x30   :  { %264 = vmatmul.msk.bf16.gmra.mxu3 %vm60_vm1, %v268_v11 }
  0x3e   :  { %253 = vmatmul.msk.bf16.gmra.mxu0 %vm60_vm1, %v269_v12  ;;  %257 = vmatmul.msk.bf16.gmra.mxu1 %vm60_vm1, %v269_v12 }
  0x3f   :  { %261 = vmatmul.msk.bf16.gmra.mxu2 %vm60_vm1, %v269_v12 }
  0x40   :  { %265 = vmatmul.msk.bf16.gmra.mxu3 %vm60_vm1, %v269_v12 }
  0x8b   :  { %v91_v16 = vpop.f32.mrf.mxu0  ;;  %v120_v17 = vpop.f32.mrf.mxu1 }
  0x8c   :  { %v92_v18 = vadd.f32 %v91_v16, %v324_v14  ;;  %v121_v19 = vadd.f32 %v120_v17, %v326_v15 }
  0x8e   :  { %v198_v20 = vpack.c.bf16 %v121_v19, %v92_v18 }
  0x90   :  { %214 = vst [vmem:[%s415_s3] sm:$0xff] %v198_v20 }
  0x92   :  { %v149_v23 = vpop.f32.mrf.mxu2 }
  0x93   :  { %v150_v24 = vadd.f32 %v149_v23, %v330_v21  ;;  %v178_v25 = vpop.f32.mrf.mxu3  ;;  %v93_v26 = vpop.f32.mrf.mxu0 }
  0x94   :  { %v179_v27 = vadd.f32 %v178_v25, %v335_v22  ;;  %v94_v28 = vadd.f32 %v93_v26, %v324_v14  ;;  %v122_v29 = vpop.f32.mrf.mxu1 }
  0x95   :  { %v123_v30 = vadd.f32 %v122_v29, %v326_v15 }
  0x96   :  { %v199_v31 = vpack.c.bf16 %v179_v27, %v150_v24 }
  0x97   :  { %v200_v32 = vpack.c.bf16 %v123_v30, %v94_v28 }
  0x98   :  { %215 = vst [vmem:[%s415_s3 + $0x8] sm:$0xff] %v199_v31 }
  0x99   :  { %216 = vst [vmem:[%s415_s3 + $0x10] sm:$0xff] %v200_v32 }
  0x9a   :  { %v151_v33 = vpop.f32.mrf.mxu2 }
  0x9b   :  { %v152_v34 = vadd.f32 %v151_v33, %v330_v21  ;;  %v180_v35 = vpop.f32.mrf.mxu3  ;;  %v96_v36 = vpop.f32.mrf.mxu0 }
  0x9c   :  { %v181_v37 = vadd.f32 %v180_v35, %v335_v22  ;;  %v97_v38 = vadd.f32 %v96_v36, %v324_v14  ;;  %v125_v39 = vpop.f32.mrf.mxu1 }
  0x9d   :  { %v126_v40 = vadd.f32 %v125_v39, %v326_v15 }
  0x9e   :  { %v201_v41 = vpack.c.bf16 %v181_v37, %v152_v34 }
  0x9f   :  { %v202_v42 = vpack.c.bf16 %v126_v40, %v97_v38 }
  0xa0   :  { %217 = vst [vmem:[%s415_s3 + $0x18] sm:$0xff] %v201_v41 }
  0xa1   :  { %218 = vst [vmem:[%s415_s3 + $0x20] sm:$0xff] %v202_v42 }
  0xa2   :  { %v154_v43 = vpop.f32.mrf.mxu2 }
  0xa3   :  { %v155_v44 = vadd.f32 %v154_v43, %v330_v21  ;;  %v183_v45 = vpop.f32.mrf.mxu3  ;;  %v98_v46 = vpop.f32.mrf.mxu0 }
  0xa4   :  { %v184_v47 = vadd.f32 %v183_v45, %v335_v22  ;;  %v99_v48 = vadd.f32 %v98_v46, %v324_v14  ;;  %v127_v49 = vpop.f32.mrf.mxu1 }
  0xa5   :  { %v128_v50 = vadd.f32 %v127_v49, %v326_v15 }
  0xa6   :  { %v203_v51 = vpack.c.bf16 %v184_v47, %v155_v44 }
  0xa7   :  { %v204_v52 = vpack.c.bf16 %v128_v50, %v99_v48 }
  0xa8   :  { %219 = vst [vmem:[%s415_s3 + $0x28] sm:$0xff] %v203_v51 }
  0xa9   :  { %220 = vst [vmem:[%s415_s3 + $0x30] sm:$0xff] %v204_v52 }
  0xaa   :  { %v156_v53 = vpop.f32.mrf.mxu2 }
  0xab   :  { %v157_v54 = vadd.f32 %v156_v53, %v330_v21  ;;  %v185_v55 = vpop.f32.mrf.mxu3  ;;  %v101_v56 = vpop.f32.mrf.mxu0 }
  0xac   :  { %v186_v57 = vadd.f32 %v185_v55, %v335_v22  ;;  %v102_v58 = vadd.f32 %v101_v56, %v324_v14  ;;  %v130_v59 = vpop.f32.mrf.mxu1 }
  0xad   :  { %v131_v60 = vadd.f32 %v130_v59, %v326_v15 }
  0xae   :  { %v205_v61 = vpack.c.bf16 %v186_v57, %v157_v54 }
  0xaf   :  { %v206_v62 = vpack.c.bf16 %v131_v60, %v102_v58 }
  0xb0   :  { %221 = vst [vmem:[%s415_s3 + $0x38] sm:$0xff] %v205_v61 }
  0xb1   :  { %222 = vst [vmem:[%s415_s3 + $0x40] sm:$0xff] %v206_v62 }
  0xb2   :  { %v159_v63 = vpop.f32.mrf.mxu2 }
  0xb3   :  { %v160_v0 = vadd.f32 %v159_v63, %v330_v21  ;;  %v188_v1 = vpop.f32.mrf.mxu3  ;;  %v103_v2 = vpop.f32.mrf.mxu0 }
  0xb4   :  { %v189_v3 = vadd.f32 %v188_v1, %v335_v22  ;;  %v104_v4 = vadd.f32 %v103_v2, %v324_v14  ;;  %v132_v5 = vpop.f32.mrf.mxu1 }
  0xb5   :  { %v133_v6 = vadd.f32 %v132_v5, %v326_v15 }
  0xb6   :  { %v207_v7 = vpack.c.bf16 %v189_v3, %v160_v0 }
  0xb7   :  { %v208_v8 = vpack.c.bf16 %v133_v6, %v104_v4 }
  0xb8   :  { %223 = vst [vmem:[%s415_s3 + $0x48] sm:$0xff] %v207_v7 }
  0xb9   :  { %224 = vst [vmem:[%s415_s3 + $0x50] sm:$0xff] %v208_v8 }
  0xba   :  { %v161_v9 = vpop.f32.mrf.mxu2 }
  0xbb   :  { %v162_v10 = vadd.f32 %v161_v9, %v330_v21  ;;  %v190_v11 = vpop.f32.mrf.mxu3  ;;  %v106_v12 = vpop.f32.mrf.mxu0 }
  0xbc   :  { %v191_v13 = vadd.f32 %v190_v11, %v335_v22  ;;  %v107_v16 = vadd.f32 %v106_v12, %v324_v14  ;;  %v135_v17 = vpop.f32.mrf.mxu1 }
  0xbd   :  { %v136_v18 = vadd.f32 %v135_v17, %v326_v15 }
  0xbe   :  { %v209_v19 = vpack.c.bf16 %v191_v13, %v162_v10 }
  0xbf   :  { %v210_v20 = vpack.c.bf16 %v136_v18, %v107_v16 }
  0xc0   :  { %225 = vst [vmem:[%s415_s3 + $0x58] sm:$0xff] %v209_v19 }
  0xc1   :  { %226 = vst [vmem:[%s415_s3 + $0x60] sm:$0xff] %v210_v20 }
  0xc2   :  { %v164_v23 = vpop.f32.mrf.mxu2 }
  0xc3   :  { %v165_v24 = vadd.f32 %v164_v23, %v330_v21  ;;  %v193_v25 = vpop.f32.mrf.mxu3  ;;  %v108_v26 = vpop.f32.mrf.mxu0 }
  0xc4   :  { %v194_v27 = vadd.f32 %v193_v25, %v335_v22  ;;  %v109_v28 = vadd.f32 %v108_v26, %v324_v14  ;;  %v137_v29 = vpop.f32.mrf.mxu1 }
  0xc5   :  { %v138_v30 = vadd.f32 %v137_v29, %v326_v15 }
  0xc6   :  { %v211_v31 = vpack.c.bf16 %v194_v27, %v165_v24 }
  0xc7   :  { %v212_v32 = vpack.c.bf16 %v138_v30, %v109_v28 }
  0xc8   :  { %227 = vst [vmem:[%s415_s3 + $0x68] sm:$0xff] %v211_v31 }
  0xc9   :  { %228 = vst [vmem:[%s415_s3 + $0x70] sm:$0xff] %v212_v32 }
  0xca   :  { %v166_v33 = vpop.f32.mrf.mxu2 }
  0xcb   :  { %v167_v34 = vadd.f32 %v166_v33, %v330_v21  ;;  %v195_v35 = vpop.f32.mrf.mxu3 }
  0xcc   :  { %v196_v36 = vadd.f32 %v195_v35, %v335_v22 }
  0xce   :  { %v213_v14 = vpack.c.bf16 %v196_v36, %v167_v34 }
  0xd0   :  { %229 = vst [vmem:[%s415_s3 + $0x78] sm:$0xff] %v213_v14 }

// kernel: _forward_padded.6
= control target key start
LH: loop header
LB: loop body
LE: loop exit
PB: predicated region body
PF: predicated region fallthrough
CT: control target
= control target key end

     0   :  { %8 = vsyncpa [#allocation3], 0  ;;  %s626_s15 = smov [#allocation2]   ;;  %s627_s17 = smov 256   ;;  %s755_s0 = inlined_call_operand.vmem [shape: bf16[64,128], index: 0, kind: input, shape index: {}]   ;;  %s756_s1 = inlined_call_operand.hbm [shape: bf16[128,512], index: 1, kind: input, shape index: {}]   ;;  %s757_s2 = inlined_call_operand.vmem [shape: f32[1,512], index: 2, kind: input, shape index: {}]   ;;  %s758_s3 = inlined_call_operand.vmem [shape: bf16[64,512], index: 3, kind: output, shape index: {}]  }
   0x1   :  { %s15_s14 = sshll.u32 %s756_s1, 4  ;;  %s17_s16 = sshll.u32 %s626_s15, 4  ;;  %s16_s14 = int_to_ptr.hbm [resolvable:$true] %s15_s14  ;;  %s18_s16 = int_to_ptr.vmem [resolvable:$true] %s17_s16 }
   0x2   :  { %s628_s18 = smov 16  }
   0x3   :  { %23 = dma.hbm_to_vmem [thread:$0]  %s16_s14, 4096, %s18_s16, [#allocation3], %s627_s17, %s627_s17, %s628_s18  }
   0x4   :  { %624 = dma.done.wait [#allocation3], 4096  }
   0x5   :  { %625 = vsyncadd [#allocation3], 4294963200  ;;  %v547_v0 = vld [vmem:[#allocation2 + $0xe0] sm:$0xf]  ;;  %v595_v1 = vld [vmem:[#allocation2 + $0xec] sm:$0xf0] }
   0x6   :  { %v593_v2 = vld [vmem:[#allocation2 + $0xe4] sm:$0xf]  ;;  %v548_v3 = vor.u32 %v595_v1, %v547_v0  ;;  %v549_v4 = vld [vmem:[#allocation2 + $0xf0] sm:$0xf0]  ;;  %v555_v5 = vld [vmem:[#allocation2 + $0xe8] sm:$0xf] }
   0x7   :  { %v596_v6 = vld [vmem:[#allocation2 + $0xf4] sm:$0xf0]  ;;  %v552_v7 = vor.u32 %v593_v2, %v549_v4  ;;  %v594_v9 = vld [vmem:[#allocation2 + $0xec] sm:$0xf]  ;;  %v557_v10 = vld [vmem:[#allocation2 + $0xf8] sm:$0xf0] }
   0x8   :  { %v556_v8 = vor.u32 %v596_v6, %v555_v5  ;;  %v531_v11 = vld [vmem:[#allocation2 + $0xc0] sm:$0xf]  ;;  %264 = vmatpush.bf16.msra.mxu0 %v548_v3  ;;  %v560_v12 = vor.u32 %v594_v9, %v557_v10  ;;  %v591_v13 = vld [vmem:[#allocation2 + $0xcc] sm:$0xf0]  ;;  %v589_v14 = vld [vmem:[#allocation2 + $0xc4] sm:$0xf] }
   0x9   :  { %v533_v15 = vld [vmem:[#allocation2 + $0xd0] sm:$0xf0]  ;;  %293 = vmatpush.bf16.msra.mxu1 %v552_v7  ;;  %v532_v16 = vor.u32 %v591_v13, %v531_v11  ;;  %v539_v18 = vld [vmem:[#allocation2 + $0xc8] sm:$0xf]  ;;  %v592_v19 = vld [vmem:[#allocation2 + $0xd4] sm:$0xf0] }
   0xa   :  { %322 = vmatpush.bf16.msra.mxu2 %v556_v8  ;;  %v536_v17 = vor.u32 %v589_v14, %v533_v15  ;;  %v590_v20 = vld [vmem:[#allocation2 + $0xcc] sm:$0xf]  ;;  %351 = vmatpush.bf16.msra.mxu3 %v560_v12  ;;  %v540_v21 = vor.u32 %v592_v19, %v539_v18  ;;  %v541_v22 = vld [vmem:[#allocation2 + $0xd8] sm:$0xf0]  ;;  %v515_v23 = vld [vmem:[#allocation2 + $0xa0] sm:$0xf] }
   0xb   :  { %v587_v24 = vld [vmem:[#allocation2 + $0xac] sm:$0xf0]  ;;  %v544_v25 = vor.u32 %v590_v20, %v541_v22  ;;  %v585_v26 = vld [vmem:[#allocation2 + $0xa4] sm:$0xf]  ;;  %v517_v27 = vld [vmem:[#allocation2 + $0xb0] sm:$0xf0] }
   0xc   :  { %v523_v28 = vld [vmem:[#allocation2 + $0xa8] sm:$0xf]  ;;  %265 = vmatpush.bf16.msra.mxu0 %v532_v16  ;;  %v516_v29 = vor.u32 %v587_v24, %v515_v23  ;;  %v588_v30 = vld [vmem:[#allocation2 + $0xb4] sm:$0xf0]  ;;  %v586_v31 = vld [vmem:[#allocation2 + $0xac] sm:$0xf]  ;;  %v520_v33 = vor.u32 %v585_v26, %v517_v27 }
   0xd   :  { %v525_v32 = vld [vmem:[#allocation2 + $0xb8] sm:$0xf0]  ;;  %294 = vmatpush.bf16.msra.mxu1 %v536_v17  ;;  %v524_v34 = vor.u32 %v588_v30, %v523_v28  ;;  %v499_v35 = vld [vmem:[#allocation2 + $0x80] sm:$0xf]  ;;  %v583_v36 = vld [vmem:[#allocation2 + $0x8c] sm:$0xf0] }
   0xe   :  { %323 = vmatpush.bf16.msra.mxu2 %v540_v21  ;;  %v581_v37 = vld [vmem:[#allocation2 + $0x84] sm:$0xf]  ;;  %352 = vmatpush.bf16.msra.mxu3 %v544_v25  ;;  %v528_v38 = vor.u32 %v586_v31, %v525_v32  ;;  %v501_v39 = vld [vmem:[#allocation2 + $0x90] sm:$0xf0]  ;;  %v507_v40 = vld [vmem:[#allocation2 + $0x88] sm:$0xf]  ;;  %v500_v44 = vor.u32 %v583_v36, %v499_v35 }
   0xf   :  { %v584_v41 = vld [vmem:[#allocation2 + $0x94] sm:$0xf0]  ;;  %v582_v42 = vld [vmem:[#allocation2 + $0x8c] sm:$0xf]  ;;  %v509_v43 = vld [vmem:[#allocation2 + $0x98] sm:$0xf0]  ;;  %v504_v45 = vor.u32 %v581_v37, %v501_v39 }
  0x10   :  { %266 = vmatpush.bf16.msra.mxu0 %v516_v29  ;;  %v508_v46 = vor.u32 %v584_v41, %v507_v40  ;;  %v483_v47 = vld [vmem:[#allocation2 + $0x60] sm:$0xf]  ;;  %v579_v48 = vld [vmem:[#allocation2 + $0x6c] sm:$0xf0]  ;;  %v577_v49 = vld [vmem:[#allocation2 + $0x64] sm:$0xf]  ;;  %v512_v50 = vor.u32 %v582_v42, %v509_v43 }
  0x11   :  { %295 = vmatpush.bf16.msra.mxu1 %v520_v33  ;;  %v485_v51 = vld [vmem:[#allocation2 + $0x70] sm:$0xf0]  ;;  %v491_v52 = vld [vmem:[#allocation2 + $0x68] sm:$0xf]  ;;  %v580_v53 = vld [vmem:[#allocation2 + $0x74] sm:$0xf0]  ;;  %v484_v56 = vor.u32 %v579_v48, %v483_v47 }
  0x12   :  { %324 = vmatpush.bf16.msra.mxu2 %v524_v34  ;;  %353 = vmatpush.bf16.msra.mxu3 %v528_v38  ;;  %v578_v54 = vld [vmem:[#allocation2 + $0x6c] sm:$0xf]  ;;  %v493_v55 = vld [vmem:[#allocation2 + $0x78] sm:$0xf0]  ;;  %v488_v57 = vor.u32 %v577_v49, %v485_v51  ;;  %v492_v58 = vor.u32 %v580_v53, %v491_v52  ;;  %v467_v59 = vld [vmem:[#allocation2 + $0x40] sm:$0xf] }
  0x13   :  { %v575_v60 = vld [vmem:[#allocation2 + $0x4c] sm:$0xf0]  ;;  %v573_v61 = vld [vmem:[#allocation2 + $0x44] sm:$0xf]  ;;  %v496_v62 = vor.u32 %v578_v54, %v493_v55  ;;  %v469_v63 = vld [vmem:[#allocation2 + $0x50] sm:$0xf0] }
  0x14   :  { %267 = vmatpush.bf16.msra.mxu0 %v500_v44  ;;  %v475_v0 = vld [vmem:[#allocation2 + $0x48] sm:$0xf]  ;;  %v576_v1 = vld [vmem:[#allocation2 + $0x54] sm:$0xf0]  ;;  %v574_v2 = vld [vmem:[#allocation2 + $0x4c] sm:$0xf]  ;;  %v468_v4 = vor.u32 %v575_v60, %v467_v59  ;;  %v472_v5 = vor.u32 %v573_v61, %v469_v63 }
  0x15   :  { %296 = vmatpush.bf16.msra.mxu1 %v504_v45  ;;  %v477_v3 = vld [vmem:[#allocation2 + $0x58] sm:$0xf0]  ;;  %v476_v6 = vor.u32 %v576_v1, %v475_v0  ;;  %v451_v7 = vld [vmem:[#allocation2 + $0x20] sm:$0xf]  ;;  %v571_v8 = vld [vmem:[#allocation2 + $0x2c] sm:$0xf0] }
  0x16   :  { %325 = vmatpush.bf16.msra.mxu2 %v508_v46  ;;  %354 = vmatpush.bf16.msra.mxu3 %v512_v50  ;;  %v569_v9 = vld [vmem:[#allocation2 + $0x24] sm:$0xf]  ;;  %v480_v10 = vor.u32 %v574_v2, %v477_v3  ;;  %v453_v11 = vld [vmem:[#allocation2 + $0x30] sm:$0xf0]  ;;  %v459_v12 = vld [vmem:[#allocation2 + $0x28] sm:$0xf]  ;;  %v452_v16 = vor.u32 %v571_v8, %v451_v7 }
  0x17   :  { %v572_v13 = vld [vmem:[#allocation2 + $0x34] sm:$0xf0]  ;;  %v570_v14 = vld [vmem:[#allocation2 + $0x2c] sm:$0xf]  ;;  %v461_v15 = vld [vmem:[#allocation2 + $0x38] sm:$0xf0]  ;;  %v456_v17 = vor.u32 %v569_v9, %v453_v11 }
  0x18   :  { %268 = vmatpush.bf16.msra.mxu0 %v484_v56  ;;  %v460_v18 = vor.u32 %v572_v13, %v459_v12  ;;  %v435_v19 = vld [vmem:[#allocation2] sm:$0xf]  ;;  %v567_v20 = vld [vmem:[#allocation2 + $0xc] sm:$0xf0]  ;;  %v565_v21 = vld [vmem:[#allocation2 + $0x4] sm:$0xf]  ;;  %v464_v22 = vor.u32 %v570_v14, %v461_v15 }
  0x19   :  { %297 = vmatpush.bf16.msra.mxu1 %v488_v57  ;;  %v437_v23 = vld [vmem:[#allocation2 + $0x10] sm:$0xf0]  ;;  %v443_v24 = vld [vmem:[#allocation2 + $0x8] sm:$0xf]  ;;  %v568_v25 = vld [vmem:[#allocation2 + $0x14] sm:$0xf0]  ;;  %v436_v28 = vor.u32 %v567_v20, %v435_v19 }
  0x1a   :  { %326 = vmatpush.bf16.msra.mxu2 %v492_v58  ;;  %355 = vmatpush.bf16.msra.mxu3 %v496_v62  ;;  %v566_v26 = vld [vmem:[#allocation2 + $0xc] sm:$0xf]  ;;  %v445_v27 = vld [vmem:[#allocation2 + $0x18] sm:$0xf0]  ;;  %v440_v29 = vor.u32 %v565_v21, %v437_v23  ;;  %v444_v30 = vor.u32 %v568_v25, %v443_v24  ;;  %v561_v32 = vld [vmem:[%s755_s0] sm:$0xff] }
  0x1b   :  { %v448_v31 = vor.u32 %v566_v26, %v445_v27  ;;  %v562_v33 = vld [vmem:[%s755_s0 + $0x8] sm:$0xff]  ;;  %v563_v34 = vld [vmem:[%s755_s0 + $0x10] sm:$0xff]  ;;  %v564_v35 = vld [vmem:[%s755_s0 + $0x18] sm:$0xff] }
  0x1c   :  { %269 = vmatpush.bf16.msra.mxu0 %v468_v4  ;;  %v70_v36 = vld [vmem:[%s757_s2] sm:$0xf] }
  0x1d   :  { %298 = vmatpush.bf16.msra.mxu1 %v472_v5  ;;  %v667_v37 = vperm.slane %v70_v36, 0  ;;  %v669_v38 = vperm.slane %v70_v36, 1  ;;  %v673_v44 = vperm.slane %v70_v36, 2  ;;  %v675_v45 = vperm.slane %v70_v36, 3 }
  0x1e   :  { %327 = vmatpush.bf16.msra.mxu2 %v476_v6  ;;  %356 = vmatpush.bf16.msra.mxu3 %v480_v10 }
  0x20   :  { %270 = vmatpush.bf16.msra.mxu0 %v452_v16 }
  0x21   :  { %299 = vmatpush.bf16.msra.mxu1 %v456_v17 }
  0x22   :  { %328 = vmatpush.bf16.msra.mxu2 %v460_v18  ;;  %357 = vmatpush.bf16.msra.mxu3 %v464_v22 }
  0x24   :  { %271 = vmatpush.bf16.msra.mxu0 %v436_v28 }
  0x25   :  { %300 = vmatpush.bf16.msra.mxu1 %v440_v29 }
  0x26   :  { %329 = vmatpush.bf16.msra.mxu2 %v444_v30  ;;  %358 = vmatpush.bf16.msra.mxu3 %v448_v31 }
  0x27   :  { %272 = vmatmul.bf16.vlgmr.msra.gmra.mxu0 %v561_v32 }
  0x28   :  { %301 = vmatmul.bf16.vlgmr.msra.gmra.mxu1 %v561_v32 }
  0x29   :  { %330 = vmatmul.bf16.vlgmr.msra.gmra.mxu2 %v561_v32  ;;  %359 = vmatmul.bf16.vlgmr.msra.gmra.mxu3 %v561_v32 }
  0x37   :  { %277 = vmatmul.bf16.gmra.mxu0 %v562_v33 }
  0x38   :  { %306 = vmatmul.bf16.gmra.mxu1 %v562_v33 }
  0x39   :  { %335 = vmatmul.bf16.gmra.mxu2 %v562_v33  ;;  %364 = vmatmul.bf16.gmra.mxu3 %v562_v33 }
  0x47   :  { %282 = vmatmul.bf16.gmra.mxu0 %v563_v34 }
  0x48   :  { %311 = vmatmul.bf16.gmra.mxu1 %v563_v34 }
  0x49   :  { %340 = vmatmul.bf16.gmra.mxu2 %v563_v34  ;;  %369 = vmatmul.bf16.gmra.mxu3 %v563_v34 }
  0x57   :  { %287 = vmatmul.bf16.gmra.mxu0 %v564_v35 }
  0x58   :  { %316 = vmatmul.bf16.gmra.mxu1 %v564_v35 }
  0x59   :  { %345 = vmatmul.bf16.gmra.mxu2 %v564_v35  ;;  %374 = vmatmul.bf16.gmra.mxu3 %v564_v35 }
  0xa4   :  { %v273_v39 = vpop.f32.mrf.mxu0 }
  0xa5   :  { %v274_v40 = vadd.f32 %v273_v39, %v667_v37  ;;  %v302_v41 = vpop.f32.mrf.mxu1 }
  0xa6   :  { %v303_v42 = vadd.f32 %v302_v41, %v669_v38 }
  0xa8   :  { %v380_v43 = vpack.c.bf16 %v303_v42, %v274_v40 }
  0xaa   :  { %396 = vst [vmem:[%s758_s3] sm:$0xff] %v380_v43 }
  0xac   :  { %v331_v46 = vpop.f32.mrf.mxu2  ;;  %v360_v48 = vpop.f32.mrf.mxu3 }
  0xad   :  { %v332_v47 = vadd.f32 %v331_v46, %v673_v44  ;;  %v275_v49 = vpop.f32.mrf.mxu0  ;;  %v361_v50 = vadd.f32 %v360_v48, %v675_v45  ;;  %v304_v52 = vpop.f32.mrf.mxu1 }
  0xae   :  { %v276_v51 = vadd.f32 %v275_v49, %v667_v37  ;;  %v305_v53 = vadd.f32 %v304_v52, %v669_v38 }
  0xaf   :  { %v381_v54 = vpack.c.bf16 %v361_v50, %v332_v47 }
  0xb0   :  { %v382_v55 = vpack.c.bf16 %v305_v53, %v276_v51 }
  0xb1   :  { %397 = vst [vmem:[%s758_s3 + $0x8] sm:$0xff] %v381_v54 }
  0xb2   :  { %398 = vst [vmem:[%s758_s3 + $0x10] sm:$0xff] %v382_v55 }
  0xb4   :  { %v333_v56 = vpop.f32.mrf.mxu2  ;;  %v362_v58 = vpop.f32.mrf.mxu3 }
  0xb5   :  { %v334_v57 = vadd.f32 %v333_v56, %v673_v44  ;;  %v278_v59 = vpop.f32.mrf.mxu0  ;;  %v363_v60 = vadd.f32 %v362_v58, %v675_v45  ;;  %v307_v62 = vpop.f32.mrf.mxu1 }
  0xb6   :  { %v279_v61 = vadd.f32 %v278_v59, %v667_v37  ;;  %v308_v63 = vadd.f32 %v307_v62, %v669_v38 }
  0xb7   :  { %v383_v0 = vpack.c.bf16 %v363_v60, %v334_v57 }
  0xb8   :  { %v384_v1 = vpack.c.bf16 %v308_v63, %v279_v61 }
  0xb9   :  { %399 = vst [vmem:[%s758_s3 + $0x18] sm:$0xff] %v383_v0 }
  0xba   :  { %400 = vst [vmem:[%s758_s3 + $0x20] sm:$0xff] %v384_v1 }
  0xbc   :  { %v336_v2 = vpop.f32.mrf.mxu2  ;;  %v365_v4 = vpop.f32.mrf.mxu3 }
  0xbd   :  { %v337_v3 = vadd.f32 %v336_v2, %v673_v44  ;;  %v280_v5 = vpop.f32.mrf.mxu0  ;;  %v366_v6 = vadd.f32 %v365_v4, %v675_v45  ;;  %v309_v8 = vpop.f32.mrf.mxu1 }
  0xbe   :  { %v281_v7 = vadd.f32 %v280_v5, %v667_v37  ;;  %v310_v9 = vadd.f32 %v309_v8, %v669_v38 }
  0xbf   :  { %v385_v10 = vpack.c.bf16 %v366_v6, %v337_v3 }
  0xc0   :  { %v386_v11 = vpack.c.bf16 %v310_v9, %v281_v7 }
  0xc1   :  { %401 = vst [vmem:[%s758_s3 + $0x28] sm:$0xff] %v385_v10 }
  0xc2   :  { %402 = vst [vmem:[%s758_s3 + $0x30] sm:$0xff] %v386_v11 }
  0xc4   :  { %v338_v12 = vpop.f32.mrf.mxu2  ;;  %v367_v14 = vpop.f32.mrf.mxu3 }
  0xc5   :  { %v339_v13 = vadd.f32 %v338_v12, %v673_v44  ;;  %v283_v15 = vpop.f32.mrf.mxu0  ;;  %v368_v16 = vadd.f32 %v367_v14, %v675_v45  ;;  %v312_v18 = vpop.f32.mrf.mxu1 }
  0xc6   :  { %v284_v17 = vadd.f32 %v283_v15, %v667_v37  ;;  %v313_v19 = vadd.f32 %v312_v18, %v669_v38 }
  0xc7   :  { %v387_v20 = vpack.c.bf16 %v368_v16, %v339_v13 }
  0xc8   :  { %v388_v21 = vpack.c.bf16 %v313_v19, %v284_v17 }
  0xc9   :  { %403 = vst [vmem:[%s758_s3 + $0x38] sm:$0xff] %v387_v20 }
  0xca   :  { %404 = vst [vmem:[%s758_s3 + $0x40] sm:$0xff] %v388_v21 }
  0xcc   :  { %v341_v22 = vpop.f32.mrf.mxu2  ;;  %v370_v24 = vpop.f32.mrf.mxu3 }
  0xcd   :  { %v342_v23 = vadd.f32 %v341_v22, %v673_v44  ;;  %v285_v25 = vpop.f32.mrf.mxu0  ;;  %v371_v26 = vadd.f32 %v370_v24, %v675_v45  ;;  %v314_v28 = vpop.f32.mrf.mxu1 }
  0xce   :  { %v286_v27 = vadd.f32 %v285_v25, %v667_v37  ;;  %v315_v29 = vadd.f32 %v314_v28, %v669_v38 }
  0xcf   :  { %v389_v30 = vpack.c.bf16 %v371_v26, %v342_v23 }
  0xd0   :  { %v390_v31 = vpack.c.bf16 %v315_v29, %v286_v27 }
  0xd1   :  { %405 = vst [vmem:[%s758_s3 + $0x48] sm:$0xff] %v389_v30 }
  0xd2   :  { %406 = vst [vmem:[%s758_s3 + $0x50] sm:$0xff] %v390_v31 }
  0xd4   :  { %v343_v32 = vpop.f32.mrf.mxu2  ;;  %v372_v34 = vpop.f32.mrf.mxu3 }
  0xd5   :  { %v344_v33 = vadd.f32 %v343_v32, %v673_v44  ;;  %v288_v35 = vpop.f32.mrf.mxu0  ;;  %v373_v36 = vadd.f32 %v372_v34, %v675_v45  ;;  %v317_v40 = vpop.f32.mrf.mxu1 }
  0xd6   :  { %v289_v39 = vadd.f32 %v288_v35, %v667_v37  ;;  %v318_v41 = vadd.f32 %v317_v40, %v669_v38 }
  0xd7   :  { %v391_v42 = vpack.c.bf16 %v373_v36, %v344_v33 }
  0xd8   :  { %v392_v43 = vpack.c.bf16 %v318_v41, %v289_v39 }
  0xd9   :  { %407 = vst [vmem:[%s758_s3 + $0x58] sm:$0xff] %v391_v42 }
  0xda   :  { %408 = vst [vmem:[%s758_s3 + $0x60] sm:$0xff] %v392_v43 }
  0xdc   :  { %v346_v46 = vpop.f32.mrf.mxu2  ;;  %v375_v48 = vpop.f32.mrf.mxu3 }
  0xdd   :  { %v347_v47 = vadd.f32 %v346_v46, %v673_v44  ;;  %v290_v49 = vpop.f32.mrf.mxu0  ;;  %v376_v50 = vadd.f32 %v375_v48, %v675_v45  ;;  %v319_v52 = vpop.f32.mrf.mxu1 }
  0xde   :  { %v291_v51 = vadd.f32 %v290_v49, %v667_v37  ;;  %v320_v53 = vadd.f32 %v319_v52, %v669_v38 }
  0xdf   :  { %v393_v54 = vpack.c.bf16 %v376_v50, %v347_v47 }
  0xe0   :  { %v394_v55 = vpack.c.bf16 %v320_v53, %v291_v51 }
  0xe1   :  { %409 = vst [vmem:[%s758_s3 + $0x68] sm:$0xff] %v393_v54 }
  0xe2   :  { %410 = vst [vmem:[%s758_s3 + $0x70] sm:$0xff] %v394_v55 }
  0xe4   :  { %v348_v56 = vpop.f32.mrf.mxu2  ;;  %v377_v58 = vpop.f32.mrf.mxu3 }
  0xe5   :  { %v349_v57 = vadd.f32 %v348_v56, %v673_v44  ;;  %v378_v59 = vadd.f32 %v377_v58, %v675_v45 }
  0xe7   :  { %v395_v37 = vpack.c.bf16 %v378_v59, %v349_v57 }
  0xe9   :  { %411 = vst [vmem:[%s758_s3 + $0x78] sm:$0xff] %v395_v37 }
  0xea   :  { %416 = vsyncpa [#allocation3], 1 }

// kernel: _forward_padded.5
= control target key start
LH: loop header
LB: loop body
LE: loop exit
PB: predicated region body
PF: predicated region fallthrough
CT: control target
= control target key end

     0   :  { %7 = vsyncpa [#allocation5], 0  ;;  %s1628_s12 = smov [#allocation4]   ;;  %s1629_s14 = smov 256   ;;  %s2070_s0 = inlined_call_operand.vmem [shape: bf16[8,8,512], index: 0, kind: input, shape index: {}]   ;;  %s2071_s1 = inlined_call_operand.hbm [shape: bf16[128,512], index: 1, kind: input, shape index: {}]   ;;  %s2072_s2 = inlined_call_operand.vmem [shape: bf16[8,8,128], index: 2, kind: output, shape index: {}]  }
   0x1   :  { %s14_s11 = sshll.u32 %s2071_s1, 4  ;;  %s16_s13 = sshll.u32 %s1628_s12, 4  ;;  %s15_s11 = int_to_ptr.hbm [resolvable:$true] %s14_s11  ;;  %s17_s13 = int_to_ptr.vmem [resolvable:$true] %s16_s13 }
   0x2   :  { %s1630_s15 = smov 16  }
   0x3   :  { %22 = dma.hbm_to_vmem [thread:$0]  %s15_s11, 4096, %s17_s13, [#allocation5], %s1629_s14, %s1629_s14, %s1630_s15  }
   0x4   :  { %1626 = dma.done.wait [#allocation5], 4096  }
   0x5   :  { %1627 = vsyncadd [#allocation5], 4294963200  ;;  %v1379_v0 = vld [vmem:[#allocation4 + $0xe0] sm:$0xf]  ;;  %v1468_v1 = vld [vmem:[#allocation4 + $0xec] sm:$0xf0] }
   0x6   :  { %v1466_v2 = vld [vmem:[#allocation4 + $0xe4] sm:$0xf]  ;;  %v1650_v3 = vor.u32 %v1468_v1, %v1379_v0  ;;  %v1381_v4 = vld [vmem:[#allocation4 + $0xf0] sm:$0xf0]  ;;  %v1387_v5 = vld [vmem:[#allocation4 + $0xe8] sm:$0xf] }
   0x7   :  { %v1469_v6 = vld [vmem:[#allocation4 + $0xf4] sm:$0xf0]  ;;  %v1652_v7 = vor.u32 %v1466_v2, %v1381_v4  ;;  %v1363_v9 = vld [vmem:[#allocation4 + $0xc0] sm:$0xf]  ;;  %v1464_v10 = vld [vmem:[#allocation4 + $0xcc] sm:$0xf0] }
   0x8   :  { %v1654_v8 = vor.u32 %v1469_v6, %v1387_v5  ;;  %v1462_v11 = vld [vmem:[#allocation4 + $0xc4] sm:$0xf]  ;;  %234 = vmatpush.bf16.msra.mxu0 %v1650_v3  ;;  %v1657_v12 = vor.u32 %v1464_v10, %v1363_v9  ;;  %v1365_v13 = vld [vmem:[#allocation4 + $0xd0] sm:$0xf0]  ;;  %v1371_v14 = vld [vmem:[#allocation4 + $0xc8] sm:$0xf] }
   0x9   :  { %v1465_v15 = vld [vmem:[#allocation4 + $0xd4] sm:$0xf0]  ;;  %247 = vmatpush.bf16.msra.mxu1 %v1652_v7  ;;  %v1661_v16 = vor.u32 %v1462_v11, %v1365_v13  ;;  %v1467_v18 = vld [vmem:[#allocation4 + $0xec] sm:$0xf]  ;;  %v1389_v19 = vld [vmem:[#allocation4 + $0xf8] sm:$0xf0] }
   0xa   :  { %260 = vmatpush.bf16.msra.mxu2 %v1654_v8  ;;  %v1663_v17 = vor.u32 %v1465_v15, %v1371_v14  ;;  %v1347_v20 = vld [vmem:[#allocation4 + $0xa0] sm:$0xf]  ;;  %v1665_v21 = vor.u32 %v1467_v18, %v1389_v19  ;;  %v1460_v22 = vld [vmem:[#allocation4 + $0xac] sm:$0xf0]  ;;  %v1458_v23 = vld [vmem:[#allocation4 + $0xa4] sm:$0xf] }
   0xb   :  { %v1349_v24 = vld [vmem:[#allocation4 + $0xb0] sm:$0xf0]  ;;  %v1355_v25 = vld [vmem:[#allocation4 + $0xa8] sm:$0xf]  ;;  %v1461_v26 = vld [vmem:[#allocation4 + $0xb4] sm:$0xf0]  ;;  %v1669_v28 = vor.u32 %v1460_v22, %v1347_v20 }
   0xc   :  { %v1463_v27 = vld [vmem:[#allocation4 + $0xcc] sm:$0xf]  ;;  %235 = vmatpush.bf16.msra.mxu0 %v1657_v12  ;;  %273 = vmatpush.bf16.msra.mxu3 %v1665_v21  ;;  %v1373_v29 = vld [vmem:[#allocation4 + $0xd8] sm:$0xf0]  ;;  %v1331_v30 = vld [vmem:[#allocation4 + $0x80] sm:$0xf]  ;;  %v1673_v32 = vor.u32 %v1458_v23, %v1349_v24  ;;  %v1675_v33 = vor.u32 %v1461_v26, %v1355_v25 }
   0xd   :  { %v1456_v31 = vld [vmem:[#allocation4 + $0x8c] sm:$0xf0]  ;;  %248 = vmatpush.bf16.msra.mxu1 %v1661_v16  ;;  %v1677_v34 = vor.u32 %v1463_v27, %v1373_v29  ;;  %v1454_v35 = vld [vmem:[#allocation4 + $0x84] sm:$0xf]  ;;  %v1333_v36 = vld [vmem:[#allocation4 + $0x90] sm:$0xf0] }
   0xe   :  { %261 = vmatpush.bf16.msra.mxu2 %v1663_v17  ;;  %v1339_v37 = vld [vmem:[#allocation4 + $0x88] sm:$0xf]  ;;  %v1457_v38 = vld [vmem:[#allocation4 + $0x94] sm:$0xf0]  ;;  %v1459_v39 = vld [vmem:[#allocation4 + $0xac] sm:$0xf]  ;;  %v1681_v41 = vor.u32 %v1456_v31, %v1331_v30  ;;  %v1687_v45 = vor.u32 %v1454_v35, %v1333_v36 }
   0xf   :  { %v1357_v40 = vld [vmem:[#allocation4 + $0xb8] sm:$0xf0]  ;;  %v1315_v43 = vld [vmem:[#allocation4 + $0x60] sm:$0xf]  ;;  %v1452_v44 = vld [vmem:[#allocation4 + $0x6c] sm:$0xf0]  ;;  %v1689_v46 = vor.u32 %v1457_v38, %v1339_v37 }
  0x10   :  { %236 = vmatpush.bf16.msra.mxu0 %v1669_v28  ;;  %274 = vmatpush.bf16.msra.mxu3 %v1677_v34  ;;  %v1683_v42 = vor.u32 %v1459_v39, %v1357_v40  ;;  %v1450_v47 = vld [vmem:[#allocation4 + $0x64] sm:$0xf]  ;;  %v1455_v48 = vld [vmem:[#allocation4 + $0x8c] sm:$0xf]  ;;  %v1341_v49 = vld [vmem:[#allocation4 + $0x98] sm:$0xf0]  ;;  %v1693_v53 = vor.u32 %v1452_v44, %v1315_v43 }
  0x11   :  { %249 = vmatpush.bf16.msra.mxu1 %v1673_v32  ;;  %v1317_v50 = vld [vmem:[#allocation4 + $0x70] sm:$0xf0]  ;;  %v1323_v51 = vld [vmem:[#allocation4 + $0x68] sm:$0xf]  ;;  %v1453_v52 = vld [vmem:[#allocation4 + $0x74] sm:$0xf0]  ;;  %v1695_v54 = vor.u32 %v1455_v48, %v1341_v49 }
  0x12   :  { %262 = vmatpush.bf16.msra.mxu2 %v1675_v33  ;;  %v1299_v55 = vld [vmem:[#allocation4 + $0x40] sm:$0xf]  ;;  %v1448_v56 = vld [vmem:[#allocation4 + $0x4c] sm:$0xf0]  ;;  %v1699_v57 = vor.u32 %v1450_v47, %v1317_v50  ;;  %v1701_v58 = vor.u32 %v1453_v52, %v1323_v51  ;;  %v1446_v59 = vld [vmem:[#allocation4 + $0x44] sm:$0xf] }
  0x13   :  { %v1451_v60 = vld [vmem:[#allocation4 + $0x6c] sm:$0xf]  ;;  %v1325_v61 = vld [vmem:[#allocation4 + $0x78] sm:$0xf0]  ;;  %v1301_v62 = vld [vmem:[#allocation4 + $0x50] sm:$0xf0]  ;;  %v1705_v1 = vor.u32 %v1448_v56, %v1299_v55 }
  0x14   :  { %237 = vmatpush.bf16.msra.mxu0 %v1681_v41  ;;  %275 = vmatpush.bf16.msra.mxu3 %v1683_v42  ;;  %v1307_v63 = vld [vmem:[#allocation4 + $0x48] sm:$0xf]  ;;  %v1449_v0 = vld [vmem:[#allocation4 + $0x54] sm:$0xf0]  ;;  %v1707_v2 = vor.u32 %v1451_v60, %v1325_v61  ;;  %v1283_v4 = vld [vmem:[#allocation4 + $0x20] sm:$0xf]  ;;  %v1711_v6 = vor.u32 %v1446_v59, %v1301_v62 }
  0x15   :  { %250 = vmatpush.bf16.msra.mxu1 %v1687_v45  ;;  %v1444_v5 = vld [vmem:[#allocation4 + $0x2c] sm:$0xf0]  ;;  %v1713_v9 = vor.u32 %v1449_v0, %v1307_v63  ;;  %v1442_v10 = vld [vmem:[#allocation4 + $0x24] sm:$0xf]  ;;  %v1447_v11 = vld [vmem:[#allocation4 + $0x4c] sm:$0xf] }
  0x16   :  { %263 = vmatpush.bf16.msra.mxu2 %v1689_v46  ;;  %v1309_v13 = vld [vmem:[#allocation4 + $0x58] sm:$0xf0]  ;;  %v1285_v14 = vld [vmem:[#allocation4 + $0x30] sm:$0xf0]  ;;  %v1291_v15 = vld [vmem:[#allocation4 + $0x28] sm:$0xf]  ;;  %v1717_v19 = vor.u32 %v1444_v5, %v1283_v4 }
  0x17   :  { %v1445_v18 = vld [vmem:[#allocation4 + $0x34] sm:$0xf0]  ;;  %v1719_v20 = vor.u32 %v1447_v11, %v1309_v13  ;;  %v1267_v22 = vld [vmem:[#allocation4] sm:$0xf]  ;;  %v1440_v23 = vld [vmem:[#allocation4 + $0xc] sm:$0xf0]  ;;  %v1723_v24 = vor.u32 %v1442_v10, %v1285_v14 }
  0x18   :  { %238 = vmatpush.bf16.msra.mxu0 %v1693_v53  ;;  %276 = vmatpush.bf16.msra.mxu3 %v1695_v54  ;;  %v1725_v25 = vor.u32 %v1445_v18, %v1291_v15  ;;  %v1438_v26 = vld [vmem:[#allocation4 + $0x4] sm:$0xf]  ;;  %v1443_v27 = vld [vmem:[#allocation4 + $0x2c] sm:$0xf]  ;;  %v1293_v29 = vld [vmem:[#allocation4 + $0x38] sm:$0xf0]  ;;  %v1729_v36 = vor.u32 %v1440_v23, %v1267_v22 }
  0x19   :  { %251 = vmatpush.bf16.msra.mxu1 %v1699_v57  ;;  %v1269_v30 = vld [vmem:[#allocation4 + $0x10] sm:$0xf0]  ;;  %v1275_v31 = vld [vmem:[#allocation4 + $0x8] sm:$0xf]  ;;  %v1441_v35 = vld [vmem:[#allocation4 + $0x14] sm:$0xf0]  ;;  %v1731_v37 = vor.u32 %v1443_v27, %v1293_v29 }
  0x1a   :  { %264 = vmatpush.bf16.msra.mxu2 %v1701_v58  ;;  %v1735_v38 = vor.u32 %v1438_v26, %v1269_v30  ;;  %v1737_v39 = vor.u32 %v1441_v35, %v1275_v31  ;;  %v1439_v40 = vld [vmem:[#allocation4 + $0xc] sm:$0xf]  ;;  %v1277_v43 = vld [vmem:[#allocation4 + $0x18] sm:$0xf0]  ;;  %v1631_v47 = vmov 0.0|0.0   ;;  %v67_v48 = vld [vmem:[%s2070_s0] sm:$0xff] }
  0x1b   :  { %v1743_v44 = vor.u32 %v1439_v40, %v1277_v43  ;;  %v69_v49 = vunpack.c.l.bf16 %v67_v48  ;;  %v70_v50 = vunpack.c.h.bf16 %v67_v48  ;;  %v68_v56 = vld [vmem:[%s2070_s0 + $0x8] sm:$0xff] }
  0x1c   :  { %239 = vmatpush.bf16.msra.mxu0 %v1705_v1  ;;  %277 = vmatpush.bf16.msra.mxu3 %v1707_v2  ;;  %v71_v62 = vunpack.c.l.bf16 %v68_v56  ;;  %v72_v22 = vunpack.c.h.bf16 %v68_v56 }
  0x1d   :  { %252 = vmatpush.bf16.msra.mxu1 %v1711_v6 }
  0x1e   :  { %265 = vmatpush.bf16.msra.mxu2 %v1713_v9 }
  0x20   :  { %240 = vmatpush.bf16.msra.mxu0 %v1717_v19  ;;  %278 = vmatpush.bf16.msra.mxu3 %v1719_v20 }
  0x21   :  { %253 = vmatpush.bf16.msra.mxu1 %v1723_v24 }
  0x22   :  { %266 = vmatpush.bf16.msra.mxu2 %v1725_v25 }
  0x24   :  { %241 = vmatpush.bf16.msra.mxu0 %v1729_v36  ;;  %279 = vmatpush.bf16.msra.mxu3 %v1731_v37 }
  0x25   :  { %254 = vmatpush.bf16.msra.mxu1 %v1735_v38 }
  0x26   :  { %267 = vmatpush.bf16.msra.mxu2 %v1737_v39 }
  0x27   :  { %242 = vmatmul.bf16.vlgmr.msra.gmra.mxu0 %v1631_v47 }
  0x28   :  { %362 = vmatpush.bf16.msrb.mxu0 %v1650_v3  ;;  %255 = vmatmul.bf16.vlgmr.msra.gmra.mxu1 %v1631_v47 }
  0x29   :  { %375 = vmatpush.bf16.msrb.mxu1 %v1652_v7  ;;  %268 = vmatmul.bf16.vlgmr.msra.gmra.mxu2 %v1631_v47 }
  0x2a   :  { %388 = vmatpush.bf16.msrb.mxu2 %v1654_v8  ;;  %280 = vmatpush.bf16.msra.mxu3 %v1743_v44 }
  0x2c   :  { %363 = vmatpush.bf16.msrb.mxu0 %v1657_v12 }
  0x2d   :  { %376 = vmatpush.bf16.msrb.mxu1 %v1661_v16  ;;  %281 = vmatmul.bf16.vlgmr.msra.gmra.mxu3 %v1631_v47 }
  0x2e   :  { %401 = vmatpush.bf16.msrb.mxu3 %v1665_v21  ;;  %389 = vmatpush.bf16.msrb.mxu2 %v1663_v17 }
  0x30   :  { %364 = vmatpush.bf16.msrb.mxu0 %v1669_v28 }
  0x31   :  { %377 = vmatpush.bf16.msrb.mxu1 %v1673_v32 }
  0x32   :  { %402 = vmatpush.bf16.msrb.mxu3 %v1677_v34  ;;  %390 = vmatpush.bf16.msrb.mxu2 %v1675_v33 }
  0x34   :  { %365 = vmatpush.bf16.msrb.mxu0 %v1681_v41 }
  0x35   :  { %378 = vmatpush.bf16.msrb.mxu1 %v1687_v45 }
  0x36   :  { %403 = vmatpush.bf16.msrb.mxu3 %v1683_v42  ;;  %391 = vmatpush.bf16.msrb.mxu2 %v1689_v46 }
  0x38   :  { %366 = vmatpush.bf16.msrb.mxu0 %v1693_v53 }
  0x39   :  { %379 = vmatpush.bf16.msrb.mxu1 %v1699_v57 }
  0x3a   :  { %404 = vmatpush.bf16.msrb.mxu3 %v1695_v54  ;;  %392 = vmatpush.bf16.msrb.mxu2 %v1701_v58 }
  0x3c   :  { %367 = vmatpush.bf16.msrb.mxu0 %v1705_v1 }
  0x3d   :  { %380 = vmatpush.bf16.msrb.mxu1 %v1711_v6 }
  0x3e   :  { %405 = vmatpush.bf16.msrb.mxu3 %v1707_v2  ;;  %393 = vmatpush.bf16.msrb.mxu2 %v1713_v9 }
  0x40   :  { %368 = vmatpush.bf16.msrb.mxu0 %v1717_v19 }
  0x41   :  { %381 = vmatpush.bf16.msrb.mxu1 %v1723_v24 }
  0x42   :  { %406 = vmatpush.bf16.msrb.mxu3 %v1719_v20  ;;  %394 = vmatpush.bf16.msrb.mxu2 %v1725_v25 }
  0x44   :  { %369 = vmatpush.bf16.msrb.mxu0 %v1729_v36 }
  0x45   :  { %382 = vmatpush.bf16.msrb.mxu1 %v1735_v38 }
  0x46   :  { %407 = vmatpush.bf16.msrb.mxu3 %v1731_v37  ;;  %395 = vmatpush.bf16.msrb.mxu2 %v1737_v39 }
  0x48   :  { %491 = vmatpush.bf16.msra.mxu0 %v1650_v3 }
  0x49   :  { %504 = vmatpush.bf16.msra.mxu1 %v1652_v7 }
  0x4a   :  { %517 = vmatpush.bf16.msra.mxu2 %v1654_v8  ;;  %408 = vmatpush.bf16.msrb.mxu3 %v1743_v44 }
  0x4c   :  { %492 = vmatpush.bf16.msra.mxu0 %v1657_v12 }
  0x4d   :  { %505 = vmatpush.bf16.msra.mxu1 %v1661_v16 }
  0x4e   :  { %530 = vmatpush.bf16.msra.mxu3 %v1665_v21  ;;  %518 = vmatpush.bf16.msra.mxu2 %v1663_v17 }
  0x50   :  { %493 = vmatpush.bf16.msra.mxu0 %v1669_v28 }
  0x51   :  { %506 = vmatpush.bf16.msra.mxu1 %v1673_v32 }
  0x52   :  { %531 = vmatpush.bf16.msra.mxu3 %v1677_v34  ;;  %519 = vmatpush.bf16.msra.mxu2 %v1675_v33 }
  0x54   :  { %494 = vmatpush.bf16.msra.mxu0 %v1681_v41 }
  0x55   :  { %507 = vmatpush.bf16.msra.mxu1 %v1687_v45 }
  0x56   :  { %532 = vmatpush.bf16.msra.mxu3 %v1683_v42  ;;  %520 = vmatpush.bf16.msra.mxu2 %v1689_v46 }
  0x58   :  { %495 = vmatpush.bf16.msra.mxu0 %v1693_v53 }
  0x59   :  { %508 = vmatpush.bf16.msra.mxu1 %v1699_v57 }
  0x5a   :  { %533 = vmatpush.bf16.msra.mxu3 %v1695_v54  ;;  %521 = vmatpush.bf16.msra.mxu2 %v1701_v58 }
  0x5c   :  { %496 = vmatpush.bf16.msra.mxu0 %v1705_v1 }
  0x5d   :  { %509 = vmatpush.bf16.msra.mxu1 %v1711_v6 }
  0x5e   :  { %534 = vmatpush.bf16.msra.mxu3 %v1707_v2  ;;  %522 = vmatpush.bf16.msra.mxu2 %v1713_v9 }
  0x60   :  { %497 = vmatpush.bf16.msra.mxu0 %v1717_v19 }
  0x61   :  { %510 = vmatpush.bf16.msra.mxu1 %v1723_v24 }
  0x62   :  { %535 = vmatpush.bf16.msra.mxu3 %v1719_v20  ;;  %523 = vmatpush.bf16.msra.mxu2 %v1725_v25 }
  0x64   :  { %498 = vmatpush.bf16.msra.mxu0 %v1729_v36 }
  0x65   :  { %511 = vmatpush.bf16.msra.mxu1 %v1735_v38 }
  0x66   :  { %536 = vmatpush.bf16.msra.mxu3 %v1731_v37  ;;  %524 = vmatpush.bf16.msra.mxu2 %v1737_v39 }
  0x6a   :  { %537 = vmatpush.bf16.msra.mxu3 %v1743_v44 }
  0xa4   :  { %v243_v51 = vpop.f32.mrf.mxu0 }
  0xa5   :  { %v286_v52 = vadd.f32 %v243_v51, %v69_v49  ;;  %v256_v55 = vpop.f32.mrf.mxu1 }
  0xa6   :  { %v287_v59 = vadd.f32 %v256_v55, %v70_v50 }
  0xa7   :  { %v1393_v60 = vmul.f32 -1.442695, %v286_v52 }
  0xa8   :  { %v1394_v61 = vmul.f32 -1.442695, %v287_v59 }
  0xa9   :  { %1474 = vpow2.f32 %v1393_v60 }
  0xaa   :  { %1476 = vpow2.f32 %v1394_v61 }
  0xac   :  { %v269_v63 = vpop.f32.mrf.mxu2  ;;  %v245_v4 = vpop.f32.mrf.mxu0 }
  0xad   :  { %v288_v0 = vadd.f32 %v269_v63, %v71_v62  ;;  %v258_v5 = vpop.f32.mrf.mxu1 }
  0xaf   :  { %v1395_v10 = vmul.f32 -1.442695, %v288_v0  ;;  %v1475_v11 = vpop.eup %1474 }
  0xb0   :  { %v282_v13 = vpop.f32.mrf.mxu3  ;;  %v1477_v14 = vpop.eup %1476  ;;  %v299_v15 = vadd.f32 1.0, %v1475_v11 }
  0xb1   :  { %1478 = vpow2.f32 %v1395_v10  ;;  %v300_v18 = vadd.f32 1.0, %v1477_v14  ;;  %v289_v27 = vadd.f32 %v282_v13, %v72_v22 }
  0xb2   :  { %1480 = vrcp.f32 %v299_v15  ;;  %v313_v49 = vand.u32 2147483648, %v299_v15  ;;  %v311_v52 = vand.u32 2147483647, %v299_v15  ;;  %vm307_vm2 = vweird.f32 %v299_v15 }
  0xb3   :  { %1482 = vrcp.f32 %v300_v18  ;;  %v328_v50 = vand.u32 2147483648, %v300_v18  ;;  %v326_v56 = vand.u32 2147483647, %v300_v18  ;;  %vm322_vm3 = vweird.f32 %v300_v18 }
  0xb4   :  { %v271_v23 = vpop.f32.mrf.mxu2  ;;  %v314_v63 = vor.u32 1.1754944e-38, %v313_v49  ;;  %vm312_vm5 = vcmp.eq.f32.partialorder %v311_v52, 8.507059e+37 }
  0xb5   :  { %v329_v4 = vor.u32 1.1754944e-38, %v328_v50  ;;  %vm327_vm7 = vcmp.eq.f32.partialorder %v326_v56, 8.507059e+37 }
  0xb7   :  { %v1479_v26 = vpop.eup %1478 }
  0xb8   :  { %v301_v29 = vadd.f32 1.0, %v1479_v26  ;;  %v284_v30 = vpop.f32.mrf.mxu3  ;;  %v1481_v31 = vpop.eup %1480 }
  0xb9   :  { %v1483_v35 = vpop.eup %1482  ;;  %v303_v40 = vmul.f32 %v1481_v31, %v299_v15  ;;  %vm308_vm0 = vweird.f32 %v1481_v31 }
  0xba   :  { %1484 = vrcp.f32 %v301_v29  ;;  %v318_v43 = vmul.f32 %v1483_v35, %v300_v18  ;;  %vm323_vm1 = vweird.f32 %v1483_v35  ;;  %vm309_vm4 = vmor %vm307_vm2, %vm308_vm0  ;;  %v343_v18 = vand.u32 2147483648, %v301_v29 }
  0xbb   :  { %1486 = vtanh.f32 %v289_v27  ;;  %v304_v47 = vsub.f32 1.0, %v303_v40  ;;  %vm324_vm6 = vmor %vm322_vm3, %vm323_vm1  ;;  %vm337_vm9 = vweird.f32 %v301_v29  ;;  %v341_v30 = vand.u32 2147483647, %v301_v29 }
  0xbc   :  { %v319_v48 = vsub.f32 1.0, %v318_v43  ;;  %v344_v40 = vor.u32 1.1754944e-38, %v343_v18 }
  0xbd   :  { %v305_v51 = vmul.f32 %v1481_v31, %v304_v47  ;;  %vm342_vm11 = vcmp.eq.f32.partialorder %v341_v30, 8.507059e+37 }
  0xbe   :  { %v320_v55 = vmul.f32 %v1483_v35, %v319_v48 }
  0xbf   :  { %v306_v60 = vadd.f32 %v1481_v31, %v305_v51 }
  0xc0   :  { %v1485_v59 = vpop.eup %1484  ;;  %v321_v0 = vadd.f32 %v1483_v35, %v320_v55 }
  0xc1   :  { %v1487_v61 = vpop.eup %1486  ;;  %v333_v62 = vmul.f32 %v1485_v59, %v301_v29  ;;  %v310_v5 = vsel %vm309_vm4, %v1481_v31, %v306_v60  ;;  %vm338_vm8 = vweird.f32 %v1485_v59  ;;  %v1396_v29 = vld [vmem:[%s2070_s0 + $0x10] sm:$0xff] }
  0xc2   :  { %v315_v11 = vsel %vm312_vm5, %v314_v63, %v310_v5  ;;  %v325_v13 = vsel %vm324_vm6, %v1483_v35, %v321_v0  ;;  %vm339_vm10 = vmor %vm337_vm9, %vm338_vm8  ;;  %v358_v49 = vunpack.c.l.bf16 %v1396_v29  ;;  %v359_v50 = vunpack.c.h.bf16 %v1396_v29 }
  0xc3   :  { %v334_v10 = vsub.f32 1.0, %v333_v62  ;;  %v330_v14 = vsel %vm327_vm7, %v329_v4, %v325_v13  ;;  %v349_v22 = vmul.f32 %v1487_v61, %v315_v11 }
  0xc4   :  { %v348_v26 = vmul.f32 0.0, %v330_v14 }
  0xc5   :  { %v335_v23 = vmul.f32 %v1485_v59, %v334_v10 }
  0xc6   :  { %v1816_v27 = vadd.f32 %v349_v22, %v348_v26 }
  0xc7   :  { %v336_v15 = vadd.f32 %v1485_v59, %v335_v23 }
  0xc8   :  { %1488 = vtanh.f32 %v1816_v27 }
  0xc9   :  { %v340_v31 = vsel %vm339_vm10, %v1485_v59, %v336_v15  ;;  %v1397_v59 = vld [vmem:[%s2070_s0 + $0x18] sm:$0xff] }
  0xca   :  { %v345_v35 = vsel %vm342_vm11, %v344_v40, %v340_v31  ;;  %v360_v62 = vunpack.c.l.bf16 %v1397_v59  ;;  %v361_v18 = vunpack.c.h.bf16 %v1397_v59 }
  0xce   :  { %v1489_v43 = vpop.eup %1488 }
  0xcf   :  { %v352_v47 = vmul.f32 %v1489_v43, %v345_v35 }
  0xd1   :  { %v353_v48 = vpack.c.bf16 %v352_v47, %v352_v47 }
  0xd3   :  { %354 = vst [vmem:[%s2072_s2] sm:$0xf] %v353_v48  ;;  %370 = vmatmul.bf16.vlgmr.msrb.gmra.mxu0 %v353_v48  ;;  %383 = vmatmul.bf16.vlgmr.msrb.gmra.mxu1 %v353_v48 }
  0xd4   :  { %396 = vmatmul.bf16.vlgmr.msrb.gmra.mxu2 %v353_v48  ;;  %409 = vmatmul.bf16.vlgmr.msrb.gmra.mxu3 %v353_v48 }
  0xd5   :  { %620 = vmatpush.bf16.msrb.mxu0 %v1650_v3  ;;  %633 = vmatpush.bf16.msrb.mxu1 %v1652_v7 }
  0xd6   :  { %646 = vmatpush.bf16.msrb.mxu2 %v1654_v8  ;;  %659 = vmatpush.bf16.msrb.mxu3 %v1665_v21 }
  0xd9   :  { %621 = vmatpush.bf16.msrb.mxu0 %v1657_v12  ;;  %634 = vmatpush.bf16.msrb.mxu1 %v1661_v16 }
  0xda   :  { %647 = vmatpush.bf16.msrb.mxu2 %v1663_v17  ;;  %660 = vmatpush.bf16.msrb.mxu3 %v1677_v34 }
  0xdd   :  { %622 = vmatpush.bf16.msrb.mxu0 %v1669_v28  ;;  %635 = vmatpush.bf16.msrb.mxu1 %v1673_v32 }
  0xde   :  { %648 = vmatpush.bf16.msrb.mxu2 %v1675_v33  ;;  %661 = vmatpush.bf16.msrb.mxu3 %v1683_v42 }
  0xe1   :  { %623 = vmatpush.bf16.msrb.mxu0 %v1681_v41  ;;  %636 = vmatpush.bf16.msrb.mxu1 %v1687_v45 }
  0xe2   :  { %649 = vmatpush.bf16.msrb.mxu2 %v1689_v46  ;;  %662 = vmatpush.bf16.msrb.mxu3 %v1695_v54 }
  0xe5   :  { %624 = vmatpush.bf16.msrb.mxu0 %v1693_v53  ;;  %637 = vmatpush.bf16.msrb.mxu1 %v1699_v57 }
  0xe6   :  { %650 = vmatpush.bf16.msrb.mxu2 %v1701_v58  ;;  %663 = vmatpush.bf16.msrb.mxu3 %v1707_v2 }
  0xe9   :  { %625 = vmatpush.bf16.msrb.mxu0 %v1705_v1  ;;  %638 = vmatpush.bf16.msrb.mxu1 %v1711_v6 }
  0xea   :  { %651 = vmatpush.bf16.msrb.mxu2 %v1713_v9  ;;  %664 = vmatpush.bf16.msrb.mxu3 %v1719_v20 }
  0xed   :  { %626 = vmatpush.bf16.msrb.mxu0 %v1717_v19  ;;  %639 = vmatpush.bf16.msrb.mxu1 %v1723_v24 }
  0xee   :  { %652 = vmatpush.bf16.msrb.mxu2 %v1725_v25  ;;  %665 = vmatpush.bf16.msrb.mxu3 %v1731_v37 }
  0xf1   :  { %627 = vmatpush.bf16.msrb.mxu0 %v1729_v36  ;;  %640 = vmatpush.bf16.msrb.mxu1 %v1735_v38 }
  0xf2   :  { %653 = vmatpush.bf16.msrb.mxu2 %v1737_v39  ;;  %666 = vmatpush.bf16.msrb.mxu3 %v1743_v44 }
 0x150   :  { %v371_v51 = vpop.f32.mrf.mxu0  ;;  %v384_v52 = vpop.f32.mrf.mxu1 }
 0x151   :  { %v414_v55 = vadd.f32 %v371_v51, %v358_v49  ;;  %v415_v56 = vadd.f32 %v384_v52, %v359_v50 }
 0x153   :  { %v1398_v60 = vmul.f32 -1.442695, %v414_v55  ;;  %v1399_v61 = vmul.f32 -1.442695, %v415_v56 }
 0x155   :  { %1490 = vpow2.f32 %v1398_v60 }
 0x156   :  { %1492 = vpow2.f32 %v1399_v61 }
 0x157   :  { %v397_v63 = vpop.f32.mrf.mxu2  ;;  %v410_v0 = vpop.f32.mrf.mxu3 }
 0x158   :  { %v416_v4 = vadd.f32 %v397_v63, %v360_v62  ;;  %v373_v5 = vpop.f32.mrf.mxu0  ;;  %v386_v10 = vpop.f32.mrf.mxu1  ;;  %v417_v43 = vadd.f32 %v410_v0, %v361_v18 }
 0x15a   :  { %v1400_v11 = vmul.f32 -1.442695, %v416_v4 }
 0x15b   :  { %v1491_v13 = vpop.eup %1490 }
 0x15c   :  { %v1493_v14 = vpop.eup %1492  ;;  %v427_v22 = vadd.f32 1.0, %v1491_v13  ;;  %1494 = vpow2.f32 %v1400_v11 }
 0x15d   :  { %v428_v23 = vadd.f32 1.0, %v1493_v14 }
 0x15e   :  { %1496 = vrcp.f32 %v427_v22  ;;  %v441_v50 = vand.u32 2147483648, %v427_v22  ;;  %v439_v55 = vand.u32 2147483647, %v427_v22  ;;  %vm435_vm14 = vweird.f32 %v427_v22 }
 0x15f   :  { %1498 = vrcp.f32 %v428_v23  ;;  %v399_v26 = vpop.f32.mrf.mxu2  ;;  %v412_v15 = vpop.f32.mrf.mxu3  ;;  %v456_v51 = vand.u32 2147483648, %v428_v23  ;;  %v454_v60 = vand.u32 2147483647, %v428_v23  ;;  %vm450_vm15 = vweird.f32 %v428_v23 }
 0x160   :  { %v442_v63 = vor.u32 1.1754944e-38, %v441_v50  ;;  %vm440_vm2 = vcmp.eq.f32.partialorder %v439_v55, 8.507059e+37 }
 0x161   :  { %v457_v4 = vor.u32 1.1754944e-38, %v456_v51  ;;  %vm455_vm3 = vcmp.eq.f32.partialorder %v454_v60, 8.507059e+37 }
 0x162   :  { %v1495_v30 = vpop.eup %1494 }
 0x163   :  { %v429_v31 = vadd.f32 1.0, %v1495_v30 }
 0x164   :  { %v1497_v40 = vpop.eup %1496 }
 0x165   :  { %v1499_v35 = vpop.eup %1498  ;;  %v431_v47 = vmul.f32 %v1497_v40, %v427_v22  ;;  %1500 = vrcp.f32 %v429_v31  ;;  %vm436_vm12 = vweird.f32 %v1497_v40  ;;  %vm465_vm5 = vweird.f32 %v429_v31 }
 0x166   :  { %v446_v48 = vmul.f32 %v1499_v35, %v428_v23  ;;  %1502 = vtanh.f32 %v417_v43  ;;  %vm451_vm13 = vweird.f32 %v1499_v35  ;;  %vm437_vm0 = vmor %vm435_vm14, %vm436_vm12  ;;  %v471_v43 = vand.u32 2147483648, %v429_v31 }
 0x167   :  { %v432_v29 = vsub.f32 1.0, %v431_v47  ;;  %vm452_vm1 = vmor %vm450_vm15, %vm451_vm13 }
 0x168   :  { %v447_v49 = vsub.f32 1.0, %v446_v48  ;;  %v472_v48 = vor.u32 1.1754944e-38, %v471_v43 }
 0x169   :  { %v433_v52 = vmul.f32 %v1497_v40, %v432_v29 }
 0x16a   :  { %v448_v56 = vmul.f32 %v1499_v35, %v447_v49 }
 0x16b   :  { %v1501_v59 = vpop.eup %1500  ;;  %v434_v61 = vadd.f32 %v1497_v40, %v433_v52 }
 0x16c   :  { %v461_v62 = vmul.f32 %v1501_v59, %v429_v31  ;;  %v449_v0 = vadd.f32 %v1499_v35, %v448_v56  ;;  %v1503_v10 = vpop.eup %1502  ;;  %vm466_vm4 = vweird.f32 %v1501_v59 }
 0x16d   :  { %v438_v5 = vsel %vm437_vm0, %v1497_v40, %v434_v61  ;;  %v469_v40 = vand.u32 2147483647, %v429_v31  ;;  %vm467_vm6 = vmor %vm465_vm5, %vm466_vm4 }
 0x16e   :  { %v462_v11 = vsub.f32 1.0, %v461_v62  ;;  %v443_v13 = vsel %vm440_vm2, %v442_v63, %v438_v5  ;;  %v453_v14 = vsel %vm452_vm1, %v1499_v35, %v449_v0 }
 0x16f   :  { %v458_v26 = vsel %vm455_vm3, %v457_v4, %v453_v14  ;;  %v477_v15 = vmul.f32 %v1503_v10, %v443_v13  ;;  %vm470_vm7 = vcmp.eq.f32.partialorder %v469_v40, 8.507059e+37 }
 0x170   :  { %v463_v18 = vmul.f32 %v1501_v59, %v462_v11  ;;  %v476_v30 = vmul.f32 %v458_v26, %v1816_v27  ;;  %v1402_v27 = vld [vmem:[%s2070_s0 + $0x20] sm:$0xff] }
 0x171   :  { %v487_v31 = vunpack.c.l.bf16 %v1402_v27  ;;  %v488_v51 = vunpack.c.h.bf16 %v1402_v27 }
 0x172   :  { %v1861_v22 = vadd.f32 %v477_v15, %v476_v30  ;;  %v464_v23 = vadd.f32 %v1501_v59, %v463_v18 }
 0x174   :  { %1504 = vtanh.f32 %v1861_v22  ;;  %v468_v47 = vsel %vm467_vm6, %v1501_v59, %v464_v23  ;;  %v1403_v59 = vld [vmem:[%s2070_s0 + $0x28] sm:$0xff] }
 0x175   :  { %v473_v29 = vsel %vm470_vm7, %v472_v48, %v468_v47  ;;  %v489_v63 = vunpack.c.l.bf16 %v1403_v59  ;;  %v490_v43 = vunpack.c.h.bf16 %v1403_v59 }
 0x17a   :  { %v1505_v35 = vpop.eup %1504 }
 0x17b   :  { %v480_v49 = vmul.f32 %v1505_v35, %v473_v29 }
 0x17d   :  { %v481_v50 = vpack.c.bf16 %v480_v49, %v480_v49 }
 0x17f   :  { %1401 = vst [vmem:[%s2072_s2 + $0x4] sm:$0xf] %v481_v50  ;;  %499 = vmatmul.bf16.vlgmr.msra.gmra.mxu0 %v481_v50  ;;  %512 = vmatmul.bf16.vlgmr.msra.gmra.mxu1 %v481_v50 }
 0x180   :  { %525 = vmatmul.bf16.vlgmr.msra.gmra.mxu2 %v481_v50  ;;  %538 = vmatmul.bf16.vlgmr.msra.gmra.mxu3 %v481_v50 }
 0x181   :  { %749 = vmatpush.bf16.msra.mxu0 %v1650_v3  ;;  %762 = vmatpush.bf16.msra.mxu1 %v1652_v7 }
 0x182   :  { %775 = vmatpush.bf16.msra.mxu2 %v1654_v8  ;;  %788 = vmatpush.bf16.msra.mxu3 %v1665_v21 }
 0x185   :  { %750 = vmatpush.bf16.msra.mxu0 %v1657_v12  ;;  %763 = vmatpush.bf16.msra.mxu1 %v1661_v16 }
 0x186   :  { %776 = vmatpush.bf16.msra.mxu2 %v1663_v17  ;;  %789 = vmatpush.bf16.msra.mxu3 %v1677_v34 }
 0x189   :  { %751 = vmatpush.bf16.msra.mxu0 %v1669_v28  ;;  %764 = vmatpush.bf16.msra.mxu1 %v1673_v32 }
 0x18a   :  { %777 = vmatpush.bf16.msra.mxu2 %v1675_v33  ;;  %790 = vmatpush.bf16.msra.mxu3 %v1683_v42 }
 0x18d   :  { %752 = vmatpush.bf16.msra.mxu0 %v1681_v41  ;;  %765 = vmatpush.bf16.msra.mxu1 %v1687_v45 }
 0x18e   :  { %778 = vmatpush.bf16.msra.mxu2 %v1689_v46  ;;  %791 = vmatpush.bf16.msra.mxu3 %v1695_v54 }
 0x191   :  { %753 = vmatpush.bf16.msra.mxu0 %v1693_v53  ;;  %766 = vmatpush.bf16.msra.mxu1 %v1699_v57 }
 0x192   :  { %779 = vmatpush.bf16.msra.mxu2 %v1701_v58  ;;  %792 = vmatpush.bf16.msra.mxu3 %v1707_v2 }
 0x195   :  { %754 = vmatpush.bf16.msra.mxu0 %v1705_v1  ;;  %767 = vmatpush.bf16.msra.mxu1 %v1711_v6 }
 0x196   :  { %780 = vmatpush.bf16.msra.mxu2 %v1713_v9  ;;  %793 = vmatpush.bf16.msra.mxu3 %v1719_v20 }
 0x199   :  { %755 = vmatpush.bf16.msra.mxu0 %v1717_v19  ;;  %768 = vmatpush.bf16.msra.mxu1 %v1723_v24 }
 0x19a   :  { %781 = vmatpush.bf16.msra.mxu2 %v1725_v25  ;;  %794 = vmatpush.bf16.msra.mxu3 %v1731_v37 }
 0x19d   :  { %756 = vmatpush.bf16.msra.mxu0 %v1729_v36  ;;  %769 = vmatpush.bf16.msra.mxu1 %v1735_v38 }
 0x19e   :  { %782 = vmatpush.bf16.msra.mxu2 %v1737_v39  ;;  %795 = vmatpush.bf16.msra.mxu3 %v1743_v44 }
 0x1fc   :  { %v500_v52 = vpop.f32.mrf.mxu0  ;;  %v513_v55 = vpop.f32.mrf.mxu1 }
 0x1fd   :  { %v543_v56 = vadd.f32 %v500_v52, %v487_v31  ;;  %v544_v60 = vadd.f32 %v513_v55, %v488_v51 }
 0x1ff   :  { %v1404_v61 = vmul.f32 -1.442695, %v543_v56  ;;  %v1405_v62 = vmul.f32 -1.442695, %v544_v60 }
 0x201   :  { %1506 = vpow2.f32 %v1404_v61 }
 0x202   :  { %1508 = vpow2.f32 %v1405_v62 }
 0x203   :  { %v526_v0 = vpop.f32.mrf.mxu2  ;;  %v539_v4 = vpop.f32.mrf.mxu3 }
 0x204   :  { %v545_v5 = vadd.f32 %v526_v0, %v489_v63  ;;  %v502_v10 = vpop.f32.mrf.mxu0  ;;  %v515_v11 = vpop.f32.mrf.mxu1  ;;  %v546_v35 = vadd.f32 %v539_v4, %v490_v43 }
 0x206   :  { %v1406_v13 = vmul.f32 -1.442695, %v545_v5 }
 0x207   :  { %v1507_v14 = vpop.eup %1506 }
 0x208   :  { %v1509_v26 = vpop.eup %1508  ;;  %v556_v15 = vadd.f32 1.0, %v1507_v14  ;;  %1510 = vpow2.f32 %v1406_v13 }
 0x209   :  { %v557_v18 = vadd.f32 1.0, %v1509_v26 }
 0x20a   :  { %1512 = vrcp.f32 %v556_v15  ;;  %v570_v51 = vand.u32 2147483648, %v556_v15  ;;  %v568_v56 = vand.u32 2147483647, %v556_v15  ;;  %vm564_vm10 = vweird.f32 %v556_v15 }
 0x20b   :  { %1514 = vrcp.f32 %v557_v18  ;;  %v528_v30 = vpop.f32.mrf.mxu2  ;;  %v541_v23 = vpop.f32.mrf.mxu3  ;;  %v585_v52 = vand.u32 2147483648, %v557_v18  ;;  %v583_v61 = vand.u32 2147483647, %v557_v18  ;;  %vm579_vm11 = vweird.f32 %v557_v18 }
 0x20c   :  { %v571_v0 = vor.u32 1.1754944e-38, %v570_v51  ;;  %vm569_vm14 = vcmp.eq.f32.partialorder %v568_v56, 8.507059e+37 }
 0x20d   :  { %v586_v5 = vor.u32 1.1754944e-38, %v585_v52  ;;  %vm584_vm15 = vcmp.eq.f32.partialorder %v583_v61, 8.507059e+37 }
 0x20e   :  { %v1511_v40 = vpop.eup %1510 }
 0x20f   :  { %v558_v47 = vadd.f32 1.0, %v1511_v40 }
 0x210   :  { %v1513_v48 = vpop.eup %1512 }
 0x211   :  { %v1515_v29 = vpop.eup %1514  ;;  %v560_v49 = vmul.f32 %v1513_v48, %v556_v15  ;;  %1516 = vrcp.f32 %v558_v47  ;;  %vm565_vm8 = vweird.f32 %v1513_v48  ;;  %vm594_vm1 = vweird.f32 %v558_v47 }
 0x212   :  { %v575_v50 = vmul.f32 %v1515_v29, %v557_v18  ;;  %1518 = vtanh.f32 %v546_v35  ;;  %vm580_vm9 = vweird.f32 %v1515_v29  ;;  %vm566_vm12 = vmor %vm564_vm10, %vm565_vm8  ;;  %v600_v35 = vand.u32 2147483648, %v558_v47 }
 0x213   :  { %v561_v27 = vsub.f32 1.0, %v560_v49  ;;  %vm581_vm13 = vmor %vm579_vm11, %vm580_vm9 }
 0x214   :  { %v576_v31 = vsub.f32 1.0, %v575_v50  ;;  %v601_v50 = vor.u32 1.1754944e-38, %v600_v35 }
 0x215   :  { %v562_v55 = vmul.f32 %v1513_v48, %v561_v27 }
 0x216   :  { %v577_v60 = vmul.f32 %v1515_v29, %v576_v31 }
 0x217   :  { %v1517_v59 = vpop.eup %1516  ;;  %v563_v62 = vadd.f32 %v1513_v48, %v562_v55 }
 0x218   :  { %v590_v63 = vmul.f32 %v1517_v59, %v558_v47  ;;  %v578_v4 = vadd.f32 %v1515_v29, %v577_v60  ;;  %v1519_v11 = vpop.eup %1518  ;;  %vm595_vm0 = vweird.f32 %v1517_v59 }
 0x219   :  { %v567_v10 = vsel %vm566_vm12, %v1513_v48, %v563_v62  ;;  %v598_v48 = vand.u32 2147483647, %v558_v47  ;;  %vm596_vm2 = vmor %vm594_vm1, %vm595_vm0 }
 0x21a   :  { %v591_v13 = vsub.f32 1.0, %v590_v63  ;;  %v572_v14 = vsel %vm569_vm14, %v571_v0, %v567_v10  ;;  %v582_v26 = vsel %vm581_vm13, %v1515_v29, %v578_v4 }
 0x21b   :  { %v587_v30 = vsel %vm584_vm15, %v586_v5, %v582_v26  ;;  %v606_v23 = vmul.f32 %v1519_v11, %v572_v14  ;;  %vm599_vm3 = vcmp.eq.f32.partialorder %v598_v48, 8.507059e+37 }
 0x21c   :  { %v592_v43 = vmul.f32 %v1517_v59, %v591_v13  ;;  %v605_v40 = vmul.f32 %v587_v30, %v1861_v22  ;;  %v1408_v22 = vld [vmem:[%s2070_s0 + $0x30] sm:$0xff] }
 0x21d   :  { %v616_v47 = vunpack.c.l.bf16 %v1408_v22  ;;  %v617_v52 = vunpack.c.h.bf16 %v1408_v22 }
 0x21e   :  { %v1906_v15 = vadd.f32 %v606_v23, %v605_v40  ;;  %v593_v18 = vadd.f32 %v1517_v59, %v592_v43 }
 0x220   :  { %1520 = vtanh.f32 %v1906_v15  ;;  %v597_v49 = vsel %vm596_vm2, %v1517_v59, %v593_v18  ;;  %v1409_v59 = vld [vmem:[%s2070_s0 + $0x38] sm:$0xff] }
 0x221   :  { %v602_v27 = vsel %vm599_vm3, %v601_v50, %v597_v49  ;;  %v618_v0 = vunpack.c.l.bf16 %v1409_v59  ;;  %v619_v35 = vunpack.c.h.bf16 %v1409_v59 }
 0x226   :  { %v1521_v29 = vpop.eup %1520 }
 0x227   :  { %v609_v31 = vmul.f32 %v1521_v29, %v602_v27 }
 0x229   :  { %v610_v51 = vpack.c.bf16 %v609_v31, %v609_v31 }
 0x22b   :  { %1407 = vst [vmem:[%s2072_s2 + $0x8] sm:$0xf] %v610_v51  ;;  %628 = vmatmul.bf16.vlgmr.msrb.gmra.mxu0 %v610_v51  ;;  %641 = vmatmul.bf16.vlgmr.msrb.gmra.mxu1 %v610_v51 }
 0x22c   :  { %654 = vmatmul.bf16.vlgmr.msrb.gmra.mxu2 %v610_v51  ;;  %667 = vmatmul.bf16.vlgmr.msrb.gmra.mxu3 %v610_v51 }
 0x22d   :  { %878 = vmatpush.bf16.msrb.mxu0 %v1650_v3  ;;  %891 = vmatpush.bf16.msrb.mxu1 %v1652_v7 }
 0x22e   :  { %904 = vmatpush.bf16.msrb.mxu2 %v1654_v8  ;;  %917 = vmatpush.bf16.msrb.mxu3 %v1665_v21 }
 0x231   :  { %879 = vmatpush.bf16.msrb.mxu0 %v1657_v12  ;;  %892 = vmatpush.bf16.msrb.mxu1 %v1661_v16 }
 0x232   :  { %905 = vmatpush.bf16.msrb.mxu2 %v1663_v17  ;;  %918 = vmatpush.bf16.msrb.mxu3 %v1677_v34 }
 0x235   :  { %880 = vmatpush.bf16.msrb.mxu0 %v1669_v28  ;;  %893 = vmatpush.bf16.msrb.mxu1 %v1673_v32 }
 0x236   :  { %906 = vmatpush.bf16.msrb.mxu2 %v1675_v33  ;;  %919 = vmatpush.bf16.msrb.mxu3 %v1683_v42 }
 0x239   :  { %881 = vmatpush.bf16.msrb.mxu0 %v1681_v41  ;;  %894 = vmatpush.bf16.msrb.mxu1 %v1687_v45 }
 0x23a   :  { %907 = vmatpush.bf16.msrb.mxu2 %v1689_v46  ;;  %920 = vmatpush.bf16.msrb.mxu3 %v1695_v54 }
 0x23d   :  { %882 = vmatpush.bf16.msrb.mxu0 %v1693_v53  ;;  %895 = vmatpush.bf16.msrb.mxu1 %v1699_v57 }
 0x23e   :  { %908 = vmatpush.bf16.msrb.mxu2 %v1701_v58  ;;  %921 = vmatpush.bf16.msrb.mxu3 %v1707_v2 }
 0x241   :  { %883 = vmatpush.bf16.msrb.mxu0 %v1705_v1  ;;  %896 = vmatpush.bf16.msrb.mxu1 %v1711_v6 }
 0x242   :  { %909 = vmatpush.bf16.msrb.mxu2 %v1713_v9  ;;  %922 = vmatpush.bf16.msrb.mxu3 %v1719_v20 }
 0x245   :  { %884 = vmatpush.bf16.msrb.mxu0 %v1717_v19  ;;  %897 = vmatpush.bf16.msrb.mxu1 %v1723_v24 }
 0x246   :  { %910 = vmatpush.bf16.msrb.mxu2 %v1725_v25  ;;  %923 = vmatpush.bf16.msrb.mxu3 %v1731_v37 }
 0x249   :  { %885 = vmatpush.bf16.msrb.mxu0 %v1729_v36  ;;  %898 = vmatpush.bf16.msrb.mxu1 %v1735_v38 }
 0x24a   :  { %911 = vmatpush.bf16.msrb.mxu2 %v1737_v39  ;;  %924 = vmatpush.bf16.msrb.mxu3 %v1743_v44 }
 0x2a8   :  { %v629_v55 = vpop.f32.mrf.mxu0  ;;  %v642_v56 = vpop.f32.mrf.mxu1 }
 0x2a9   :  { %v672_v60 = vadd.f32 %v629_v55, %v616_v47  ;;  %v673_v61 = vadd.f32 %v642_v56, %v617_v52 }
 0x2ab   :  { %v1410_v62 = vmul.f32 -1.442695, %v672_v60  ;;  %v1411_v63 = vmul.f32 -1.442695, %v673_v61 }
 0x2ad   :  { %1522 = vpow2.f32 %v1410_v62 }
 0x2ae   :  { %1524 = vpow2.f32 %v1411_v63 }
 0x2af   :  { %v655_v4 = vpop.f32.mrf.mxu2  ;;  %v668_v5 = vpop.f32.mrf.mxu3 }
 0x2b0   :  { %v674_v10 = vadd.f32 %v655_v4, %v618_v0  ;;  %v631_v11 = vpop.f32.mrf.mxu0  ;;  %v644_v13 = vpop.f32.mrf.mxu1  ;;  %v675_v29 = vadd.f32 %v668_v5, %v619_v35 }
 0x2b2   :  { %v1412_v14 = vmul.f32 -1.442695, %v674_v10 }
 0x2b3   :  { %v1523_v26 = vpop.eup %1522 }
 0x2b4   :  { %v1525_v30 = vpop.eup %1524  ;;  %v685_v23 = vadd.f32 1.0, %v1523_v26  ;;  %1526 = vpow2.f32 %v1412_v14 }
 0x2b5   :  { %v686_v43 = vadd.f32 1.0, %v1525_v30 }
 0x2b6   :  { %1528 = vrcp.f32 %v685_v23  ;;  %v699_v52 = vand.u32 2147483648, %v685_v23  ;;  %v697_v60 = vand.u32 2147483647, %v685_v23  ;;  %vm693_vm6 = vweird.f32 %v685_v23 }
 0x2b7   :  { %1530 = vrcp.f32 %v686_v43  ;;  %v657_v40 = vpop.f32.mrf.mxu2  ;;  %v670_v18 = vpop.f32.mrf.mxu3  ;;  %v714_v55 = vand.u32 2147483648, %v686_v43  ;;  %v712_v62 = vand.u32 2147483647, %v686_v43  ;;  %vm708_vm7 = vweird.f32 %v686_v43 }
 0x2b8   :  { %v700_v4 = vor.u32 1.1754944e-38, %v699_v52  ;;  %vm698_vm10 = vcmp.eq.f32.partialorder %v697_v60, 8.507059e+37 }
 0x2b9   :  { %v715_v10 = vor.u32 1.1754944e-38, %v714_v55  ;;  %vm713_vm11 = vcmp.eq.f32.partialorder %v712_v62, 8.507059e+37 }
 0x2ba   :  { %v1527_v48 = vpop.eup %1526 }
 0x2bb   :  { %v687_v49 = vadd.f32 1.0, %v1527_v48 }
 0x2bc   :  { %v1529_v50 = vpop.eup %1528 }
 0x2bd   :  { %v1531_v27 = vpop.eup %1530  ;;  %v689_v31 = vmul.f32 %v1529_v50, %v685_v23  ;;  %1532 = vrcp.f32 %v687_v49  ;;  %vm694_vm4 = vweird.f32 %v1529_v50  ;;  %vm723_vm13 = vweird.f32 %v687_v49 }
 0x2be   :  { %v704_v51 = vmul.f32 %v1531_v27, %v686_v43  ;;  %1534 = vtanh.f32 %v675_v29  ;;  %vm709_vm5 = vweird.f32 %v1531_v27  ;;  %vm695_vm8 = vmor %vm693_vm6, %vm694_vm4  ;;  %v729_v29 = vand.u32 2147483648, %v687_v49 }
 0x2bf   :  { %v690_v22 = vsub.f32 1.0, %v689_v31  ;;  %vm710_vm9 = vmor %vm708_vm7, %vm709_vm5 }
 0x2c0   :  { %v705_v47 = vsub.f32 1.0, %v704_v51  ;;  %v730_v51 = vor.u32 1.1754944e-38, %v729_v29 }
 0x2c1   :  { %v691_v56 = vmul.f32 %v1529_v50, %v690_v22 }
 0x2c2   :  { %v706_v61 = vmul.f32 %v1531_v27, %v705_v47 }
 0x2c3   :  { %v1533_v59 = vpop.eup %1532  ;;  %v692_v63 = vadd.f32 %v1529_v50, %v691_v56 }
 0x2c4   :  { %v719_v0 = vmul.f32 %v1533_v59, %v687_v49  ;;  %v707_v5 = vadd.f32 %v1531_v27, %v706_v61  ;;  %v1535_v13 = vpop.eup %1534  ;;  %vm724_vm12 = vweird.f32 %v1533_v59 }
 0x2c5   :  { %v696_v11 = vsel %vm695_vm8, %v1529_v50, %v692_v63  ;;  %v727_v50 = vand.u32 2147483647, %v687_v49  ;;  %vm725_vm14 = vmor %vm723_vm13, %vm724_vm12 }
 0x2c6   :  { %v720_v14 = vsub.f32 1.0, %v719_v0  ;;  %v701_v26 = vsel %vm698_vm10, %v700_v4, %v696_v11  ;;  %v711_v30 = vsel %vm710_vm9, %v1531_v27, %v707_v5 }
 0x2c7   :  { %v716_v40 = vsel %vm713_vm11, %v715_v10, %v711_v30  ;;  %v735_v18 = vmul.f32 %v1535_v13, %v701_v26  ;;  %vm728_vm15 = vcmp.eq.f32.partialorder %v727_v50, 8.507059e+37 }
 0x2c8   :  { %v721_v35 = vmul.f32 %v1533_v59, %v720_v14  ;;  %v734_v48 = vmul.f32 %v716_v40, %v1906_v15  ;;  %v1414_v15 = vld [vmem:[%s2070_s0 + $0x40] sm:$0xff] }
 0x2c9   :  { %v745_v49 = vunpack.c.l.bf16 %v1414_v15  ;;  %v746_v55 = vunpack.c.h.bf16 %v1414_v15 }
 0x2ca   :  { %v1951_v23 = vadd.f32 %v735_v18, %v734_v48  ;;  %v722_v43 = vadd.f32 %v1533_v59, %v721_v35 }
 0x2cc   :  { %1536 = vtanh.f32 %v1951_v23  ;;  %v726_v31 = vsel %vm725_vm14, %v1533_v59, %v722_v43  ;;  %v1415_v59 = vld [vmem:[%s2070_s0 + $0x48] sm:$0xff] }
 0x2cd   :  { %v731_v22 = vsel %vm728_vm15, %v730_v51, %v726_v31  ;;  %v747_v4 = vunpack.c.l.bf16 %v1415_v59  ;;  %v748_v29 = vunpack.c.h.bf16 %v1415_v59 }
 0x2d2   :  { %v1537_v27 = vpop.eup %1536 }
 0x2d3   :  { %v738_v47 = vmul.f32 %v1537_v27, %v731_v22 }
 0x2d5   :  { %v739_v52 = vpack.c.bf16 %v738_v47, %v738_v47 }
 0x2d7   :  { %1413 = vst [vmem:[%s2072_s2 + $0xc] sm:$0xf] %v739_v52  ;;  %757 = vmatmul.bf16.vlgmr.msra.gmra.mxu0 %v739_v52  ;;  %770 = vmatmul.bf16.vlgmr.msra.gmra.mxu1 %v739_v52 }
 0x2d8   :  { %783 = vmatmul.bf16.vlgmr.msra.gmra.mxu2 %v739_v52  ;;  %796 = vmatmul.bf16.vlgmr.msra.gmra.mxu3 %v739_v52 }
 0x2d9   :  { %1007 = vmatpush.bf16.msra.mxu0 %v1650_v3  ;;  %1020 = vmatpush.bf16.msra.mxu1 %v1652_v7 }
 0x2da   :  { %1033 = vmatpush.bf16.msra.mxu2 %v1654_v8  ;;  %1046 = vmatpush.bf16.msra.mxu3 %v1665_v21 }
 0x2dd   :  { %1008 = vmatpush.bf16.msra.mxu0 %v1657_v12  ;;  %1021 = vmatpush.bf16.msra.mxu1 %v1661_v16 }
 0x2de   :  { %1034 = vmatpush.bf16.msra.mxu2 %v1663_v17  ;;  %1047 = vmatpush.bf16.msra.mxu3 %v1677_v34 }
 0x2e1   :  { %1009 = vmatpush.bf16.msra.mxu0 %v1669_v28  ;;  %1022 = vmatpush.bf16.msra.mxu1 %v1673_v32 }
 0x2e2   :  { %1035 = vmatpush.bf16.msra.mxu2 %v1675_v33  ;;  %1048 = vmatpush.bf16.msra.mxu3 %v1683_v42 }
 0x2e5   :  { %1010 = vmatpush.bf16.msra.mxu0 %v1681_v41  ;;  %1023 = vmatpush.bf16.msra.mxu1 %v1687_v45 }
 0x2e6   :  { %1036 = vmatpush.bf16.msra.mxu2 %v1689_v46  ;;  %1049 = vmatpush.bf16.msra.mxu3 %v1695_v54 }
 0x2e9   :  { %1011 = vmatpush.bf16.msra.mxu0 %v1693_v53  ;;  %1024 = vmatpush.bf16.msra.mxu1 %v1699_v57 }
 0x2ea   :  { %1037 = vmatpush.bf16.msra.mxu2 %v1701_v58  ;;  %1050 = vmatpush.bf16.msra.mxu3 %v1707_v2 }
 0x2ed   :  { %1012 = vmatpush.bf16.msra.mxu0 %v1705_v1  ;;  %1025 = vmatpush.bf16.msra.mxu1 %v1711_v6 }
 0x2ee   :  { %1038 = vmatpush.bf16.msra.mxu2 %v1713_v9  ;;  %1051 = vmatpush.bf16.msra.mxu3 %v1719_v20 }
 0x2f1   :  { %1013 = vmatpush.bf16.msra.mxu0 %v1717_v19  ;;  %1026 = vmatpush.bf16.msra.mxu1 %v1723_v24 }
 0x2f2   :  { %1039 = vmatpush.bf16.msra.mxu2 %v1725_v25  ;;  %1052 = vmatpush.bf16.msra.mxu3 %v1731_v37 }
 0x2f5   :  { %1014 = vmatpush.bf16.msra.mxu0 %v1729_v36  ;;  %1027 = vmatpush.bf16.msra.mxu1 %v1735_v38 }
 0x2f6   :  { %1040 = vmatpush.bf16.msra.mxu2 %v1737_v39  ;;  %1053 = vmatpush.bf16.msra.mxu3 %v1743_v44 }
 0x354   :  { %v758_v56 = vpop.f32.mrf.mxu0  ;;  %v771_v60 = vpop.f32.mrf.mxu1 }
 0x355   :  { %v801_v61 = vadd.f32 %v758_v56, %v745_v49  ;;  %v802_v62 = vadd.f32 %v771_v60, %v746_v55 }
 0x357   :  { %v1416_v63 = vmul.f32 -1.442695, %v801_v61  ;;  %v1417_v0 = vmul.f32 -1.442695, %v802_v62 }
 0x359   :  { %1538 = vpow2.f32 %v1416_v63 }
 0x35a   :  { %1540 = vpow2.f32 %v1417_v0 }
 0x35b   :  { %v784_v5 = vpop.f32.mrf.mxu2  ;;  %v797_v10 = vpop.f32.mrf.mxu3 }
 0x35c   :  { %v803_v11 = vadd.f32 %v784_v5, %v747_v4  ;;  %v760_v13 = vpop.f32.mrf.mxu0  ;;  %v773_v14 = vpop.f32.mrf.mxu1  ;;  %v804_v27 = vadd.f32 %v797_v10, %v748_v29 }
 0x35e   :  { %v1418_v26 = vmul.f32 -1.442695, %v803_v11 }
 0x35f   :  { %v1539_v30 = vpop.eup %1538 }
 0x360   :  { %v1541_v40 = vpop.eup %1540  ;;  %v814_v18 = vadd.f32 1.0, %v1539_v30  ;;  %1542 = vpow2.f32 %v1418_v26 }
 0x361   :  { %v815_v35 = vadd.f32 1.0, %v1541_v40 }
 0x362   :  { %1544 = vrcp.f32 %v814_v18  ;;  %v828_v55 = vand.u32 2147483648, %v814_v18  ;;  %v826_v61 = vand.u32 2147483647, %v814_v18  ;;  %vm822_vm2 = vweird.f32 %v814_v18 }
 0x363   :  { %1546 = vrcp.f32 %v815_v35  ;;  %v786_v48 = vpop.f32.mrf.mxu2  ;;  %v799_v43 = vpop.f32.mrf.mxu3  ;;  %v843_v56 = vand.u32 2147483648, %v815_v35  ;;  %v841_v63 = vand.u32 2147483647, %v815_v35  ;;  %vm837_vm3 = vweird.f32 %v815_v35 }
 0x364   :  { %v829_v5 = vor.u32 1.1754944e-38, %v828_v55  ;;  %vm827_vm6 = vcmp.eq.f32.partialorder %v826_v61, 8.507059e+37 }
 0x365   :  { %v844_v11 = vor.u32 1.1754944e-38, %v843_v56  ;;  %vm842_vm7 = vcmp.eq.f32.partialorder %v841_v63, 8.507059e+37 }
 0x366   :  { %v1543_v50 = vpop.eup %1542 }
 0x367   :  { %v816_v31 = vadd.f32 1.0, %v1543_v50 }
 0x368   :  { %v1545_v51 = vpop.eup %1544 }
 0x369   :  { %v1547_v22 = vpop.eup %1546  ;;  %v818_v47 = vmul.f32 %v1545_v51, %v814_v18  ;;  %1548 = vrcp.f32 %v816_v31  ;;  %vm823_vm0 = vweird.f32 %v1545_v51  ;;  %vm852_vm9 = vweird.f32 %v816_v31 }
 0x36a   :  { %v833_v52 = vmul.f32 %v1547_v22, %v815_v35  ;;  %1550 = vtanh.f32 %v804_v27  ;;  %vm838_vm1 = vweird.f32 %v1547_v22  ;;  %vm824_vm4 = vmor %vm822_vm2, %vm823_vm0  ;;  %v858_v27 = vand.u32 2147483648, %v816_v31 }
 0x36b   :  { %v819_v15 = vsub.f32 1.0, %v818_v47  ;;  %vm839_vm5 = vmor %vm837_vm3, %vm838_vm1 }
 0x36c   :  { %v834_v49 = vsub.f32 1.0, %v833_v52  ;;  %v859_v52 = vor.u32 1.1754944e-38, %v858_v27 }
 0x36d   :  { %v820_v60 = vmul.f32 %v1545_v51, %v819_v15 }
 0x36e   :  { %v835_v62 = vmul.f32 %v1547_v22, %v834_v49 }
 0x36f   :  { %v1549_v59 = vpop.eup %1548  ;;  %v821_v0 = vadd.f32 %v1545_v51, %v820_v60 }
 0x370   :  { %v848_v4 = vmul.f32 %v1549_v59, %v816_v31  ;;  %v836_v10 = vadd.f32 %v1547_v22, %v835_v62  ;;  %v1551_v14 = vpop.eup %1550  ;;  %vm853_vm8 = vweird.f32 %v1549_v59 }
 0x371   :  { %v825_v13 = vsel %vm824_vm4, %v1545_v51, %v821_v0  ;;  %v856_v51 = vand.u32 2147483647, %v816_v31  ;;  %vm854_vm10 = vmor %vm852_vm9, %vm853_vm8 }
 0x372   :  { %v849_v26 = vsub.f32 1.0, %v848_v4  ;;  %v830_v30 = vsel %vm827_vm6, %v829_v5, %v825_v13  ;;  %v840_v40 = vsel %vm839_vm5, %v1547_v22, %v836_v10 }
 0x373   :  { %v845_v48 = vsel %vm842_vm7, %v844_v11, %v840_v40  ;;  %v864_v43 = vmul.f32 %v1551_v14, %v830_v30  ;;  %vm857_vm11 = vcmp.eq.f32.partialorder %v856_v51, 8.507059e+37 }
 0x374   :  { %v850_v29 = vmul.f32 %v1549_v59, %v849_v26  ;;  %v863_v50 = vmul.f32 %v845_v48, %v1951_v23 }
 0x376   :  { %v1996_v18 = vadd.f32 %v864_v43, %v863_v50  ;;  %v851_v35 = vadd.f32 %v1549_v59, %v850_v29 }
 0x378   :  { %1552 = vtanh.f32 %v1996_v18  ;;  %v855_v47 = vsel %vm854_vm10, %v1549_v59, %v851_v35 }
 0x379   :  { %v860_v15 = vsel %vm857_vm11, %v859_v52, %v855_v47 }
 0x37e   :  { %v1553_v22 = vpop.eup %1552 }
 0x37f   :  { %v867_v49 = vmul.f32 %v1553_v22, %v860_v15 }
 0x381   :  { %v868_v55 = vpack.c.bf16 %v867_v49, %v867_v49 }
 0x383   :  { %1419 = vst [vmem:[%s2072_s2 + $0x10] sm:$0xf] %v868_v55  ;;  %886 = vmatmul.bf16.vlgmr.msrb.gmra.mxu0 %v868_v55  ;;  %899 = vmatmul.bf16.vlgmr.msrb.gmra.mxu1 %v868_v55 }
 0x384   :  { %912 = vmatmul.bf16.vlgmr.msrb.gmra.mxu2 %v868_v55  ;;  %925 = vmatmul.bf16.vlgmr.msrb.gmra.mxu3 %v868_v55 }
 0x385   :  { %1136 = vmatpush.bf16.msrb.mxu0 %v1650_v3  ;;  %1149 = vmatpush.bf16.msrb.mxu1 %v1652_v7  ;;  %v1420_v3 = vld [vmem:[%s2070_s0 + $0x50] sm:$0xff] }
 0x386   :  { %1162 = vmatpush.bf16.msrb.mxu2 %v1654_v8  ;;  %1175 = vmatpush.bf16.msrb.mxu3 %v1665_v21  ;;  %v874_v7 = vunpack.c.l.bf16 %v1420_v3  ;;  %v875_v8 = vunpack.c.h.bf16 %v1420_v3 }
 0x389   :  { %1137 = vmatpush.bf16.msrb.mxu0 %v1657_v12  ;;  %1150 = vmatpush.bf16.msrb.mxu1 %v1661_v16 }
 0x38a   :  { %1163 = vmatpush.bf16.msrb.mxu2 %v1663_v17  ;;  %1176 = vmatpush.bf16.msrb.mxu3 %v1677_v34 }
 0x38d   :  { %1138 = vmatpush.bf16.msrb.mxu0 %v1669_v28  ;;  %1151 = vmatpush.bf16.msrb.mxu1 %v1673_v32  ;;  %v1421_v28 = vld [vmem:[%s2070_s0 + $0x58] sm:$0xff] }
 0x38e   :  { %1164 = vmatpush.bf16.msrb.mxu2 %v1675_v33  ;;  %1177 = vmatpush.bf16.msrb.mxu3 %v1683_v42  ;;  %v876_v34 = vunpack.c.l.bf16 %v1421_v28 }
 0x391   :  { %1139 = vmatpush.bf16.msrb.mxu0 %v1681_v41  ;;  %1152 = vmatpush.bf16.msrb.mxu1 %v1687_v45 }
 0x392   :  { %1165 = vmatpush.bf16.msrb.mxu2 %v1689_v46  ;;  %1178 = vmatpush.bf16.msrb.mxu3 %v1695_v54 }
 0x395   :  { %1140 = vmatpush.bf16.msrb.mxu0 %v1693_v53  ;;  %1153 = vmatpush.bf16.msrb.mxu1 %v1699_v57 }
 0x396   :  { %1166 = vmatpush.bf16.msrb.mxu2 %v1701_v58  ;;  %1179 = vmatpush.bf16.msrb.mxu3 %v1707_v2 }
 0x399   :  { %1141 = vmatpush.bf16.msrb.mxu0 %v1705_v1  ;;  %1154 = vmatpush.bf16.msrb.mxu1 %v1711_v6 }
 0x39a   :  { %1167 = vmatpush.bf16.msrb.mxu2 %v1713_v9  ;;  %1180 = vmatpush.bf16.msrb.mxu3 %v1719_v20 }
 0x39d   :  { %1142 = vmatpush.bf16.msrb.mxu0 %v1717_v19  ;;  %1155 = vmatpush.bf16.msrb.mxu1 %v1723_v24  ;;  %v877_v19 = vunpack.c.h.bf16 %v1421_v28  ;;  %v1427_v28 = vld [vmem:[%s2070_s0 + $0x68] sm:$0xff] }
 0x39e   :  { %1168 = vmatpush.bf16.msrb.mxu2 %v1725_v25  ;;  %1181 = vmatpush.bf16.msrb.mxu3 %v1731_v37 }
 0x3a1   :  { %1143 = vmatpush.bf16.msrb.mxu0 %v1729_v36  ;;  %1156 = vmatpush.bf16.msrb.mxu1 %v1735_v38 }
 0x3a2   :  { %1169 = vmatpush.bf16.msrb.mxu2 %v1737_v39  ;;  %1182 = vmatpush.bf16.msrb.mxu3 %v1743_v44 }
 0x400   :  { %v887_v12 = vpop.f32.mrf.mxu0  ;;  %v900_v16 = vpop.f32.mrf.mxu1 }
 0x401   :  { %v930_v17 = vadd.f32 %v887_v12, %v874_v7  ;;  %v931_v21 = vadd.f32 %v900_v16, %v875_v8 }
 0x403   :  { %v1422_v32 = vmul.f32 -1.442695, %v930_v17  ;;  %v1423_v33 = vmul.f32 -1.442695, %v931_v21 }
 0x405   :  { %1554 = vpow2.f32 %v1422_v32 }
 0x406   :  { %1556 = vpow2.f32 %v1423_v33 }
 0x407   :  { %v913_v41 = vpop.f32.mrf.mxu2  ;;  %v926_v42 = vpop.f32.mrf.mxu3 }
 0x408   :  { %v932_v45 = vadd.f32 %v913_v41, %v876_v34  ;;  %v889_v46 = vpop.f32.mrf.mxu0  ;;  %v902_v53 = vpop.f32.mrf.mxu1  ;;  %v933_v36 = vadd.f32 %v926_v42, %v877_v19  ;;  %v1005_v34 = vunpack.c.l.bf16 %v1427_v28  ;;  %v1006_v19 = vunpack.c.h.bf16 %v1427_v28  ;;  %v1433_v28 = vld [vmem:[%s2070_s0 + $0x78] sm:$0xff] }
 0x40a   :  { %v1424_v54 = vmul.f32 -1.442695, %v932_v45 }
 0x40b   :  { %v1555_v57 = vpop.eup %1554 }
 0x40c   :  { %v1557_v58 = vpop.eup %1556  ;;  %v943_v1 = vadd.f32 1.0, %v1555_v57  ;;  %1558 = vpow2.f32 %v1424_v54 }
 0x40d   :  { %v944_v2 = vadd.f32 1.0, %v1557_v58 }
 0x40e   :  { %1560 = vrcp.f32 %v943_v1  ;;  %v957_v31 = vand.u32 2147483648, %v943_v1  ;;  %v955_v61 = vand.u32 2147483647, %v943_v1  ;;  %vm951_vm14 = vweird.f32 %v943_v1 }
 0x40f   :  { %1562 = vrcp.f32 %v944_v2  ;;  %v915_v6 = vpop.f32.mrf.mxu2  ;;  %v928_v9 = vpop.f32.mrf.mxu3  ;;  %v972_v56 = vand.u32 2147483648, %v944_v2  ;;  %v970_v63 = vand.u32 2147483647, %v944_v2  ;;  %vm966_vm15 = vweird.f32 %v944_v2 }
 0x410   :  { %v958_v5 = vor.u32 1.1754944e-38, %v957_v31  ;;  %vm956_vm2 = vcmp.eq.f32.partialorder %v955_v61, 8.507059e+37 }
 0x411   :  { %v973_v11 = vor.u32 1.1754944e-38, %v972_v56  ;;  %vm971_vm3 = vcmp.eq.f32.partialorder %v970_v63, 8.507059e+37 }
 0x412   :  { %v1559_v20 = vpop.eup %1558 }
 0x413   :  { %v945_v24 = vadd.f32 1.0, %v1559_v20 }
 0x414   :  { %v1561_v25 = vpop.eup %1560 }
 0x415   :  { %v1563_v37 = vpop.eup %1562  ;;  %v947_v38 = vmul.f32 %v1561_v25, %v943_v1  ;;  %1564 = vrcp.f32 %v945_v24  ;;  %vm952_vm12 = vweird.f32 %v1561_v25  ;;  %v987_v51 = vand.u32 2147483648, %v945_v24 }
 0x416   :  { %v962_v39 = vmul.f32 %v1563_v37, %v944_v2  ;;  %1566 = vtanh.f32 %v933_v36  ;;  %vm967_vm13 = vweird.f32 %v1563_v37  ;;  %vm953_vm0 = vmor %vm951_vm14, %vm952_vm12  ;;  %vm981_vm5 = vweird.f32 %v945_v24 }
 0x417   :  { %v948_v44 = vsub.f32 1.0, %v947_v38  ;;  %vm968_vm1 = vmor %vm966_vm15, %vm967_vm13  ;;  %v985_v47 = vand.u32 2147483647, %v945_v24  ;;  %v988_v22 = vor.u32 1.1754944e-38, %v987_v51 }
 0x418   :  { %v963_v23 = vsub.f32 1.0, %v962_v39 }
 0x419   :  { %v949_v60 = vmul.f32 %v1561_v25, %v948_v44  ;;  %vm986_vm7 = vcmp.eq.f32.partialorder %v985_v47, 8.507059e+37 }
 0x41a   :  { %v964_v62 = vmul.f32 %v1563_v37, %v963_v23 }
 0x41b   :  { %v1565_v59 = vpop.eup %1564  ;;  %v950_v0 = vadd.f32 %v1561_v25, %v949_v60 }
 0x41c   :  { %v977_v4 = vmul.f32 %v1565_v59, %v945_v24  ;;  %v965_v10 = vadd.f32 %v1563_v37, %v964_v62  ;;  %v1567_v14 = vpop.eup %1566  ;;  %vm982_vm4 = vweird.f32 %v1565_v59 }
 0x41d   :  { %v954_v13 = vsel %vm953_vm0, %v1561_v25, %v950_v0  ;;  %vm983_vm6 = vmor %vm981_vm5, %vm982_vm4 }
 0x41e   :  { %v978_v26 = vsub.f32 1.0, %v977_v4  ;;  %v959_v30 = vsel %vm956_vm2, %v958_v5, %v954_v13  ;;  %v969_v40 = vsel %vm968_vm1, %v1563_v37, %v965_v10 }
 0x41f   :  { %v974_v48 = vsel %vm971_vm3, %v973_v11, %v969_v40  ;;  %v993_v43 = vmul.f32 %v1567_v14, %v959_v30 }
 0x420   :  { %v979_v29 = vmul.f32 %v1565_v59, %v978_v26  ;;  %v992_v50 = vmul.f32 %v974_v48, %v1996_v18  ;;  %v1426_v18 = vld [vmem:[%s2070_s0 + $0x60] sm:$0xff] }
 0x421   :  { %v1003_v7 = vunpack.c.l.bf16 %v1426_v18  ;;  %v1004_v8 = vunpack.c.h.bf16 %v1426_v18 }
 0x422   :  { %v2041_v35 = vadd.f32 %v993_v43, %v992_v50  ;;  %v980_v27 = vadd.f32 %v1565_v59, %v979_v29 }
 0x424   :  { %1568 = vtanh.f32 %v2041_v35  ;;  %v984_v52 = vsel %vm983_vm6, %v1565_v59, %v980_v27 }
 0x425   :  { %v989_v49 = vsel %vm986_vm7, %v988_v22, %v984_v52 }
 0x42a   :  { %v1569_v15 = vpop.eup %1568 }
 0x42b   :  { %v996_v55 = vmul.f32 %v1569_v15, %v989_v49 }
 0x42d   :  { %v997_v3 = vpack.c.bf16 %v996_v55, %v996_v55 }
 0x42f   :  { %1425 = vst [vmem:[%s2072_s2 + $0x14] sm:$0xf] %v997_v3  ;;  %1015 = vmatmul.bf16.vlgmr.msra.gmra.mxu0 %v997_v3  ;;  %1028 = vmatmul.bf16.vlgmr.msra.gmra.mxu1 %v997_v3 }
 0x430   :  { %1041 = vmatmul.bf16.vlgmr.msra.gmra.mxu2 %v997_v3  ;;  %1054 = vmatmul.bf16.vlgmr.msra.gmra.mxu3 %v997_v3 }
 0x4ac   :  { %v1016_v12 = vpop.f32.mrf.mxu0  ;;  %v1029_v16 = vpop.f32.mrf.mxu1 }
 0x4ad   :  { %v1059_v17 = vadd.f32 %v1016_v12, %v1003_v7  ;;  %v1060_v21 = vadd.f32 %v1029_v16, %v1004_v8 }
 0x4af   :  { %v1428_v32 = vmul.f32 -1.442695, %v1059_v17  ;;  %v1429_v33 = vmul.f32 -1.442695, %v1060_v21 }
 0x4b1   :  { %1570 = vpow2.f32 %v1428_v32 }
 0x4b2   :  { %1572 = vpow2.f32 %v1429_v33 }
 0x4b3   :  { %v1042_v41 = vpop.f32.mrf.mxu2  ;;  %v1055_v42 = vpop.f32.mrf.mxu3 }
 0x4b4   :  { %v1061_v45 = vadd.f32 %v1042_v41, %v1005_v34  ;;  %v1018_v46 = vpop.f32.mrf.mxu0  ;;  %v1031_v53 = vpop.f32.mrf.mxu1  ;;  %v1062_v36 = vadd.f32 %v1055_v42, %v1006_v19  ;;  %v1134_v34 = vunpack.c.l.bf16 %v1433_v28  ;;  %v1135_v19 = vunpack.c.h.bf16 %v1433_v28 }
 0x4b6   :  { %v1430_v54 = vmul.f32 -1.442695, %v1061_v45 }
 0x4b7   :  { %v1571_v57 = vpop.eup %1570 }
 0x4b8   :  { %v1573_v58 = vpop.eup %1572  ;;  %v1072_v1 = vadd.f32 1.0, %v1571_v57  ;;  %1574 = vpow2.f32 %v1430_v54 }
 0x4b9   :  { %v1073_v2 = vadd.f32 1.0, %v1573_v58 }
 0x4ba   :  { %1576 = vrcp.f32 %v1072_v1  ;;  %v1086_v31 = vand.u32 2147483648, %v1072_v1  ;;  %v1084_v61 = vand.u32 2147483647, %v1072_v1  ;;  %vm1080_vm10 = vweird.f32 %v1072_v1 }
 0x4bb   :  { %1578 = vrcp.f32 %v1073_v2  ;;  %v1044_v6 = vpop.f32.mrf.mxu2  ;;  %v1057_v9 = vpop.f32.mrf.mxu3  ;;  %v1101_v56 = vand.u32 2147483648, %v1073_v2  ;;  %v1099_v63 = vand.u32 2147483647, %v1073_v2  ;;  %vm1095_vm11 = vweird.f32 %v1073_v2 }
 0x4bc   :  { %v1087_v5 = vor.u32 1.1754944e-38, %v1086_v31  ;;  %vm1085_vm14 = vcmp.eq.f32.partialorder %v1084_v61, 8.507059e+37 }
 0x4bd   :  { %v1102_v11 = vor.u32 1.1754944e-38, %v1101_v56  ;;  %vm1100_vm15 = vcmp.eq.f32.partialorder %v1099_v63, 8.507059e+37 }
 0x4be   :  { %v1575_v20 = vpop.eup %1574 }
 0x4bf   :  { %v1074_v24 = vadd.f32 1.0, %v1575_v20 }
 0x4c0   :  { %v1577_v25 = vpop.eup %1576 }
 0x4c1   :  { %v1579_v37 = vpop.eup %1578  ;;  %v1076_v38 = vmul.f32 %v1577_v25, %v1072_v1  ;;  %1580 = vrcp.f32 %v1074_v24  ;;  %vm1081_vm8 = vweird.f32 %v1577_v25  ;;  %v1116_v47 = vand.u32 2147483648, %v1074_v24 }
 0x4c2   :  { %v1091_v39 = vmul.f32 %v1579_v37, %v1073_v2  ;;  %1582 = vtanh.f32 %v1062_v36  ;;  %vm1096_vm9 = vweird.f32 %v1579_v37  ;;  %vm1082_vm12 = vmor %vm1080_vm10, %vm1081_vm8  ;;  %vm1110_vm1 = vweird.f32 %v1074_v24 }
 0x4c3   :  { %v1077_v44 = vsub.f32 1.0, %v1076_v38  ;;  %vm1097_vm13 = vmor %vm1095_vm11, %vm1096_vm9  ;;  %v1114_v52 = vand.u32 2147483647, %v1074_v24  ;;  %v1117_v15 = vor.u32 1.1754944e-38, %v1116_v47 }
 0x4c4   :  { %v1092_v23 = vsub.f32 1.0, %v1091_v39 }
 0x4c5   :  { %v1078_v60 = vmul.f32 %v1577_v25, %v1077_v44  ;;  %vm1115_vm3 = vcmp.eq.f32.partialorder %v1114_v52, 8.507059e+37 }
 0x4c6   :  { %v1093_v62 = vmul.f32 %v1579_v37, %v1092_v23 }
 0x4c7   :  { %v1581_v59 = vpop.eup %1580  ;;  %v1079_v0 = vadd.f32 %v1577_v25, %v1078_v60 }
 0x4c8   :  { %v1106_v4 = vmul.f32 %v1581_v59, %v1074_v24  ;;  %v1094_v10 = vadd.f32 %v1579_v37, %v1093_v62  ;;  %v1583_v14 = vpop.eup %1582  ;;  %vm1111_vm0 = vweird.f32 %v1581_v59 }
 0x4c9   :  { %v1083_v13 = vsel %vm1082_vm12, %v1577_v25, %v1079_v0  ;;  %vm1112_vm2 = vmor %vm1110_vm1, %vm1111_vm0 }
 0x4ca   :  { %v1107_v26 = vsub.f32 1.0, %v1106_v4  ;;  %v1088_v30 = vsel %vm1085_vm14, %v1087_v5, %v1083_v13  ;;  %v1098_v40 = vsel %vm1097_vm13, %v1579_v37, %v1094_v10 }
 0x4cb   :  { %v1103_v48 = vsel %vm1100_vm15, %v1102_v11, %v1098_v40  ;;  %v1122_v43 = vmul.f32 %v1583_v14, %v1088_v30 }
 0x4cc   :  { %v1108_v29 = vmul.f32 %v1581_v59, %v1107_v26  ;;  %v1121_v50 = vmul.f32 %v1103_v48, %v2041_v35  ;;  %v1432_v35 = vld [vmem:[%s2070_s0 + $0x70] sm:$0xff] }
 0x4cd   :  { %v1132_v7 = vunpack.c.l.bf16 %v1432_v35  ;;  %v1133_v8 = vunpack.c.h.bf16 %v1432_v35 }
 0x4ce   :  { %v2054_v27 = vadd.f32 %v1122_v43, %v1121_v50  ;;  %v1109_v51 = vadd.f32 %v1581_v59, %v1108_v29 }
 0x4d0   :  { %1584 = vtanh.f32 %v2054_v27  ;;  %v1113_v22 = vsel %vm1112_vm2, %v1581_v59, %v1109_v51 }
 0x4d1   :  { %v1118_v55 = vsel %vm1115_vm3, %v1117_v15, %v1113_v22 }
 0x4d6   :  { %v1585_v49 = vpop.eup %1584 }
 0x4d7   :  { %v1125_v3 = vmul.f32 %v1585_v49, %v1118_v55 }
 0x4d9   :  { %v1126_v18 = vpack.c.bf16 %v1125_v3, %v1125_v3 }
 0x4db   :  { %1431 = vst [vmem:[%s2072_s2 + $0x18] sm:$0xf] %v1126_v18  ;;  %1144 = vmatmul.bf16.vlgmr.msrb.gmra.mxu0 %v1126_v18  ;;  %1157 = vmatmul.bf16.vlgmr.msrb.gmra.mxu1 %v1126_v18 }
 0x4dc   :  { %1170 = vmatmul.bf16.vlgmr.msrb.gmra.mxu2 %v1126_v18  ;;  %1183 = vmatmul.bf16.vlgmr.msrb.gmra.mxu3 %v1126_v18 }
 0x558   :  { %v1145_v12 = vpop.f32.mrf.mxu0  ;;  %v1158_v16 = vpop.f32.mrf.mxu1 }
 0x559   :  { %v1188_v17 = vadd.f32 %v1145_v12, %v1132_v7  ;;  %v1189_v21 = vadd.f32 %v1158_v16, %v1133_v8 }
 0x55b   :  { %v1434_v32 = vmul.f32 -1.442695, %v1188_v17  ;;  %v1435_v33 = vmul.f32 -1.442695, %v1189_v21 }
 0x55d   :  { %1586 = vpow2.f32 %v1434_v32 }
 0x55e   :  { %1588 = vpow2.f32 %v1435_v33 }
 0x55f   :  { %v1171_v41 = vpop.f32.mrf.mxu2  ;;  %v1184_v42 = vpop.f32.mrf.mxu3 }
 0x560   :  { %v1190_v45 = vadd.f32 %v1171_v41, %v1134_v34  ;;  %v1147_v46 = vpop.f32.mrf.mxu0  ;;  %v1160_v53 = vpop.f32.mrf.mxu1  ;;  %v1191_v36 = vadd.f32 %v1184_v42, %v1135_v19 }
 0x562   :  { %v1436_v54 = vmul.f32 -1.442695, %v1190_v45 }
 0x563   :  { %v1587_v57 = vpop.eup %1586 }
 0x564   :  { %v1589_v58 = vpop.eup %1588  ;;  %v1201_v1 = vadd.f32 1.0, %v1587_v57  ;;  %1590 = vpow2.f32 %v1436_v54 }
 0x565   :  { %v1202_v2 = vadd.f32 1.0, %v1589_v58 }
 0x566   :  { %1592 = vrcp.f32 %v1201_v1  ;;  %v1215_v31 = vand.u32 2147483648, %v1201_v1  ;;  %v1213_v61 = vand.u32 2147483647, %v1201_v1  ;;  %vm1209_vm6 = vweird.f32 %v1201_v1 }
 0x567   :  { %1594 = vrcp.f32 %v1202_v2  ;;  %v1173_v6 = vpop.f32.mrf.mxu2  ;;  %v1186_v9 = vpop.f32.mrf.mxu3  ;;  %v1230_v56 = vand.u32 2147483648, %v1202_v2  ;;  %v1228_v63 = vand.u32 2147483647, %v1202_v2  ;;  %vm1224_vm7 = vweird.f32 %v1202_v2 }
 0x568   :  { %v1216_v5 = vor.u32 1.1754944e-38, %v1215_v31  ;;  %vm1214_vm10 = vcmp.eq.f32.partialorder %v1213_v61, 8.507059e+37 }
 0x569   :  { %v1231_v11 = vor.u32 1.1754944e-38, %v1230_v56  ;;  %vm1229_vm11 = vcmp.eq.f32.partialorder %v1228_v63, 8.507059e+37 }
 0x56a   :  { %v1591_v20 = vpop.eup %1590 }
 0x56b   :  { %v1203_v24 = vadd.f32 1.0, %v1591_v20 }
 0x56c   :  { %v1593_v25 = vpop.eup %1592 }
 0x56d   :  { %v1595_v37 = vpop.eup %1594  ;;  %v1205_v38 = vmul.f32 %v1593_v25, %v1201_v1  ;;  %1596 = vrcp.f32 %v1203_v24  ;;  %vm1210_vm4 = vweird.f32 %v1593_v25  ;;  %v1245_v52 = vand.u32 2147483648, %v1203_v24 }
 0x56e   :  { %v1220_v39 = vmul.f32 %v1595_v37, %v1202_v2  ;;  %1598 = vtanh.f32 %v1191_v36  ;;  %vm1225_vm5 = vweird.f32 %v1595_v37  ;;  %vm1211_vm8 = vmor %vm1209_vm6, %vm1210_vm4  ;;  %vm1239_vm13 = vweird.f32 %v1203_v24 }
 0x56f   :  { %v1206_v44 = vsub.f32 1.0, %v1205_v38  ;;  %vm1226_vm9 = vmor %vm1224_vm7, %vm1225_vm5  ;;  %v1243_v22 = vand.u32 2147483647, %v1203_v24  ;;  %v1246_v49 = vor.u32 1.1754944e-38, %v1245_v52 }
 0x570   :  { %v1221_v23 = vsub.f32 1.0, %v1220_v39 }
 0x571   :  { %v1207_v60 = vmul.f32 %v1593_v25, %v1206_v44  ;;  %vm1244_vm15 = vcmp.eq.f32.partialorder %v1243_v22, 8.507059e+37 }
 0x572   :  { %v1222_v62 = vmul.f32 %v1595_v37, %v1221_v23 }
 0x573   :  { %v1597_v59 = vpop.eup %1596  ;;  %v1208_v0 = vadd.f32 %v1593_v25, %v1207_v60 }
 0x574   :  { %v1235_v4 = vmul.f32 %v1597_v59, %v1203_v24  ;;  %v1223_v10 = vadd.f32 %v1595_v37, %v1222_v62  ;;  %v1599_v14 = vpop.eup %1598  ;;  %vm1240_vm12 = vweird.f32 %v1597_v59 }
 0x575   :  { %v1212_v13 = vsel %vm1211_vm8, %v1593_v25, %v1208_v0  ;;  %vm1241_vm14 = vmor %vm1239_vm13, %vm1240_vm12 }
 0x576   :  { %v1236_v26 = vsub.f32 1.0, %v1235_v4  ;;  %v1217_v30 = vsel %vm1214_vm10, %v1216_v5, %v1212_v13  ;;  %v1227_v40 = vsel %vm1226_vm9, %v1595_v37, %v1223_v10 }
 0x577   :  { %v1232_v48 = vsel %vm1229_vm11, %v1231_v11, %v1227_v40  ;;  %v1251_v43 = vmul.f32 %v1599_v14, %v1217_v30 }
 0x578   :  { %v1237_v29 = vmul.f32 %v1597_v59, %v1236_v26  ;;  %v1250_v50 = vmul.f32 %v1232_v48, %v2054_v27 }
 0x57a   :  { %v1252_v51 = vadd.f32 %v1251_v43, %v1250_v50  ;;  %v1238_v47 = vadd.f32 %v1597_v59, %v1237_v29 }
 0x57c   :  { %1600 = vtanh.f32 %v1252_v51  ;;  %v1242_v15 = vsel %vm1241_vm14, %v1597_v59, %v1238_v47 }
 0x57d   :  { %v1247_v3 = vsel %vm1244_vm15, %v1246_v49, %v1242_v15 }
 0x582   :  { %v1601_v55 = vpop.eup %1600 }
 0x583   :  { %v1254_v18 = vmul.f32 %v1601_v55, %v1247_v3 }
 0x585   :  { %v1255_v35 = vpack.c.bf16 %v1254_v18, %v1254_v18 }
 0x587   :  { %1437 = vst [vmem:[%s2072_s2 + $0x1c] sm:$0xf] %v1255_v35 }
 0x588   :  { %1264 = vsyncpa [#allocation5], 1 }

// kernel: _forward_padded.7
= control target key start
LH: loop header
LB: loop body
LE: loop exit
PB: predicated region body
PF: predicated region fallthrough
CT: control target
= control target key end

     0   :  { %9 = vsyncpa [#allocation5], 0  ;;  %s2238_s0 = inlined_call_operand.vmem [shape: bf16[8,8,512], index: 0, kind: input, shape index: {}]   ;;  %s2239_s1 = inlined_call_operand.hbm [shape: bf16[128,512], index: 1, kind: input, shape index: {}]   ;;  %s2240_s2 = inlined_call_operand.vmem [shape: bf16[128,128], index: 2, kind: input, shape index: {}]   ;;  %s2241_s3 = inlined_call_operand.vmem [shape: f32[1,128], index: 3, kind: input, shape index: {}]   ;;  %s2242_s4 = inlined_call_operand.hbm [shape: f32[8,128], index: 4, kind: output, shape index: {}]  }
   0x1   :  { %10 = vsyncpa [#allocation6], 0  ;;  %s17_s17 = sshll.u32 %s2239_s1, 4  ;;  %s1779_s18 = smov [#allocation4]   ;;  %s18_s17 = int_to_ptr.hbm [resolvable:$true] %s17_s17 }
   0x2   :  { %s19_s19 = sshll.u32 %s1779_s18, 4  ;;  %s1780_s20 = smov 256   ;;  %s20_s19 = int_to_ptr.vmem [resolvable:$true] %s19_s19 }
   0x3   :  { %s1781_s21 = smov 16  }
   0x4   :  { %25 = dma.hbm_to_vmem [thread:$0]  %s18_s17, 4096, %s20_s19, [#allocation5], %s1780_s20, %s1780_s20, %s1781_s21  }
   0x5   :  { %1775 = dma.done.wait [#allocation5], 4096  }
   0x6   :  { %1776 = vsyncadd [#allocation5], 4294963200  ;;  %v1469_v0 = vld [vmem:[#allocation4 + $0xe0] sm:$0xf]  ;;  %v1583_v1 = vld [vmem:[#allocation4 + $0xec] sm:$0xf0] }
   0x7   :  { %v1581_v2 = vld [vmem:[#allocation4 + $0xe4] sm:$0xf]  ;;  %v1812_v3 = vor.u32 %v1583_v1, %v1469_v0  ;;  %v1471_v4 = vld [vmem:[#allocation4 + $0xf0] sm:$0xf0]  ;;  %v1477_v5 = vld [vmem:[#allocation4 + $0xe8] sm:$0xf] }
   0x8   :  { %v1584_v6 = vld [vmem:[#allocation4 + $0xf4] sm:$0xf0]  ;;  %v1814_v7 = vor.u32 %v1581_v2, %v1471_v4  ;;  %v1453_v9 = vld [vmem:[#allocation4 + $0xc0] sm:$0xf]  ;;  %v1579_v10 = vld [vmem:[#allocation4 + $0xcc] sm:$0xf0] }
   0x9   :  { %v1816_v8 = vor.u32 %v1584_v6, %v1477_v5  ;;  %v1577_v11 = vld [vmem:[#allocation4 + $0xc4] sm:$0xf]  ;;  %241 = vmatpush.bf16.msra.mxu0 %v1812_v3  ;;  %v1819_v12 = vor.u32 %v1579_v10, %v1453_v9  ;;  %v1455_v13 = vld [vmem:[#allocation4 + $0xd0] sm:$0xf0]  ;;  %v1461_v14 = vld [vmem:[#allocation4 + $0xc8] sm:$0xf] }
   0xa   :  { %v1580_v15 = vld [vmem:[#allocation4 + $0xd4] sm:$0xf0]  ;;  %254 = vmatpush.bf16.msra.mxu1 %v1814_v7  ;;  %v1823_v16 = vor.u32 %v1577_v11, %v1455_v13  ;;  %v1582_v18 = vld [vmem:[#allocation4 + $0xec] sm:$0xf]  ;;  %v1479_v19 = vld [vmem:[#allocation4 + $0xf8] sm:$0xf0] }
   0xb   :  { %267 = vmatpush.bf16.msra.mxu2 %v1816_v8  ;;  %v1825_v17 = vor.u32 %v1580_v15, %v1461_v14  ;;  %v1437_v20 = vld [vmem:[#allocation4 + $0xa0] sm:$0xf]  ;;  %v1827_v21 = vor.u32 %v1582_v18, %v1479_v19  ;;  %v1575_v22 = vld [vmem:[#allocation4 + $0xac] sm:$0xf0]  ;;  %v1573_v23 = vld [vmem:[#allocation4 + $0xa4] sm:$0xf] }
   0xc   :  { %v1439_v24 = vld [vmem:[#allocation4 + $0xb0] sm:$0xf0]  ;;  %v1445_v25 = vld [vmem:[#allocation4 + $0xa8] sm:$0xf]  ;;  %v1576_v26 = vld [vmem:[#allocation4 + $0xb4] sm:$0xf0]  ;;  %v1831_v28 = vor.u32 %v1575_v22, %v1437_v20 }
   0xd   :  { %v1578_v27 = vld [vmem:[#allocation4 + $0xcc] sm:$0xf]  ;;  %242 = vmatpush.bf16.msra.mxu0 %v1819_v12  ;;  %280 = vmatpush.bf16.msra.mxu3 %v1827_v21  ;;  %v1463_v29 = vld [vmem:[#allocation4 + $0xd8] sm:$0xf0]  ;;  %v1421_v30 = vld [vmem:[#allocation4 + $0x80] sm:$0xf]  ;;  %v1835_v32 = vor.u32 %v1573_v23, %v1439_v24  ;;  %v1837_v33 = vor.u32 %v1576_v26, %v1445_v25 }
   0xe   :  { %v1571_v31 = vld [vmem:[#allocation4 + $0x8c] sm:$0xf0]  ;;  %255 = vmatpush.bf16.msra.mxu1 %v1823_v16  ;;  %v1839_v34 = vor.u32 %v1578_v27, %v1463_v29  ;;  %v1569_v35 = vld [vmem:[#allocation4 + $0x84] sm:$0xf]  ;;  %v1423_v36 = vld [vmem:[#allocation4 + $0x90] sm:$0xf0] }
   0xf   :  { %268 = vmatpush.bf16.msra.mxu2 %v1825_v17  ;;  %v1429_v37 = vld [vmem:[#allocation4 + $0x88] sm:$0xf]  ;;  %v1572_v38 = vld [vmem:[#allocation4 + $0x94] sm:$0xf0]  ;;  %v1574_v39 = vld [vmem:[#allocation4 + $0xac] sm:$0xf]  ;;  %v1843_v41 = vor.u32 %v1571_v31, %v1421_v30  ;;  %v1849_v45 = vor.u32 %v1569_v35, %v1423_v36 }
  0x10   :  { %v1447_v40 = vld [vmem:[#allocation4 + $0xb8] sm:$0xf0]  ;;  %v1405_v43 = vld [vmem:[#allocation4 + $0x60] sm:$0xf]  ;;  %v1567_v44 = vld [vmem:[#allocation4 + $0x6c] sm:$0xf0]  ;;  %v1851_v46 = vor.u32 %v1572_v38, %v1429_v37 }
  0x11   :  { %243 = vmatpush.bf16.msra.mxu0 %v1831_v28  ;;  %281 = vmatpush.bf16.msra.mxu3 %v1839_v34  ;;  %v1845_v42 = vor.u32 %v1574_v39, %v1447_v40  ;;  %v1565_v47 = vld [vmem:[#allocation4 + $0x64] sm:$0xf]  ;;  %v1570_v48 = vld [vmem:[#allocation4 + $0x8c] sm:$0xf]  ;;  %v1431_v49 = vld [vmem:[#allocation4 + $0x98] sm:$0xf0]  ;;  %v1855_v53 = vor.u32 %v1567_v44, %v1405_v43 }
  0x12   :  { %256 = vmatpush.bf16.msra.mxu1 %v1835_v32  ;;  %v1407_v50 = vld [vmem:[#allocation4 + $0x70] sm:$0xf0]  ;;  %v1413_v51 = vld [vmem:[#allocation4 + $0x68] sm:$0xf]  ;;  %v1568_v52 = vld [vmem:[#allocation4 + $0x74] sm:$0xf0]  ;;  %v1857_v54 = vor.u32 %v1570_v48, %v1431_v49 }
  0x13   :  { %269 = vmatpush.bf16.msra.mxu2 %v1837_v33  ;;  %v1389_v55 = vld [vmem:[#allocation4 + $0x40] sm:$0xf]  ;;  %v1563_v56 = vld [vmem:[#allocation4 + $0x4c] sm:$0xf0]  ;;  %v1861_v57 = vor.u32 %v1565_v47, %v1407_v50  ;;  %v1863_v58 = vor.u32 %v1568_v52, %v1413_v51  ;;  %v1561_v59 = vld [vmem:[#allocation4 + $0x44] sm:$0xf] }
  0x14   :  { %v1566_v60 = vld [vmem:[#allocation4 + $0x6c] sm:$0xf]  ;;  %v1415_v61 = vld [vmem:[#allocation4 + $0x78] sm:$0xf0]  ;;  %v1391_v62 = vld [vmem:[#allocation4 + $0x50] sm:$0xf0]  ;;  %v1867_v1 = vor.u32 %v1563_v56, %v1389_v55 }
  0x15   :  { %244 = vmatpush.bf16.msra.mxu0 %v1843_v41  ;;  %282 = vmatpush.bf16.msra.mxu3 %v1845_v42  ;;  %v1397_v63 = vld [vmem:[#allocation4 + $0x48] sm:$0xf]  ;;  %v1564_v0 = vld [vmem:[#allocation4 + $0x54] sm:$0xf0]  ;;  %v1869_v2 = vor.u32 %v1566_v60, %v1415_v61  ;;  %v1373_v4 = vld [vmem:[#allocation4 + $0x20] sm:$0xf]  ;;  %v1873_v9 = vor.u32 %v1561_v59, %v1391_v62 }
  0x16   :  { %257 = vmatpush.bf16.msra.mxu1 %v1849_v45  ;;  %v1559_v5 = vld [vmem:[#allocation4 + $0x2c] sm:$0xf0]  ;;  %v1557_v6 = vld [vmem:[#allocation4 + $0x24] sm:$0xf]  ;;  %v1875_v10 = vor.u32 %v1564_v0, %v1397_v63  ;;  %v1375_v11 = vld [vmem:[#allocation4 + $0x30] sm:$0xf0] }
  0x17   :  { %270 = vmatpush.bf16.msra.mxu2 %v1851_v46  ;;  %v1562_v13 = vld [vmem:[#allocation4 + $0x4c] sm:$0xf]  ;;  %v1399_v14 = vld [vmem:[#allocation4 + $0x58] sm:$0xf0]  ;;  %v1381_v15 = vld [vmem:[#allocation4 + $0x28] sm:$0xf]  ;;  %v1879_v19 = vor.u32 %v1559_v5, %v1373_v4  ;;  %v1885_v24 = vor.u32 %v1557_v6, %v1375_v11 }
  0x18   :  { %v1560_v18 = vld [vmem:[#allocation4 + $0x34] sm:$0xf0]  ;;  %v1881_v20 = vor.u32 %v1562_v13, %v1399_v14  ;;  %v1357_v22 = vld [vmem:[#allocation4] sm:$0xf]  ;;  %v1555_v23 = vld [vmem:[#allocation4 + $0xc] sm:$0xf0] }
  0x19   :  { %245 = vmatpush.bf16.msra.mxu0 %v1855_v53  ;;  %283 = vmatpush.bf16.msra.mxu3 %v1857_v54  ;;  %v1887_v25 = vor.u32 %v1560_v18, %v1381_v15  ;;  %v1553_v26 = vld [vmem:[#allocation4 + $0x4] sm:$0xf]  ;;  %v1558_v27 = vld [vmem:[#allocation4 + $0x2c] sm:$0xf]  ;;  %v1383_v29 = vld [vmem:[#allocation4 + $0x38] sm:$0xf0]  ;;  %v1891_v36 = vor.u32 %v1555_v23, %v1357_v22 }
  0x1a   :  { %258 = vmatpush.bf16.msra.mxu1 %v1861_v57  ;;  %v1359_v30 = vld [vmem:[#allocation4 + $0x10] sm:$0xf0]  ;;  %v1365_v31 = vld [vmem:[#allocation4 + $0x8] sm:$0xf]  ;;  %v1556_v35 = vld [vmem:[#allocation4 + $0x14] sm:$0xf0]  ;;  %v1893_v37 = vor.u32 %v1558_v27, %v1383_v29 }
  0x1b   :  { %271 = vmatpush.bf16.msra.mxu2 %v1863_v58  ;;  %v1897_v38 = vor.u32 %v1553_v26, %v1359_v30  ;;  %v1899_v39 = vor.u32 %v1556_v35, %v1365_v31  ;;  %v1554_v40 = vld [vmem:[#allocation4 + $0xc] sm:$0xf]  ;;  %v1367_v43 = vld [vmem:[#allocation4 + $0x18] sm:$0xf0]  ;;  %v1782_v47 = vmov 0.0|0.0   ;;  %v74_v48 = vld [vmem:[%s2238_s0] sm:$0xff] }
  0x1c   :  { %v1905_v44 = vor.u32 %v1554_v40, %v1367_v43  ;;  %v76_v49 = vunpack.c.l.bf16 %v74_v48  ;;  %v77_v50 = vunpack.c.h.bf16 %v74_v48  ;;  %v75_v56 = vld [vmem:[%s2238_s0 + $0x8] sm:$0xff]  ;;  %s1783_s16 = smov [#allocation7]   ;;  %s1345_s20 = sshll.u32 %s2242_s4, 4  ;;  %s1346_s20 = int_to_ptr.hbm [resolvable:$true] %s1345_s20 }
  0x1d   :  { %246 = vmatpush.bf16.msra.mxu0 %v1867_v1  ;;  %284 = vmatpush.bf16.msra.mxu3 %v1869_v2  ;;  %v78_v62 = vunpack.c.l.bf16 %v75_v56  ;;  %v79_v22 = vunpack.c.h.bf16 %v75_v56  ;;  %s1343_s17 = sshll.u32 %s1783_s16, 4  ;;  %s1344_s17 = int_to_ptr.vmem [resolvable:$true] %s1343_s17 }
  0x1e   :  { %259 = vmatpush.bf16.msra.mxu1 %v1873_v9 }
  0x1f   :  { %272 = vmatpush.bf16.msra.mxu2 %v1875_v10 }
  0x21   :  { %247 = vmatpush.bf16.msra.mxu0 %v1879_v19  ;;  %285 = vmatpush.bf16.msra.mxu3 %v1881_v20 }
  0x22   :  { %260 = vmatpush.bf16.msra.mxu1 %v1885_v24 }
  0x23   :  { %273 = vmatpush.bf16.msra.mxu2 %v1887_v25 }
  0x25   :  { %248 = vmatpush.bf16.msra.mxu0 %v1891_v36  ;;  %286 = vmatpush.bf16.msra.mxu3 %v1893_v37 }
  0x26   :  { %261 = vmatpush.bf16.msra.mxu1 %v1897_v38 }
  0x27   :  { %274 = vmatpush.bf16.msra.mxu2 %v1899_v39 }
  0x28   :  { %249 = vmatmul.bf16.vlgmr.msra.gmra.mxu0 %v1782_v47 }
  0x29   :  { %368 = vmatpush.bf16.msrb.mxu0 %v1812_v3  ;;  %262 = vmatmul.bf16.vlgmr.msra.gmra.mxu1 %v1782_v47 }
  0x2a   :  { %381 = vmatpush.bf16.msrb.mxu1 %v1814_v7  ;;  %275 = vmatmul.bf16.vlgmr.msra.gmra.mxu2 %v1782_v47 }
  0x2b   :  { %394 = vmatpush.bf16.msrb.mxu2 %v1816_v8  ;;  %287 = vmatpush.bf16.msra.mxu3 %v1905_v44 }
  0x2d   :  { %369 = vmatpush.bf16.msrb.mxu0 %v1819_v12 }
  0x2e   :  { %382 = vmatpush.bf16.msrb.mxu1 %v1823_v16  ;;  %288 = vmatmul.bf16.vlgmr.msra.gmra.mxu3 %v1782_v47 }
  0x2f   :  { %407 = vmatpush.bf16.msrb.mxu3 %v1827_v21  ;;  %395 = vmatpush.bf16.msrb.mxu2 %v1825_v17 }
  0x31   :  { %370 = vmatpush.bf16.msrb.mxu0 %v1831_v28 }
  0x32   :  { %383 = vmatpush.bf16.msrb.mxu1 %v1835_v32 }
  0x33   :  { %408 = vmatpush.bf16.msrb.mxu3 %v1839_v34  ;;  %396 = vmatpush.bf16.msrb.mxu2 %v1837_v33 }
  0x35   :  { %371 = vmatpush.bf16.msrb.mxu0 %v1843_v41 }
  0x36   :  { %384 = vmatpush.bf16.msrb.mxu1 %v1849_v45 }
  0x37   :  { %409 = vmatpush.bf16.msrb.mxu3 %v1845_v42  ;;  %397 = vmatpush.bf16.msrb.mxu2 %v1851_v46 }
  0x39   :  { %372 = vmatpush.bf16.msrb.mxu0 %v1855_v53 }
  0x3a   :  { %385 = vmatpush.bf16.msrb.mxu1 %v1861_v57 }
  0x3b   :  { %410 = vmatpush.bf16.msrb.mxu3 %v1857_v54  ;;  %398 = vmatpush.bf16.msrb.mxu2 %v1863_v58 }
  0x3d   :  { %373 = vmatpush.bf16.msrb.mxu0 %v1867_v1 }
  0x3e   :  { %386 = vmatpush.bf16.msrb.mxu1 %v1873_v9 }
  0x3f   :  { %411 = vmatpush.bf16.msrb.mxu3 %v1869_v2  ;;  %399 = vmatpush.bf16.msrb.mxu2 %v1875_v10 }
  0x41   :  { %374 = vmatpush.bf16.msrb.mxu0 %v1879_v19 }
  0x42   :  { %387 = vmatpush.bf16.msrb.mxu1 %v1885_v24 }
  0x43   :  { %412 = vmatpush.bf16.msrb.mxu3 %v1881_v20  ;;  %400 = vmatpush.bf16.msrb.mxu2 %v1887_v25 }
  0x45   :  { %375 = vmatpush.bf16.msrb.mxu0 %v1891_v36 }
  0x46   :  { %388 = vmatpush.bf16.msrb.mxu1 %v1897_v38 }
  0x47   :  { %413 = vmatpush.bf16.msrb.mxu3 %v1893_v37  ;;  %401 = vmatpush.bf16.msrb.mxu2 %v1899_v39 }
  0x49   :  { %495 = vmatpush.bf16.msra.mxu0 %v1812_v3 }
  0x4a   :  { %508 = vmatpush.bf16.msra.mxu1 %v1814_v7 }
  0x4b   :  { %521 = vmatpush.bf16.msra.mxu2 %v1816_v8  ;;  %414 = vmatpush.bf16.msrb.mxu3 %v1905_v44 }
  0x4d   :  { %496 = vmatpush.bf16.msra.mxu0 %v1819_v12 }
  0x4e   :  { %509 = vmatpush.bf16.msra.mxu1 %v1823_v16 }
  0x4f   :  { %534 = vmatpush.bf16.msra.mxu3 %v1827_v21  ;;  %522 = vmatpush.bf16.msra.mxu2 %v1825_v17 }
  0x51   :  { %497 = vmatpush.bf16.msra.mxu0 %v1831_v28 }
  0x52   :  { %510 = vmatpush.bf16.msra.mxu1 %v1835_v32 }
  0x53   :  { %535 = vmatpush.bf16.msra.mxu3 %v1839_v34  ;;  %523 = vmatpush.bf16.msra.mxu2 %v1837_v33 }
  0x55   :  { %498 = vmatpush.bf16.msra.mxu0 %v1843_v41 }
  0x56   :  { %511 = vmatpush.bf16.msra.mxu1 %v1849_v45 }
  0x57   :  { %536 = vmatpush.bf16.msra.mxu3 %v1845_v42  ;;  %524 = vmatpush.bf16.msra.mxu2 %v1851_v46 }
  0x59   :  { %499 = vmatpush.bf16.msra.mxu0 %v1855_v53 }
  0x5a   :  { %512 = vmatpush.bf16.msra.mxu1 %v1861_v57 }
  0x5b   :  { %537 = vmatpush.bf16.msra.mxu3 %v1857_v54  ;;  %525 = vmatpush.bf16.msra.mxu2 %v1863_v58 }
  0x5d   :  { %500 = vmatpush.bf16.msra.mxu0 %v1867_v1 }
  0x5e   :  { %513 = vmatpush.bf16.msra.mxu1 %v1873_v9 }
  0x5f   :  { %538 = vmatpush.bf16.msra.mxu3 %v1869_v2  ;;  %526 = vmatpush.bf16.msra.mxu2 %v1875_v10 }
  0x61   :  { %501 = vmatpush.bf16.msra.mxu0 %v1879_v19 }
  0x62   :  { %514 = vmatpush.bf16.msra.mxu1 %v1885_v24 }
  0x63   :  { %539 = vmatpush.bf16.msra.mxu3 %v1881_v20  ;;  %527 = vmatpush.bf16.msra.mxu2 %v1887_v25 }
  0x65   :  { %502 = vmatpush.bf16.msra.mxu0 %v1891_v36 }
  0x66   :  { %515 = vmatpush.bf16.msra.mxu1 %v1897_v38 }
  0x67   :  { %540 = vmatpush.bf16.msra.mxu3 %v1893_v37  ;;  %528 = vmatpush.bf16.msra.mxu2 %v1899_v39 }
  0x6b   :  { %541 = vmatpush.bf16.msra.mxu3 %v1905_v44 }
  0xa5   :  { %v250_v51 = vpop.f32.mrf.mxu0 }
  0xa6   :  { %v293_v52 = vadd.f32 %v250_v51, %v76_v49  ;;  %v263_v55 = vpop.f32.mrf.mxu1 }
  0xa7   :  { %v294_v59 = vadd.f32 %v263_v55, %v77_v50 }
  0xa8   :  { %v1483_v60 = vmul.f32 -1.442695, %v293_v52 }
  0xa9   :  { %v1484_v61 = vmul.f32 -1.442695, %v294_v59 }
  0xaa   :  { %1599 = vpow2.f32 %v1483_v60 }
  0xab   :  { %1601 = vpow2.f32 %v1484_v61 }
  0xad   :  { %v276_v63 = vpop.f32.mrf.mxu2  ;;  %v252_v4 = vpop.f32.mrf.mxu0 }
  0xae   :  { %v295_v0 = vadd.f32 %v276_v63, %v78_v62  ;;  %v265_v5 = vpop.f32.mrf.mxu1 }
  0xb0   :  { %v1485_v6 = vmul.f32 -1.442695, %v295_v0  ;;  %v1600_v11 = vpop.eup %1599 }
  0xb1   :  { %v289_v13 = vpop.f32.mrf.mxu3  ;;  %v1602_v14 = vpop.eup %1601  ;;  %v306_v15 = vadd.f32 1.0, %v1600_v11 }
  0xb2   :  { %1603 = vpow2.f32 %v1485_v6  ;;  %v307_v18 = vadd.f32 1.0, %v1602_v14  ;;  %v296_v27 = vadd.f32 %v289_v13, %v79_v22 }
  0xb3   :  { %1605 = vrcp.f32 %v306_v15  ;;  %v320_v49 = vand.u32 2147483648, %v306_v15  ;;  %v318_v52 = vand.u32 2147483647, %v306_v15  ;;  %vm314_vm2 = vweird.f32 %v306_v15 }
  0xb4   :  { %1607 = vrcp.f32 %v307_v18  ;;  %v335_v50 = vand.u32 2147483648, %v307_v18  ;;  %v333_v56 = vand.u32 2147483647, %v307_v18  ;;  %vm329_vm3 = vweird.f32 %v307_v18 }
  0xb5   :  { %v278_v23 = vpop.f32.mrf.mxu2  ;;  %v321_v63 = vor.u32 1.1754944e-38, %v320_v49  ;;  %vm319_vm5 = vcmp.eq.f32.partialorder %v318_v52, 8.507059e+37 }
  0xb6   :  { %v336_v4 = vor.u32 1.1754944e-38, %v335_v50  ;;  %vm334_vm7 = vcmp.eq.f32.partialorder %v333_v56, 8.507059e+37 }
  0xb8   :  { %v1604_v26 = vpop.eup %1603 }
  0xb9   :  { %v308_v29 = vadd.f32 1.0, %v1604_v26  ;;  %v291_v30 = vpop.f32.mrf.mxu3  ;;  %v1606_v31 = vpop.eup %1605 }
  0xba   :  { %v1608_v35 = vpop.eup %1607  ;;  %v310_v40 = vmul.f32 %v1606_v31, %v306_v15  ;;  %vm315_vm0 = vweird.f32 %v1606_v31 }
  0xbb   :  { %1609 = vrcp.f32 %v308_v29  ;;  %v325_v43 = vmul.f32 %v1608_v35, %v307_v18  ;;  %vm330_vm1 = vweird.f32 %v1608_v35  ;;  %vm316_vm4 = vmor %vm314_vm2, %vm315_vm0  ;;  %v350_v18 = vand.u32 2147483648, %v308_v29 }
  0xbc   :  { %1611 = vtanh.f32 %v296_v27  ;;  %v311_v47 = vsub.f32 1.0, %v310_v40  ;;  %vm331_vm6 = vmor %vm329_vm3, %vm330_vm1  ;;  %vm344_vm9 = vweird.f32 %v308_v29  ;;  %v348_v30 = vand.u32 2147483647, %v308_v29 }
  0xbd   :  { %v326_v48 = vsub.f32 1.0, %v325_v43  ;;  %v351_v40 = vor.u32 1.1754944e-38, %v350_v18 }
  0xbe   :  { %v312_v51 = vmul.f32 %v1606_v31, %v311_v47  ;;  %vm349_vm11 = vcmp.eq.f32.partialorder %v348_v30, 8.507059e+37 }
  0xbf   :  { %v327_v55 = vmul.f32 %v1608_v35, %v326_v48 }
  0xc0   :  { %v313_v60 = vadd.f32 %v1606_v31, %v312_v51 }
  0xc1   :  { %v1610_v59 = vpop.eup %1609  ;;  %v328_v0 = vadd.f32 %v1608_v35, %v327_v55 }
  0xc2   :  { %v1612_v61 = vpop.eup %1611  ;;  %v340_v62 = vmul.f32 %v1610_v59, %v308_v29  ;;  %v317_v5 = vsel %vm316_vm4, %v1606_v31, %v313_v60  ;;  %vm345_vm8 = vweird.f32 %v1610_v59  ;;  %v1486_v29 = vld [vmem:[%s2238_s0 + $0x10] sm:$0xff] }
  0xc3   :  { %v322_v11 = vsel %vm319_vm5, %v321_v63, %v317_v5  ;;  %v332_v13 = vsel %vm331_vm6, %v1608_v35, %v328_v0  ;;  %vm346_vm10 = vmor %vm344_vm9, %vm345_vm8  ;;  %v363_v49 = vunpack.c.l.bf16 %v1486_v29  ;;  %v364_v50 = vunpack.c.h.bf16 %v1486_v29 }
  0xc4   :  { %v341_v6 = vsub.f32 1.0, %v340_v62  ;;  %v337_v14 = vsel %vm334_vm7, %v336_v4, %v332_v13  ;;  %v356_v22 = vmul.f32 %v1612_v61, %v322_v11 }
  0xc5   :  { %v355_v23 = vmul.f32 0.0, %v337_v14 }
  0xc6   :  { %v342_v26 = vmul.f32 %v1610_v59, %v341_v6 }
  0xc7   :  { %v1978_v27 = vadd.f32 %v356_v22, %v355_v23 }
  0xc8   :  { %v343_v15 = vadd.f32 %v1610_v59, %v342_v26 }
  0xc9   :  { %1613 = vtanh.f32 %v1978_v27 }
  0xca   :  { %v347_v31 = vsel %vm346_vm10, %v1610_v59, %v343_v15  ;;  %v1487_v59 = vld [vmem:[%s2238_s0 + $0x18] sm:$0xff] }
  0xcb   :  { %v352_v35 = vsel %vm349_vm11, %v351_v40, %v347_v31  ;;  %v365_v62 = vunpack.c.l.bf16 %v1487_v59  ;;  %v366_v18 = vunpack.c.h.bf16 %v1487_v59 }
  0xcf   :  { %v1614_v43 = vpop.eup %1613 }
  0xd0   :  { %v359_v47 = vmul.f32 %v1614_v43, %v352_v35 }
  0xd2   :  { %v367_v48 = vpack.c.bf16 %v359_v47, %v359_v47 }
  0xd4   :  { %376 = vmatmul.bf16.vlgmr.msrb.gmra.mxu0 %v367_v48  ;;  %389 = vmatmul.bf16.vlgmr.msrb.gmra.mxu1 %v367_v48 }
  0xd5   :  { %402 = vmatmul.bf16.vlgmr.msrb.gmra.mxu2 %v367_v48  ;;  %415 = vmatmul.bf16.vlgmr.msrb.gmra.mxu3 %v367_v48 }
  0xd6   :  { %622 = vmatpush.bf16.msrb.mxu0 %v1812_v3  ;;  %635 = vmatpush.bf16.msrb.mxu1 %v1814_v7 }
  0xd7   :  { %648 = vmatpush.bf16.msrb.mxu2 %v1816_v8  ;;  %661 = vmatpush.bf16.msrb.mxu3 %v1827_v21 }
  0xda   :  { %623 = vmatpush.bf16.msrb.mxu0 %v1819_v12  ;;  %636 = vmatpush.bf16.msrb.mxu1 %v1823_v16 }
  0xdb   :  { %649 = vmatpush.bf16.msrb.mxu2 %v1825_v17  ;;  %662 = vmatpush.bf16.msrb.mxu3 %v1839_v34 }
  0xde   :  { %624 = vmatpush.bf16.msrb.mxu0 %v1831_v28  ;;  %637 = vmatpush.bf16.msrb.mxu1 %v1835_v32 }
  0xdf   :  { %650 = vmatpush.bf16.msrb.mxu2 %v1837_v33  ;;  %663 = vmatpush.bf16.msrb.mxu3 %v1845_v42 }
  0xe2   :  { %625 = vmatpush.bf16.msrb.mxu0 %v1843_v41  ;;  %638 = vmatpush.bf16.msrb.mxu1 %v1849_v45 }
  0xe3   :  { %651 = vmatpush.bf16.msrb.mxu2 %v1851_v46  ;;  %664 = vmatpush.bf16.msrb.mxu3 %v1857_v54 }
  0xe6   :  { %626 = vmatpush.bf16.msrb.mxu0 %v1855_v53  ;;  %639 = vmatpush.bf16.msrb.mxu1 %v1861_v57 }
  0xe7   :  { %652 = vmatpush.bf16.msrb.mxu2 %v1863_v58  ;;  %665 = vmatpush.bf16.msrb.mxu3 %v1869_v2 }
  0xea   :  { %627 = vmatpush.bf16.msrb.mxu0 %v1867_v1  ;;  %640 = vmatpush.bf16.msrb.mxu1 %v1873_v9 }
  0xeb   :  { %653 = vmatpush.bf16.msrb.mxu2 %v1875_v10  ;;  %666 = vmatpush.bf16.msrb.mxu3 %v1881_v20 }
  0xee   :  { %628 = vmatpush.bf16.msrb.mxu0 %v1879_v19  ;;  %641 = vmatpush.bf16.msrb.mxu1 %v1885_v24 }
  0xef   :  { %654 = vmatpush.bf16.msrb.mxu2 %v1887_v25  ;;  %667 = vmatpush.bf16.msrb.mxu3 %v1893_v37 }
  0xf2   :  { %629 = vmatpush.bf16.msrb.mxu0 %v1891_v36  ;;  %642 = vmatpush.bf16.msrb.mxu1 %v1897_v38 }
  0xf3   :  { %655 = vmatpush.bf16.msrb.mxu2 %v1899_v39  ;;  %668 = vmatpush.bf16.msrb.mxu3 %v1905_v44 }
 0x151   :  { %v377_v51 = vpop.f32.mrf.mxu0  ;;  %v390_v52 = vpop.f32.mrf.mxu1 }
 0x152   :  { %v420_v55 = vadd.f32 %v377_v51, %v363_v49  ;;  %v421_v56 = vadd.f32 %v390_v52, %v364_v50 }
 0x154   :  { %v1488_v60 = vmul.f32 -1.442695, %v420_v55  ;;  %v1489_v61 = vmul.f32 -1.442695, %v421_v56 }
 0x156   :  { %1615 = vpow2.f32 %v1488_v60 }
 0x157   :  { %1617 = vpow2.f32 %v1489_v61 }
 0x158   :  { %v403_v63 = vpop.f32.mrf.mxu2  ;;  %v416_v0 = vpop.f32.mrf.mxu3 }
 0x159   :  { %v422_v4 = vadd.f32 %v403_v63, %v365_v62  ;;  %v379_v5 = vpop.f32.mrf.mxu0  ;;  %v392_v6 = vpop.f32.mrf.mxu1  ;;  %v423_v43 = vadd.f32 %v416_v0, %v366_v18 }
 0x15b   :  { %v1490_v11 = vmul.f32 -1.442695, %v422_v4 }
 0x15c   :  { %v1616_v13 = vpop.eup %1615 }
 0x15d   :  { %v1618_v14 = vpop.eup %1617  ;;  %v433_v22 = vadd.f32 1.0, %v1616_v13  ;;  %1619 = vpow2.f32 %v1490_v11 }
 0x15e   :  { %v434_v23 = vadd.f32 1.0, %v1618_v14 }
 0x15f   :  { %1621 = vrcp.f32 %v433_v22  ;;  %v447_v50 = vand.u32 2147483648, %v433_v22  ;;  %v445_v55 = vand.u32 2147483647, %v433_v22  ;;  %vm441_vm14 = vweird.f32 %v433_v22 }
 0x160   :  { %1623 = vrcp.f32 %v434_v23  ;;  %v405_v26 = vpop.f32.mrf.mxu2  ;;  %v418_v15 = vpop.f32.mrf.mxu3  ;;  %v462_v51 = vand.u32 2147483648, %v434_v23  ;;  %v460_v60 = vand.u32 2147483647, %v434_v23  ;;  %vm456_vm15 = vweird.f32 %v434_v23 }
 0x161   :  { %v448_v63 = vor.u32 1.1754944e-38, %v447_v50  ;;  %vm446_vm2 = vcmp.eq.f32.partialorder %v445_v55, 8.507059e+37 }
 0x162   :  { %v463_v4 = vor.u32 1.1754944e-38, %v462_v51  ;;  %vm461_vm3 = vcmp.eq.f32.partialorder %v460_v60, 8.507059e+37 }
 0x163   :  { %v1620_v30 = vpop.eup %1619 }
 0x164   :  { %v435_v31 = vadd.f32 1.0, %v1620_v30 }
 0x165   :  { %v1622_v40 = vpop.eup %1621 }
 0x166   :  { %v1624_v35 = vpop.eup %1623  ;;  %v437_v47 = vmul.f32 %v1622_v40, %v433_v22  ;;  %1625 = vrcp.f32 %v435_v31  ;;  %vm442_vm12 = vweird.f32 %v1622_v40  ;;  %vm471_vm5 = vweird.f32 %v435_v31 }
 0x167   :  { %v452_v48 = vmul.f32 %v1624_v35, %v434_v23  ;;  %1627 = vtanh.f32 %v423_v43  ;;  %vm457_vm13 = vweird.f32 %v1624_v35  ;;  %vm443_vm0 = vmor %vm441_vm14, %vm442_vm12  ;;  %v477_v43 = vand.u32 2147483648, %v435_v31 }
 0x168   :  { %v438_v29 = vsub.f32 1.0, %v437_v47  ;;  %vm458_vm1 = vmor %vm456_vm15, %vm457_vm13 }
 0x169   :  { %v453_v49 = vsub.f32 1.0, %v452_v48  ;;  %v478_v48 = vor.u32 1.1754944e-38, %v477_v43 }
 0x16a   :  { %v439_v52 = vmul.f32 %v1622_v40, %v438_v29 }
 0x16b   :  { %v454_v56 = vmul.f32 %v1624_v35, %v453_v49 }
 0x16c   :  { %v1626_v59 = vpop.eup %1625  ;;  %v440_v61 = vadd.f32 %v1622_v40, %v439_v52 }
 0x16d   :  { %v467_v62 = vmul.f32 %v1626_v59, %v435_v31  ;;  %v455_v0 = vadd.f32 %v1624_v35, %v454_v56  ;;  %v1628_v6 = vpop.eup %1627  ;;  %vm472_vm4 = vweird.f32 %v1626_v59 }
 0x16e   :  { %v444_v5 = vsel %vm443_vm0, %v1622_v40, %v440_v61  ;;  %v475_v40 = vand.u32 2147483647, %v435_v31  ;;  %vm473_vm6 = vmor %vm471_vm5, %vm472_vm4 }
 0x16f   :  { %v468_v11 = vsub.f32 1.0, %v467_v62  ;;  %v449_v13 = vsel %vm446_vm2, %v448_v63, %v444_v5  ;;  %v459_v14 = vsel %vm458_vm1, %v1624_v35, %v455_v0 }
 0x170   :  { %v464_v26 = vsel %vm461_vm3, %v463_v4, %v459_v14  ;;  %v483_v15 = vmul.f32 %v1628_v6, %v449_v13  ;;  %vm476_vm7 = vcmp.eq.f32.partialorder %v475_v40, 8.507059e+37 }
 0x171   :  { %v482_v18 = vmul.f32 %v464_v26, %v1978_v27  ;;  %v469_v30 = vmul.f32 %v1626_v59, %v468_v11  ;;  %v1491_v27 = vld [vmem:[%s2238_s0 + $0x20] sm:$0xff] }
 0x172   :  { %v490_v31 = vunpack.c.l.bf16 %v1491_v27  ;;  %v491_v51 = vunpack.c.h.bf16 %v1491_v27 }
 0x173   :  { %v2020_v22 = vadd.f32 %v483_v15, %v482_v18  ;;  %v470_v23 = vadd.f32 %v1626_v59, %v469_v30 }
 0x175   :  { %1629 = vtanh.f32 %v2020_v22  ;;  %v474_v47 = vsel %vm473_vm6, %v1626_v59, %v470_v23  ;;  %v1492_v59 = vld [vmem:[%s2238_s0 + $0x28] sm:$0xff] }
 0x176   :  { %v479_v29 = vsel %vm476_vm7, %v478_v48, %v474_v47  ;;  %v492_v63 = vunpack.c.l.bf16 %v1492_v59  ;;  %v493_v43 = vunpack.c.h.bf16 %v1492_v59 }
 0x17b   :  { %v1630_v35 = vpop.eup %1629 }
 0x17c   :  { %v486_v49 = vmul.f32 %v1630_v35, %v479_v29 }
 0x17e   :  { %v494_v50 = vpack.c.bf16 %v486_v49, %v486_v49 }
 0x180   :  { %503 = vmatmul.bf16.vlgmr.msra.gmra.mxu0 %v494_v50  ;;  %516 = vmatmul.bf16.vlgmr.msra.gmra.mxu1 %v494_v50 }
 0x181   :  { %529 = vmatmul.bf16.vlgmr.msra.gmra.mxu2 %v494_v50  ;;  %542 = vmatmul.bf16.vlgmr.msra.gmra.mxu3 %v494_v50 }
 0x182   :  { %749 = vmatpush.bf16.msra.mxu0 %v1812_v3  ;;  %762 = vmatpush.bf16.msra.mxu1 %v1814_v7 }
 0x183   :  { %775 = vmatpush.bf16.msra.mxu2 %v1816_v8  ;;  %788 = vmatpush.bf16.msra.mxu3 %v1827_v21 }
 0x186   :  { %750 = vmatpush.bf16.msra.mxu0 %v1819_v12  ;;  %763 = vmatpush.bf16.msra.mxu1 %v1823_v16 }
 0x187   :  { %776 = vmatpush.bf16.msra.mxu2 %v1825_v17  ;;  %789 = vmatpush.bf16.msra.mxu3 %v1839_v34 }
 0x18a   :  { %751 = vmatpush.bf16.msra.mxu0 %v1831_v28  ;;  %764 = vmatpush.bf16.msra.mxu1 %v1835_v32 }
 0x18b   :  { %777 = vmatpush.bf16.msra.mxu2 %v1837_v33  ;;  %790 = vmatpush.bf16.msra.mxu3 %v1845_v42 }
 0x18e   :  { %752 = vmatpush.bf16.msra.mxu0 %v1843_v41  ;;  %765 = vmatpush.bf16.msra.mxu1 %v1849_v45 }
 0x18f   :  { %778 = vmatpush.bf16.msra.mxu2 %v1851_v46  ;;  %791 = vmatpush.bf16.msra.mxu3 %v1857_v54 }
 0x192   :  { %753 = vmatpush.bf16.msra.mxu0 %v1855_v53  ;;  %766 = vmatpush.bf16.msra.mxu1 %v1861_v57 }
 0x193   :  { %779 = vmatpush.bf16.msra.mxu2 %v1863_v58  ;;  %792 = vmatpush.bf16.msra.mxu3 %v1869_v2 }
 0x196   :  { %754 = vmatpush.bf16.msra.mxu0 %v1867_v1  ;;  %767 = vmatpush.bf16.msra.mxu1 %v1873_v9 }
 0x197   :  { %780 = vmatpush.bf16.msra.mxu2 %v1875_v10  ;;  %793 = vmatpush.bf16.msra.mxu3 %v1881_v20 }
 0x19a   :  { %755 = vmatpush.bf16.msra.mxu0 %v1879_v19  ;;  %768 = vmatpush.bf16.msra.mxu1 %v1885_v24 }
 0x19b   :  { %781 = vmatpush.bf16.msra.mxu2 %v1887_v25  ;;  %794 = vmatpush.bf16.msra.mxu3 %v1893_v37 }
 0x19e   :  { %756 = vmatpush.bf16.msra.mxu0 %v1891_v36  ;;  %769 = vmatpush.bf16.msra.mxu1 %v1897_v38 }
 0x19f   :  { %782 = vmatpush.bf16.msra.mxu2 %v1899_v39  ;;  %795 = vmatpush.bf16.msra.mxu3 %v1905_v44 }
 0x1fd   :  { %v504_v52 = vpop.f32.mrf.mxu0  ;;  %v517_v55 = vpop.f32.mrf.mxu1 }
 0x1fe   :  { %v547_v56 = vadd.f32 %v504_v52, %v490_v31  ;;  %v548_v60 = vadd.f32 %v517_v55, %v491_v51 }
 0x200   :  { %v1493_v61 = vmul.f32 -1.442695, %v547_v56  ;;  %v1494_v62 = vmul.f32 -1.442695, %v548_v60 }
 0x202   :  { %1631 = vpow2.f32 %v1493_v61 }
 0x203   :  { %1633 = vpow2.f32 %v1494_v62 }
 0x204   :  { %v530_v0 = vpop.f32.mrf.mxu2  ;;  %v543_v4 = vpop.f32.mrf.mxu3 }
 0x205   :  { %v549_v5 = vadd.f32 %v530_v0, %v492_v63  ;;  %v506_v6 = vpop.f32.mrf.mxu0  ;;  %v519_v11 = vpop.f32.mrf.mxu1  ;;  %v550_v35 = vadd.f32 %v543_v4, %v493_v43 }
 0x207   :  { %v1495_v13 = vmul.f32 -1.442695, %v549_v5 }
 0x208   :  { %v1632_v14 = vpop.eup %1631 }
 0x209   :  { %v1634_v26 = vpop.eup %1633  ;;  %v560_v15 = vadd.f32 1.0, %v1632_v14  ;;  %1635 = vpow2.f32 %v1495_v13 }
 0x20a   :  { %v561_v18 = vadd.f32 1.0, %v1634_v26 }
 0x20b   :  { %1637 = vrcp.f32 %v560_v15  ;;  %v574_v51 = vand.u32 2147483648, %v560_v15  ;;  %v572_v56 = vand.u32 2147483647, %v560_v15  ;;  %vm568_vm10 = vweird.f32 %v560_v15 }
 0x20c   :  { %1639 = vrcp.f32 %v561_v18  ;;  %v532_v30 = vpop.f32.mrf.mxu2  ;;  %v545_v23 = vpop.f32.mrf.mxu3  ;;  %v589_v52 = vand.u32 2147483648, %v561_v18  ;;  %v587_v61 = vand.u32 2147483647, %v561_v18  ;;  %vm583_vm11 = vweird.f32 %v561_v18 }
 0x20d   :  { %v575_v0 = vor.u32 1.1754944e-38, %v574_v51  ;;  %vm573_vm14 = vcmp.eq.f32.partialorder %v572_v56, 8.507059e+37 }
 0x20e   :  { %v590_v5 = vor.u32 1.1754944e-38, %v589_v52  ;;  %vm588_vm15 = vcmp.eq.f32.partialorder %v587_v61, 8.507059e+37 }
 0x20f   :  { %v1636_v40 = vpop.eup %1635 }
 0x210   :  { %v562_v47 = vadd.f32 1.0, %v1636_v40 }
 0x211   :  { %v1638_v48 = vpop.eup %1637 }
 0x212   :  { %v1640_v29 = vpop.eup %1639  ;;  %v564_v49 = vmul.f32 %v1638_v48, %v560_v15  ;;  %1641 = vrcp.f32 %v562_v47  ;;  %vm569_vm8 = vweird.f32 %v1638_v48  ;;  %vm598_vm1 = vweird.f32 %v562_v47 }
 0x213   :  { %v579_v50 = vmul.f32 %v1640_v29, %v561_v18  ;;  %1643 = vtanh.f32 %v550_v35  ;;  %vm584_vm9 = vweird.f32 %v1640_v29  ;;  %vm570_vm12 = vmor %vm568_vm10, %vm569_vm8  ;;  %v604_v35 = vand.u32 2147483648, %v562_v47 }
 0x214   :  { %v565_v27 = vsub.f32 1.0, %v564_v49  ;;  %vm585_vm13 = vmor %vm583_vm11, %vm584_vm9 }
 0x215   :  { %v580_v31 = vsub.f32 1.0, %v579_v50  ;;  %v605_v50 = vor.u32 1.1754944e-38, %v604_v35 }
 0x216   :  { %v566_v55 = vmul.f32 %v1638_v48, %v565_v27 }
 0x217   :  { %v581_v60 = vmul.f32 %v1640_v29, %v580_v31 }
 0x218   :  { %v1642_v59 = vpop.eup %1641  ;;  %v567_v62 = vadd.f32 %v1638_v48, %v566_v55 }
 0x219   :  { %v594_v63 = vmul.f32 %v1642_v59, %v562_v47  ;;  %v582_v4 = vadd.f32 %v1640_v29, %v581_v60  ;;  %v1644_v11 = vpop.eup %1643  ;;  %vm599_vm0 = vweird.f32 %v1642_v59 }
 0x21a   :  { %v571_v6 = vsel %vm570_vm12, %v1638_v48, %v567_v62  ;;  %v602_v48 = vand.u32 2147483647, %v562_v47  ;;  %vm600_vm2 = vmor %vm598_vm1, %vm599_vm0 }
 0x21b   :  { %v595_v13 = vsub.f32 1.0, %v594_v63  ;;  %v576_v14 = vsel %vm573_vm14, %v575_v0, %v571_v6  ;;  %v586_v26 = vsel %vm585_vm13, %v1640_v29, %v582_v4 }
 0x21c   :  { %v591_v30 = vsel %vm588_vm15, %v590_v5, %v586_v26  ;;  %v610_v23 = vmul.f32 %v1644_v11, %v576_v14  ;;  %vm603_vm3 = vcmp.eq.f32.partialorder %v602_v48, 8.507059e+37 }
 0x21d   :  { %v609_v43 = vmul.f32 %v591_v30, %v2020_v22  ;;  %v596_v40 = vmul.f32 %v1642_v59, %v595_v13  ;;  %v1496_v22 = vld [vmem:[%s2238_s0 + $0x30] sm:$0xff] }
 0x21e   :  { %v617_v47 = vunpack.c.l.bf16 %v1496_v22  ;;  %v618_v52 = vunpack.c.h.bf16 %v1496_v22 }
 0x21f   :  { %v2062_v15 = vadd.f32 %v610_v23, %v609_v43  ;;  %v597_v18 = vadd.f32 %v1642_v59, %v596_v40 }
 0x221   :  { %1645 = vtanh.f32 %v2062_v15  ;;  %v601_v49 = vsel %vm600_vm2, %v1642_v59, %v597_v18  ;;  %v1497_v59 = vld [vmem:[%s2238_s0 + $0x38] sm:$0xff] }
 0x222   :  { %v606_v27 = vsel %vm603_vm3, %v605_v50, %v601_v49  ;;  %v619_v0 = vunpack.c.l.bf16 %v1497_v59  ;;  %v620_v35 = vunpack.c.h.bf16 %v1497_v59 }
 0x227   :  { %v1646_v29 = vpop.eup %1645 }
 0x228   :  { %v613_v31 = vmul.f32 %v1646_v29, %v606_v27 }
 0x22a   :  { %v621_v51 = vpack.c.bf16 %v613_v31, %v613_v31 }
 0x22c   :  { %630 = vmatmul.bf16.vlgmr.msrb.gmra.mxu0 %v621_v51  ;;  %643 = vmatmul.bf16.vlgmr.msrb.gmra.mxu1 %v621_v51 }
 0x22d   :  { %656 = vmatmul.bf16.vlgmr.msrb.gmra.mxu2 %v621_v51  ;;  %669 = vmatmul.bf16.vlgmr.msrb.gmra.mxu3 %v621_v51 }
 0x22e   :  { %876 = vmatpush.bf16.msrb.mxu0 %v1812_v3  ;;  %889 = vmatpush.bf16.msrb.mxu1 %v1814_v7 }
 0x22f   :  { %902 = vmatpush.bf16.msrb.mxu2 %v1816_v8  ;;  %915 = vmatpush.bf16.msrb.mxu3 %v1827_v21 }
 0x232   :  { %877 = vmatpush.bf16.msrb.mxu0 %v1819_v12  ;;  %890 = vmatpush.bf16.msrb.mxu1 %v1823_v16 }
 0x233   :  { %903 = vmatpush.bf16.msrb.mxu2 %v1825_v17  ;;  %916 = vmatpush.bf16.msrb.mxu3 %v1839_v34 }
 0x236   :  { %878 = vmatpush.bf16.msrb.mxu0 %v1831_v28  ;;  %891 = vmatpush.bf16.msrb.mxu1 %v1835_v32 }
 0x237   :  { %904 = vmatpush.bf16.msrb.mxu2 %v1837_v33  ;;  %917 = vmatpush.bf16.msrb.mxu3 %v1845_v42 }
 0x23a   :  { %879 = vmatpush.bf16.msrb.mxu0 %v1843_v41  ;;  %892 = vmatpush.bf16.msrb.mxu1 %v1849_v45 }
 0x23b   :  { %905 = vmatpush.bf16.msrb.mxu2 %v1851_v46  ;;  %918 = vmatpush.bf16.msrb.mxu3 %v1857_v54 }
 0x23e   :  { %880 = vmatpush.bf16.msrb.mxu0 %v1855_v53  ;;  %893 = vmatpush.bf16.msrb.mxu1 %v1861_v57 }
 0x23f   :  { %906 = vmatpush.bf16.msrb.mxu2 %v1863_v58  ;;  %919 = vmatpush.bf16.msrb.mxu3 %v1869_v2 }
 0x242   :  { %881 = vmatpush.bf16.msrb.mxu0 %v1867_v1  ;;  %894 = vmatpush.bf16.msrb.mxu1 %v1873_v9 }
 0x243   :  { %907 = vmatpush.bf16.msrb.mxu2 %v1875_v10  ;;  %920 = vmatpush.bf16.msrb.mxu3 %v1881_v20 }
 0x246   :  { %882 = vmatpush.bf16.msrb.mxu0 %v1879_v19  ;;  %895 = vmatpush.bf16.msrb.mxu1 %v1885_v24 }
 0x247   :  { %908 = vmatpush.bf16.msrb.mxu2 %v1887_v25  ;;  %921 = vmatpush.bf16.msrb.mxu3 %v1893_v37 }
 0x24a   :  { %883 = vmatpush.bf16.msrb.mxu0 %v1891_v36  ;;  %896 = vmatpush.bf16.msrb.mxu1 %v1897_v38 }
 0x24b   :  { %909 = vmatpush.bf16.msrb.mxu2 %v1899_v39  ;;  %922 = vmatpush.bf16.msrb.mxu3 %v1905_v44 }
 0x2a9   :  { %v631_v55 = vpop.f32.mrf.mxu0  ;;  %v644_v56 = vpop.f32.mrf.mxu1 }
 0x2aa   :  { %v674_v60 = vadd.f32 %v631_v55, %v617_v47  ;;  %v675_v61 = vadd.f32 %v644_v56, %v618_v52 }
 0x2ac   :  { %v1498_v62 = vmul.f32 -1.442695, %v674_v60  ;;  %v1499_v63 = vmul.f32 -1.442695, %v675_v61 }
 0x2ae   :  { %1647 = vpow2.f32 %v1498_v62 }
 0x2af   :  { %1649 = vpow2.f32 %v1499_v63 }
 0x2b0   :  { %v657_v4 = vpop.f32.mrf.mxu2  ;;  %v670_v5 = vpop.f32.mrf.mxu3 }
 0x2b1   :  { %v676_v6 = vadd.f32 %v657_v4, %v619_v0  ;;  %v633_v11 = vpop.f32.mrf.mxu0  ;;  %v646_v13 = vpop.f32.mrf.mxu1  ;;  %v677_v29 = vadd.f32 %v670_v5, %v620_v35 }
 0x2b3   :  { %v1500_v14 = vmul.f32 -1.442695, %v676_v6 }
 0x2b4   :  { %v1648_v26 = vpop.eup %1647 }
 0x2b5   :  { %v1650_v30 = vpop.eup %1649  ;;  %v687_v23 = vadd.f32 1.0, %v1648_v26  ;;  %1651 = vpow2.f32 %v1500_v14 }
 0x2b6   :  { %v688_v43 = vadd.f32 1.0, %v1650_v30 }
 0x2b7   :  { %1653 = vrcp.f32 %v687_v23  ;;  %v701_v52 = vand.u32 2147483648, %v687_v23  ;;  %v699_v60 = vand.u32 2147483647, %v687_v23  ;;  %vm695_vm6 = vweird.f32 %v687_v23 }
 0x2b8   :  { %1655 = vrcp.f32 %v688_v43  ;;  %v659_v40 = vpop.f32.mrf.mxu2  ;;  %v672_v18 = vpop.f32.mrf.mxu3  ;;  %v716_v55 = vand.u32 2147483648, %v688_v43  ;;  %v714_v62 = vand.u32 2147483647, %v688_v43  ;;  %vm710_vm7 = vweird.f32 %v688_v43 }
 0x2b9   :  { %v702_v4 = vor.u32 1.1754944e-38, %v701_v52  ;;  %vm700_vm10 = vcmp.eq.f32.partialorder %v699_v60, 8.507059e+37 }
 0x2ba   :  { %v717_v6 = vor.u32 1.1754944e-38, %v716_v55  ;;  %vm715_vm11 = vcmp.eq.f32.partialorder %v714_v62, 8.507059e+37 }
 0x2bb   :  { %v1652_v48 = vpop.eup %1651 }
 0x2bc   :  { %v689_v49 = vadd.f32 1.0, %v1652_v48 }
 0x2bd   :  { %v1654_v50 = vpop.eup %1653 }
 0x2be   :  { %v1656_v27 = vpop.eup %1655  ;;  %v691_v31 = vmul.f32 %v1654_v50, %v687_v23  ;;  %1657 = vrcp.f32 %v689_v49  ;;  %vm696_vm4 = vweird.f32 %v1654_v50  ;;  %vm725_vm13 = vweird.f32 %v689_v49 }
 0x2bf   :  { %v706_v51 = vmul.f32 %v1656_v27, %v688_v43  ;;  %1659 = vtanh.f32 %v677_v29  ;;  %vm711_vm5 = vweird.f32 %v1656_v27  ;;  %vm697_vm8 = vmor %vm695_vm6, %vm696_vm4  ;;  %v731_v29 = vand.u32 2147483648, %v689_v49 }
 0x2c0   :  { %v692_v22 = vsub.f32 1.0, %v691_v31  ;;  %vm712_vm9 = vmor %vm710_vm7, %vm711_vm5 }
 0x2c1   :  { %v707_v47 = vsub.f32 1.0, %v706_v51  ;;  %v732_v51 = vor.u32 1.1754944e-38, %v731_v29 }
 0x2c2   :  { %v693_v56 = vmul.f32 %v1654_v50, %v692_v22 }
 0x2c3   :  { %v708_v61 = vmul.f32 %v1656_v27, %v707_v47 }
 0x2c4   :  { %v1658_v59 = vpop.eup %1657  ;;  %v694_v63 = vadd.f32 %v1654_v50, %v693_v56 }
 0x2c5   :  { %v721_v0 = vmul.f32 %v1658_v59, %v689_v49  ;;  %v709_v5 = vadd.f32 %v1656_v27, %v708_v61  ;;  %v1660_v13 = vpop.eup %1659  ;;  %vm726_vm12 = vweird.f32 %v1658_v59 }
 0x2c6   :  { %v698_v11 = vsel %vm697_vm8, %v1654_v50, %v694_v63  ;;  %v729_v50 = vand.u32 2147483647, %v689_v49  ;;  %vm727_vm14 = vmor %vm725_vm13, %vm726_vm12 }
 0x2c7   :  { %v722_v14 = vsub.f32 1.0, %v721_v0  ;;  %v703_v26 = vsel %vm700_vm10, %v702_v4, %v698_v11  ;;  %v713_v30 = vsel %vm712_vm9, %v1656_v27, %v709_v5 }
 0x2c8   :  { %v718_v40 = vsel %vm715_vm11, %v717_v6, %v713_v30  ;;  %v737_v18 = vmul.f32 %v1660_v13, %v703_v26  ;;  %vm730_vm15 = vcmp.eq.f32.partialorder %v729_v50, 8.507059e+37 }
 0x2c9   :  { %v736_v35 = vmul.f32 %v718_v40, %v2062_v15  ;;  %v723_v48 = vmul.f32 %v1658_v59, %v722_v14  ;;  %v1501_v15 = vld [vmem:[%s2238_s0 + $0x40] sm:$0xff] }
 0x2ca   :  { %v744_v49 = vunpack.c.l.bf16 %v1501_v15  ;;  %v745_v55 = vunpack.c.h.bf16 %v1501_v15 }
 0x2cb   :  { %v2104_v23 = vadd.f32 %v737_v18, %v736_v35  ;;  %v724_v43 = vadd.f32 %v1658_v59, %v723_v48 }
 0x2cd   :  { %1661 = vtanh.f32 %v2104_v23  ;;  %v728_v31 = vsel %vm727_vm14, %v1658_v59, %v724_v43  ;;  %v1502_v59 = vld [vmem:[%s2238_s0 + $0x48] sm:$0xff] }
 0x2ce   :  { %v733_v22 = vsel %vm730_vm15, %v732_v51, %v728_v31  ;;  %v746_v4 = vunpack.c.l.bf16 %v1502_v59  ;;  %v747_v29 = vunpack.c.h.bf16 %v1502_v59 }
 0x2d3   :  { %v1662_v27 = vpop.eup %1661 }
 0x2d4   :  { %v740_v47 = vmul.f32 %v1662_v27, %v733_v22 }
 0x2d6   :  { %v748_v52 = vpack.c.bf16 %v740_v47, %v740_v47 }
 0x2d8   :  { %757 = vmatmul.bf16.vlgmr.msra.gmra.mxu0 %v748_v52  ;;  %770 = vmatmul.bf16.vlgmr.msra.gmra.mxu1 %v748_v52 }
 0x2d9   :  { %783 = vmatmul.bf16.vlgmr.msra.gmra.mxu2 %v748_v52  ;;  %796 = vmatmul.bf16.vlgmr.msra.gmra.mxu3 %v748_v52 }
 0x2da   :  { %1003 = vmatpush.bf16.msra.mxu0 %v1812_v3  ;;  %1016 = vmatpush.bf16.msra.mxu1 %v1814_v7 }
 0x2db   :  { %1029 = vmatpush.bf16.msra.mxu2 %v1816_v8  ;;  %1042 = vmatpush.bf16.msra.mxu3 %v1827_v21 }
 0x2de   :  { %1004 = vmatpush.bf16.msra.mxu0 %v1819_v12  ;;  %1017 = vmatpush.bf16.msra.mxu1 %v1823_v16 }
 0x2df   :  { %1030 = vmatpush.bf16.msra.mxu2 %v1825_v17  ;;  %1043 = vmatpush.bf16.msra.mxu3 %v1839_v34 }
 0x2e2   :  { %1005 = vmatpush.bf16.msra.mxu0 %v1831_v28  ;;  %1018 = vmatpush.bf16.msra.mxu1 %v1835_v32 }
 0x2e3   :  { %1031 = vmatpush.bf16.msra.mxu2 %v1837_v33  ;;  %1044 = vmatpush.bf16.msra.mxu3 %v1845_v42 }
 0x2e6   :  { %1006 = vmatpush.bf16.msra.mxu0 %v1843_v41  ;;  %1019 = vmatpush.bf16.msra.mxu1 %v1849_v45 }
 0x2e7   :  { %1032 = vmatpush.bf16.msra.mxu2 %v1851_v46  ;;  %1045 = vmatpush.bf16.msra.mxu3 %v1857_v54 }
 0x2ea   :  { %1007 = vmatpush.bf16.msra.mxu0 %v1855_v53  ;;  %1020 = vmatpush.bf16.msra.mxu1 %v1861_v57 }
 0x2eb   :  { %1033 = vmatpush.bf16.msra.mxu2 %v1863_v58  ;;  %1046 = vmatpush.bf16.msra.mxu3 %v1869_v2 }
 0x2ee   :  { %1008 = vmatpush.bf16.msra.mxu0 %v1867_v1  ;;  %1021 = vmatpush.bf16.msra.mxu1 %v1873_v9 }
 0x2ef   :  { %1034 = vmatpush.bf16.msra.mxu2 %v1875_v10  ;;  %1047 = vmatpush.bf16.msra.mxu3 %v1881_v20 }
 0x2f2   :  { %1009 = vmatpush.bf16.msra.mxu0 %v1879_v19  ;;  %1022 = vmatpush.bf16.msra.mxu1 %v1885_v24 }
 0x2f3   :  { %1035 = vmatpush.bf16.msra.mxu2 %v1887_v25  ;;  %1048 = vmatpush.bf16.msra.mxu3 %v1893_v37 }
 0x2f6   :  { %1010 = vmatpush.bf16.msra.mxu0 %v1891_v36  ;;  %1023 = vmatpush.bf16.msra.mxu1 %v1897_v38 }
 0x2f7   :  { %1036 = vmatpush.bf16.msra.mxu2 %v1899_v39  ;;  %1049 = vmatpush.bf16.msra.mxu3 %v1905_v44 }
 0x355   :  { %v758_v56 = vpop.f32.mrf.mxu0  ;;  %v771_v60 = vpop.f32.mrf.mxu1 }
 0x356   :  { %v801_v61 = vadd.f32 %v758_v56, %v744_v49  ;;  %v802_v62 = vadd.f32 %v771_v60, %v745_v55 }
 0x358   :  { %v1503_v63 = vmul.f32 -1.442695, %v801_v61  ;;  %v1504_v0 = vmul.f32 -1.442695, %v802_v62 }
 0x35a   :  { %1663 = vpow2.f32 %v1503_v63 }
 0x35b   :  { %1665 = vpow2.f32 %v1504_v0 }
 0x35c   :  { %v784_v5 = vpop.f32.mrf.mxu2  ;;  %v797_v6 = vpop.f32.mrf.mxu3 }
 0x35d   :  { %v803_v11 = vadd.f32 %v784_v5, %v746_v4  ;;  %v760_v13 = vpop.f32.mrf.mxu0  ;;  %v773_v14 = vpop.f32.mrf.mxu1  ;;  %v804_v27 = vadd.f32 %v797_v6, %v747_v29 }
 0x35f   :  { %v1505_v26 = vmul.f32 -1.442695, %v803_v11 }
 0x360   :  { %v1664_v30 = vpop.eup %1663 }
 0x361   :  { %v1666_v40 = vpop.eup %1665  ;;  %v814_v18 = vadd.f32 1.0, %v1664_v30  ;;  %1667 = vpow2.f32 %v1505_v26 }
 0x362   :  { %v815_v35 = vadd.f32 1.0, %v1666_v40 }
 0x363   :  { %1669 = vrcp.f32 %v814_v18  ;;  %v828_v55 = vand.u32 2147483648, %v814_v18  ;;  %v826_v61 = vand.u32 2147483647, %v814_v18  ;;  %vm822_vm2 = vweird.f32 %v814_v18 }
 0x364   :  { %1671 = vrcp.f32 %v815_v35  ;;  %v786_v48 = vpop.f32.mrf.mxu2  ;;  %v799_v43 = vpop.f32.mrf.mxu3  ;;  %v843_v56 = vand.u32 2147483648, %v815_v35  ;;  %v841_v63 = vand.u32 2147483647, %v815_v35  ;;  %vm837_vm3 = vweird.f32 %v815_v35 }
 0x365   :  { %v829_v5 = vor.u32 1.1754944e-38, %v828_v55  ;;  %vm827_vm6 = vcmp.eq.f32.partialorder %v826_v61, 8.507059e+37 }
 0x366   :  { %v844_v11 = vor.u32 1.1754944e-38, %v843_v56  ;;  %vm842_vm7 = vcmp.eq.f32.partialorder %v841_v63, 8.507059e+37 }
 0x367   :  { %v1668_v50 = vpop.eup %1667 }
 0x368   :  { %v816_v31 = vadd.f32 1.0, %v1668_v50 }
 0x369   :  { %v1670_v51 = vpop.eup %1669 }
 0x36a   :  { %v1672_v22 = vpop.eup %1671  ;;  %v818_v47 = vmul.f32 %v1670_v51, %v814_v18  ;;  %1673 = vrcp.f32 %v816_v31  ;;  %vm823_vm0 = vweird.f32 %v1670_v51  ;;  %vm852_vm9 = vweird.f32 %v816_v31 }
 0x36b   :  { %v833_v52 = vmul.f32 %v1672_v22, %v815_v35  ;;  %1675 = vtanh.f32 %v804_v27  ;;  %vm838_vm1 = vweird.f32 %v1672_v22  ;;  %vm824_vm4 = vmor %vm822_vm2, %vm823_vm0  ;;  %v858_v27 = vand.u32 2147483648, %v816_v31 }
 0x36c   :  { %v819_v15 = vsub.f32 1.0, %v818_v47  ;;  %vm839_vm5 = vmor %vm837_vm3, %vm838_vm1 }
 0x36d   :  { %v834_v49 = vsub.f32 1.0, %v833_v52  ;;  %v859_v52 = vor.u32 1.1754944e-38, %v858_v27 }
 0x36e   :  { %v820_v60 = vmul.f32 %v1670_v51, %v819_v15 }
 0x36f   :  { %v835_v62 = vmul.f32 %v1672_v22, %v834_v49 }
 0x370   :  { %v1674_v59 = vpop.eup %1673  ;;  %v821_v0 = vadd.f32 %v1670_v51, %v820_v60 }
 0x371   :  { %v848_v4 = vmul.f32 %v1674_v59, %v816_v31  ;;  %v836_v6 = vadd.f32 %v1672_v22, %v835_v62  ;;  %v1676_v14 = vpop.eup %1675  ;;  %vm853_vm8 = vweird.f32 %v1674_v59 }
 0x372   :  { %v825_v13 = vsel %vm824_vm4, %v1670_v51, %v821_v0  ;;  %v856_v51 = vand.u32 2147483647, %v816_v31  ;;  %vm854_vm10 = vmor %vm852_vm9, %vm853_vm8 }
 0x373   :  { %v849_v26 = vsub.f32 1.0, %v848_v4  ;;  %v830_v30 = vsel %vm827_vm6, %v829_v5, %v825_v13  ;;  %v840_v40 = vsel %vm839_vm5, %v1672_v22, %v836_v6 }
 0x374   :  { %v845_v48 = vsel %vm842_vm7, %v844_v11, %v840_v40  ;;  %v864_v43 = vmul.f32 %v1676_v14, %v830_v30  ;;  %vm857_vm11 = vcmp.eq.f32.partialorder %v856_v51, 8.507059e+37 }
 0x375   :  { %v863_v29 = vmul.f32 %v845_v48, %v2104_v23  ;;  %v850_v50 = vmul.f32 %v1674_v59, %v849_v26 }
 0x377   :  { %v2146_v18 = vadd.f32 %v864_v43, %v863_v29  ;;  %v851_v35 = vadd.f32 %v1674_v59, %v850_v50 }
 0x379   :  { %1677 = vtanh.f32 %v2146_v18  ;;  %v855_v47 = vsel %vm854_vm10, %v1674_v59, %v851_v35 }
 0x37a   :  { %v860_v15 = vsel %vm857_vm11, %v859_v52, %v855_v47 }
 0x37f   :  { %v1678_v22 = vpop.eup %1677 }
 0x380   :  { %v867_v49 = vmul.f32 %v1678_v22, %v860_v15 }
 0x382   :  { %v875_v55 = vpack.c.bf16 %v867_v49, %v867_v49 }
 0x384   :  { %884 = vmatmul.bf16.vlgmr.msrb.gmra.mxu0 %v875_v55  ;;  %897 = vmatmul.bf16.vlgmr.msrb.gmra.mxu1 %v875_v55 }
 0x385   :  { %910 = vmatmul.bf16.vlgmr.msrb.gmra.mxu2 %v875_v55  ;;  %923 = vmatmul.bf16.vlgmr.msrb.gmra.mxu3 %v875_v55 }
 0x386   :  { %1130 = vmatpush.bf16.msrb.mxu0 %v1812_v3  ;;  %1143 = vmatpush.bf16.msrb.mxu1 %v1814_v7  ;;  %v1506_v3 = vld [vmem:[%s2238_s0 + $0x50] sm:$0xff] }
 0x387   :  { %1156 = vmatpush.bf16.msrb.mxu2 %v1816_v8  ;;  %1169 = vmatpush.bf16.msrb.mxu3 %v1827_v21  ;;  %v871_v7 = vunpack.c.l.bf16 %v1506_v3  ;;  %v872_v8 = vunpack.c.h.bf16 %v1506_v3 }
 0x38a   :  { %1131 = vmatpush.bf16.msrb.mxu0 %v1819_v12  ;;  %1144 = vmatpush.bf16.msrb.mxu1 %v1823_v16 }
 0x38b   :  { %1157 = vmatpush.bf16.msrb.mxu2 %v1825_v17  ;;  %1170 = vmatpush.bf16.msrb.mxu3 %v1839_v34 }
 0x38e   :  { %1132 = vmatpush.bf16.msrb.mxu0 %v1831_v28  ;;  %1145 = vmatpush.bf16.msrb.mxu1 %v1835_v32  ;;  %v1507_v28 = vld [vmem:[%s2238_s0 + $0x58] sm:$0xff] }
 0x38f   :  { %1158 = vmatpush.bf16.msrb.mxu2 %v1837_v33  ;;  %1171 = vmatpush.bf16.msrb.mxu3 %v1845_v42  ;;  %v873_v34 = vunpack.c.l.bf16 %v1507_v28 }
 0x392   :  { %1133 = vmatpush.bf16.msrb.mxu0 %v1843_v41  ;;  %1146 = vmatpush.bf16.msrb.mxu1 %v1849_v45 }
 0x393   :  { %1159 = vmatpush.bf16.msrb.mxu2 %v1851_v46  ;;  %1172 = vmatpush.bf16.msrb.mxu3 %v1857_v54 }
 0x396   :  { %1134 = vmatpush.bf16.msrb.mxu0 %v1855_v53  ;;  %1147 = vmatpush.bf16.msrb.mxu1 %v1861_v57 }
 0x397   :  { %1160 = vmatpush.bf16.msrb.mxu2 %v1863_v58  ;;  %1173 = vmatpush.bf16.msrb.mxu3 %v1869_v2 }
 0x39a   :  { %1135 = vmatpush.bf16.msrb.mxu0 %v1867_v1  ;;  %1148 = vmatpush.bf16.msrb.mxu1 %v1873_v9 }
 0x39b   :  { %1161 = vmatpush.bf16.msrb.mxu2 %v1875_v10  ;;  %1174 = vmatpush.bf16.msrb.mxu3 %v1881_v20 }
 0x39e   :  { %1136 = vmatpush.bf16.msrb.mxu0 %v1879_v19  ;;  %1149 = vmatpush.bf16.msrb.mxu1 %v1885_v24  ;;  %v874_v19 = vunpack.c.h.bf16 %v1507_v28  ;;  %v1512_v28 = vld [vmem:[%s2238_s0 + $0x68] sm:$0xff] }
 0x39f   :  { %1162 = vmatpush.bf16.msrb.mxu2 %v1887_v25  ;;  %1175 = vmatpush.bf16.msrb.mxu3 %v1893_v37 }
 0x3a2   :  { %1137 = vmatpush.bf16.msrb.mxu0 %v1891_v36  ;;  %1150 = vmatpush.bf16.msrb.mxu1 %v1897_v38 }
 0x3a3   :  { %1163 = vmatpush.bf16.msrb.mxu2 %v1899_v39  ;;  %1176 = vmatpush.bf16.msrb.mxu3 %v1905_v44 }
 0x401   :  { %v885_v12 = vpop.f32.mrf.mxu0  ;;  %v898_v16 = vpop.f32.mrf.mxu1 }
 0x402   :  { %v928_v17 = vadd.f32 %v885_v12, %v871_v7  ;;  %v929_v21 = vadd.f32 %v898_v16, %v872_v8 }
 0x404   :  { %v1508_v32 = vmul.f32 -1.442695, %v928_v17  ;;  %v1509_v33 = vmul.f32 -1.442695, %v929_v21 }
 0x406   :  { %1679 = vpow2.f32 %v1508_v32 }
 0x407   :  { %1681 = vpow2.f32 %v1509_v33 }
 0x408   :  { %v911_v41 = vpop.f32.mrf.mxu2  ;;  %v924_v42 = vpop.f32.mrf.mxu3 }
 0x409   :  { %v930_v45 = vadd.f32 %v911_v41, %v873_v34  ;;  %v887_v46 = vpop.f32.mrf.mxu0  ;;  %v900_v53 = vpop.f32.mrf.mxu1  ;;  %v931_v36 = vadd.f32 %v924_v42, %v874_v19  ;;  %v1000_v34 = vunpack.c.l.bf16 %v1512_v28  ;;  %v1001_v19 = vunpack.c.h.bf16 %v1512_v28  ;;  %v1588_v28 = vld [vmem:[%s2240_s2 + $0x18] sm:$0xff] }
 0x40b   :  { %v1510_v54 = vmul.f32 -1.442695, %v930_v45 }
 0x40c   :  { %v1680_v57 = vpop.eup %1679 }
 0x40d   :  { %v1682_v58 = vpop.eup %1681  ;;  %v941_v1 = vadd.f32 1.0, %v1680_v57  ;;  %1683 = vpow2.f32 %v1510_v54 }
 0x40e   :  { %v942_v2 = vadd.f32 1.0, %v1682_v58 }
 0x40f   :  { %1685 = vrcp.f32 %v941_v1  ;;  %v955_v31 = vand.u32 2147483648, %v941_v1  ;;  %v953_v61 = vand.u32 2147483647, %v941_v1  ;;  %vm949_vm14 = vweird.f32 %v941_v1 }
 0x410   :  { %1687 = vrcp.f32 %v942_v2  ;;  %v913_v9 = vpop.f32.mrf.mxu2  ;;  %v926_v10 = vpop.f32.mrf.mxu3  ;;  %v970_v56 = vand.u32 2147483648, %v942_v2  ;;  %v968_v63 = vand.u32 2147483647, %v942_v2  ;;  %vm964_vm15 = vweird.f32 %v942_v2 }
 0x411   :  { %v956_v5 = vor.u32 1.1754944e-38, %v955_v31  ;;  %vm954_vm2 = vcmp.eq.f32.partialorder %v953_v61, 8.507059e+37 }
 0x412   :  { %v971_v11 = vor.u32 1.1754944e-38, %v970_v56  ;;  %vm969_vm3 = vcmp.eq.f32.partialorder %v968_v63, 8.507059e+37 }
 0x413   :  { %v1684_v20 = vpop.eup %1683 }
 0x414   :  { %v943_v24 = vadd.f32 1.0, %v1684_v20 }
 0x415   :  { %v1686_v25 = vpop.eup %1685 }
 0x416   :  { %v1688_v37 = vpop.eup %1687  ;;  %v945_v38 = vmul.f32 %v1686_v25, %v941_v1  ;;  %1689 = vrcp.f32 %v943_v24  ;;  %vm950_vm12 = vweird.f32 %v1686_v25  ;;  %v985_v51 = vand.u32 2147483648, %v943_v24 }
 0x417   :  { %v960_v39 = vmul.f32 %v1688_v37, %v942_v2  ;;  %1691 = vtanh.f32 %v931_v36  ;;  %vm965_vm13 = vweird.f32 %v1688_v37  ;;  %vm951_vm0 = vmor %vm949_vm14, %vm950_vm12  ;;  %vm979_vm5 = vweird.f32 %v943_v24 }
 0x418   :  { %v946_v44 = vsub.f32 1.0, %v945_v38  ;;  %vm966_vm1 = vmor %vm964_vm15, %vm965_vm13  ;;  %v983_v47 = vand.u32 2147483647, %v943_v24  ;;  %v986_v22 = vor.u32 1.1754944e-38, %v985_v51 }
 0x419   :  { %v961_v23 = vsub.f32 1.0, %v960_v39 }
 0x41a   :  { %v947_v60 = vmul.f32 %v1686_v25, %v946_v44  ;;  %vm984_vm7 = vcmp.eq.f32.partialorder %v983_v47, 8.507059e+37 }
 0x41b   :  { %v962_v62 = vmul.f32 %v1688_v37, %v961_v23 }
 0x41c   :  { %v1690_v59 = vpop.eup %1689  ;;  %v948_v0 = vadd.f32 %v1686_v25, %v947_v60 }
 0x41d   :  { %v975_v4 = vmul.f32 %v1690_v59, %v943_v24  ;;  %v963_v6 = vadd.f32 %v1688_v37, %v962_v62  ;;  %v1692_v14 = vpop.eup %1691  ;;  %vm980_vm4 = vweird.f32 %v1690_v59 }
 0x41e   :  { %v952_v13 = vsel %vm951_vm0, %v1686_v25, %v948_v0  ;;  %vm981_vm6 = vmor %vm979_vm5, %vm980_vm4 }
 0x41f   :  { %v976_v26 = vsub.f32 1.0, %v975_v4  ;;  %v957_v30 = vsel %vm954_vm2, %v956_v5, %v952_v13  ;;  %v967_v40 = vsel %vm966_vm1, %v1688_v37, %v963_v6 }
 0x420   :  { %v972_v48 = vsel %vm969_vm3, %v971_v11, %v967_v40  ;;  %v991_v43 = vmul.f32 %v1692_v14, %v957_v30 }
 0x421   :  { %v990_v29 = vmul.f32 %v972_v48, %v2146_v18  ;;  %v977_v50 = vmul.f32 %v1690_v59, %v976_v26  ;;  %v1511_v18 = vld [vmem:[%s2238_s0 + $0x60] sm:$0xff] }
 0x422   :  { %v998_v7 = vunpack.c.l.bf16 %v1511_v18  ;;  %v999_v8 = vunpack.c.h.bf16 %v1511_v18 }
 0x423   :  { %v2188_v35 = vadd.f32 %v991_v43, %v990_v29  ;;  %v978_v27 = vadd.f32 %v1690_v59, %v977_v50 }
 0x425   :  { %1693 = vtanh.f32 %v2188_v35  ;;  %v982_v52 = vsel %vm981_vm6, %v1690_v59, %v978_v27 }
 0x426   :  { %v987_v49 = vsel %vm984_vm7, %v986_v22, %v982_v52 }
 0x42b   :  { %v1694_v15 = vpop.eup %1693 }
 0x42c   :  { %v994_v55 = vmul.f32 %v1694_v15, %v987_v49 }
 0x42e   :  { %v1002_v3 = vpack.c.bf16 %v994_v55, %v994_v55 }
 0x430   :  { %1011 = vmatmul.bf16.vlgmr.msra.gmra.mxu0 %v1002_v3  ;;  %1024 = vmatmul.bf16.vlgmr.msra.gmra.mxu1 %v1002_v3 }
 0x431   :  { %1037 = vmatmul.bf16.vlgmr.msra.gmra.mxu2 %v1002_v3  ;;  %1050 = vmatmul.bf16.vlgmr.msra.gmra.mxu3 %v1002_v3 }
 0x4ad   :  { %v1012_v12 = vpop.f32.mrf.mxu0  ;;  %v1025_v16 = vpop.f32.mrf.mxu1 }
 0x4ae   :  { %v1055_v17 = vadd.f32 %v1012_v12, %v998_v7  ;;  %v1056_v21 = vadd.f32 %v1025_v16, %v999_v8  ;;  %v1591_v7 = vld [vmem:[%s2240_s2 + $0x30] sm:$0xff]  ;;  %v1590_v8 = vld [vmem:[%s2240_s2 + $0x28] sm:$0xff]  ;;  %v1589_v16 = vld [vmem:[%s2240_s2 + $0x20] sm:$0xff] }
 0x4af   :  { %v1516_v12 = vld [vmem:[%s2238_s0 + $0x70] sm:$0xff] }
 0x4b0   :  { %v1513_v32 = vmul.f32 -1.442695, %v1055_v17  ;;  %v1514_v33 = vmul.f32 -1.442695, %v1056_v21  ;;  %v1125_v17 = vunpack.c.l.bf16 %v1516_v12  ;;  %v1126_v21 = vunpack.c.h.bf16 %v1516_v12 }
 0x4b2   :  { %1695 = vpow2.f32 %v1513_v32 }
 0x4b3   :  { %1697 = vpow2.f32 %v1514_v33 }
 0x4b4   :  { %v1038_v41 = vpop.f32.mrf.mxu2  ;;  %v1051_v42 = vpop.f32.mrf.mxu3 }
 0x4b5   :  { %v1057_v45 = vadd.f32 %v1038_v41, %v1000_v34  ;;  %v1014_v46 = vpop.f32.mrf.mxu0  ;;  %v1027_v53 = vpop.f32.mrf.mxu1  ;;  %v1058_v36 = vadd.f32 %v1051_v42, %v1001_v19  ;;  %v1517_v42 = vld [vmem:[%s2238_s0 + $0x78] sm:$0xff]  ;;  %v1585_v19 = vld [vmem:[%s2240_s2] sm:$0xff] }
 0x4b7   :  { %v1515_v54 = vmul.f32 -1.442695, %v1057_v45  ;;  %v1587_v45 = vld [vmem:[%s2240_s2 + $0x10] sm:$0xff] }
 0x4b8   :  { %v1696_v57 = vpop.eup %1695 }
 0x4b9   :  { %v1698_v58 = vpop.eup %1697  ;;  %v1068_v1 = vadd.f32 1.0, %v1696_v57  ;;  %1699 = vpow2.f32 %v1515_v54  ;;  %v1127_v54 = vunpack.c.l.bf16 %v1517_v42  ;;  %v1586_v57 = vld [vmem:[%s2240_s2 + $0x8] sm:$0xff] }
 0x4ba   :  { %v1069_v2 = vadd.f32 1.0, %v1698_v58 }
 0x4bb   :  { %1701 = vrcp.f32 %v1068_v1  ;;  %v1082_v31 = vand.u32 2147483648, %v1068_v1  ;;  %v1080_v61 = vand.u32 2147483647, %v1068_v1  ;;  %vm1076_vm10 = vweird.f32 %v1068_v1 }
 0x4bc   :  { %1703 = vrcp.f32 %v1069_v2  ;;  %v1040_v9 = vpop.f32.mrf.mxu2  ;;  %v1053_v10 = vpop.f32.mrf.mxu3  ;;  %v1097_v56 = vand.u32 2147483648, %v1069_v2  ;;  %v1095_v63 = vand.u32 2147483647, %v1069_v2  ;;  %vm1091_vm11 = vweird.f32 %v1069_v2 }
 0x4bd   :  { %v1083_v5 = vor.u32 1.1754944e-38, %v1082_v31  ;;  %vm1081_vm14 = vcmp.eq.f32.partialorder %v1080_v61, 8.507059e+37 }
 0x4be   :  { %v1098_v11 = vor.u32 1.1754944e-38, %v1097_v56  ;;  %vm1096_vm15 = vcmp.eq.f32.partialorder %v1095_v63, 8.507059e+37 }
 0x4bf   :  { %v1700_v20 = vpop.eup %1699 }
 0x4c0   :  { %v1070_v24 = vadd.f32 1.0, %v1700_v20 }
 0x4c1   :  { %v1702_v25 = vpop.eup %1701 }
 0x4c2   :  { %v1704_v37 = vpop.eup %1703  ;;  %v1072_v38 = vmul.f32 %v1702_v25, %v1068_v1  ;;  %1705 = vrcp.f32 %v1070_v24  ;;  %vm1077_vm8 = vweird.f32 %v1702_v25  ;;  %v1112_v47 = vand.u32 2147483648, %v1070_v24 }
 0x4c3   :  { %v1087_v39 = vmul.f32 %v1704_v37, %v1069_v2  ;;  %1707 = vtanh.f32 %v1058_v36  ;;  %vm1092_vm9 = vweird.f32 %v1704_v37  ;;  %vm1078_vm12 = vmor %vm1076_vm10, %vm1077_vm8  ;;  %vm1106_vm1 = vweird.f32 %v1070_v24 }
 0x4c4   :  { %v1073_v44 = vsub.f32 1.0, %v1072_v38  ;;  %vm1093_vm13 = vmor %vm1091_vm11, %vm1092_vm9  ;;  %v1110_v52 = vand.u32 2147483647, %v1070_v24  ;;  %v1113_v15 = vor.u32 1.1754944e-38, %v1112_v47 }
 0x4c5   :  { %v1088_v23 = vsub.f32 1.0, %v1087_v39 }
 0x4c6   :  { %v1074_v60 = vmul.f32 %v1702_v25, %v1073_v44  ;;  %vm1111_vm3 = vcmp.eq.f32.partialorder %v1110_v52, 8.507059e+37  ;;  %v1128_v44 = vunpack.c.h.bf16 %v1517_v42 }
 0x4c7   :  { %v1089_v62 = vmul.f32 %v1704_v37, %v1088_v23 }
 0x4c8   :  { %v1706_v59 = vpop.eup %1705  ;;  %v1075_v0 = vadd.f32 %v1702_v25, %v1074_v60 }
 0x4c9   :  { %v1102_v4 = vmul.f32 %v1706_v59, %v1070_v24  ;;  %v1090_v6 = vadd.f32 %v1704_v37, %v1089_v62  ;;  %v1708_v14 = vpop.eup %1707  ;;  %vm1107_vm0 = vweird.f32 %v1706_v59 }
 0x4ca   :  { %v1079_v13 = vsel %vm1078_vm12, %v1702_v25, %v1075_v0  ;;  %vm1108_vm2 = vmor %vm1106_vm1, %vm1107_vm0 }
 0x4cb   :  { %v1103_v26 = vsub.f32 1.0, %v1102_v4  ;;  %v1084_v30 = vsel %vm1081_vm14, %v1083_v5, %v1079_v13  ;;  %v1094_v40 = vsel %vm1093_vm13, %v1704_v37, %v1090_v6 }
 0x4cc   :  { %v1099_v48 = vsel %vm1096_vm15, %v1098_v11, %v1094_v40  ;;  %v1118_v43 = vmul.f32 %v1708_v14, %v1084_v30 }
 0x4cd   :  { %v1117_v29 = vmul.f32 %v1099_v48, %v2188_v35  ;;  %v1104_v50 = vmul.f32 %v1706_v59, %v1103_v26  ;;  %v1592_v35 = vld [vmem:[%s2240_s2 + $0x38] sm:$0xff] }
 0x4ce   :  { %1324 = vmatpush.bf16.msra.mxu0 %v1592_v35 }
 0x4cf   :  { %v2198_v27 = vadd.f32 %v1118_v43, %v1117_v29  ;;  %v1105_v51 = vadd.f32 %v1706_v59, %v1104_v50 }
 0x4d1   :  { %1709 = vtanh.f32 %v2198_v27  ;;  %v1109_v22 = vsel %vm1108_vm2, %v1706_v59, %v1105_v51 }
 0x4d2   :  { %v1114_v55 = vsel %vm1111_vm3, %v1113_v15, %v1109_v22  ;;  %1325 = vmatpush.bf16.msra.mxu0 %v1591_v7 }
 0x4d6   :  { %1326 = vmatpush.bf16.msra.mxu0 %v1590_v8 }
 0x4d7   :  { %v1710_v49 = vpop.eup %1709 }
 0x4d8   :  { %v1121_v3 = vmul.f32 %v1710_v49, %v1114_v55 }
 0x4da   :  { %v1129_v18 = vpack.c.bf16 %v1121_v3, %v1121_v3  ;;  %1327 = vmatpush.bf16.msra.mxu0 %v1589_v16 }
 0x4dc   :  { %1138 = vmatmul.bf16.vlgmr.msrb.gmra.mxu0 %v1129_v18  ;;  %1151 = vmatmul.bf16.vlgmr.msrb.gmra.mxu1 %v1129_v18 }
 0x4dd   :  { %1164 = vmatmul.bf16.vlgmr.msrb.gmra.mxu2 %v1129_v18  ;;  %1177 = vmatmul.bf16.vlgmr.msrb.gmra.mxu3 %v1129_v18 }
 0x4de   :  { %1328 = vmatpush.bf16.msra.mxu0 %v1588_v28 }
 0x4e2   :  { %1329 = vmatpush.bf16.msra.mxu0 %v1587_v45 }
 0x4e6   :  { %1330 = vmatpush.bf16.msra.mxu0 %v1586_v57 }
 0x4ea   :  { %1331 = vmatpush.bf16.msra.mxu0 %v1585_v19 }
 0x559   :  { %v1139_v32 = vpop.f32.mrf.mxu0  ;;  %v1152_v33 = vpop.f32.mrf.mxu1 }
 0x55a   :  { %v1182_v34 = vadd.f32 %v1139_v32, %v1125_v17  ;;  %v1183_v41 = vadd.f32 %v1152_v33, %v1126_v21 }
 0x55c   :  { %v1518_v46 = vmul.f32 -1.442695, %v1182_v34  ;;  %v1519_v53 = vmul.f32 -1.442695, %v1183_v41 }
 0x55e   :  { %1711 = vpow2.f32 %v1518_v46 }
 0x55f   :  { %1713 = vpow2.f32 %v1519_v53 }
 0x560   :  { %v1165_v58 = vpop.f32.mrf.mxu2  ;;  %v1178_v1 = vpop.f32.mrf.mxu3 }
 0x561   :  { %v1184_v2 = vadd.f32 %v1165_v58, %v1127_v54  ;;  %v1141_v9 = vpop.f32.mrf.mxu0  ;;  %v1154_v10 = vpop.f32.mrf.mxu1  ;;  %v1185_v60 = vadd.f32 %v1178_v1, %v1128_v44 }
 0x563   :  { %v1520_v20 = vmul.f32 -1.442695, %v1184_v2 }
 0x564   :  { %v1712_v24 = vpop.eup %1711 }
 0x565   :  { %v1714_v25 = vpop.eup %1713  ;;  %v1195_v36 = vadd.f32 1.0, %v1712_v24  ;;  %1715 = vpow2.f32 %v1520_v20 }
 0x566   :  { %v1196_v37 = vadd.f32 1.0, %v1714_v25 }
 0x567   :  { %1717 = vrcp.f32 %v1195_v36  ;;  %v1209_v4 = vand.u32 2147483648, %v1195_v36  ;;  %v1207_v11 = vand.u32 2147483647, %v1195_v36  ;;  %vm1203_vm6 = vweird.f32 %v1195_v36 }
 0x568   :  { %1719 = vrcp.f32 %v1196_v37  ;;  %v1167_v38 = vpop.f32.mrf.mxu2  ;;  %v1180_v39 = vpop.f32.mrf.mxu3  ;;  %v1224_v5 = vand.u32 2147483648, %v1196_v37  ;;  %v1222_v14 = vand.u32 2147483647, %v1196_v37  ;;  %vm1218_vm7 = vweird.f32 %v1196_v37 }
 0x569   :  { %v1210_v48 = vor.u32 1.1754944e-38, %v1209_v4  ;;  %vm1208_vm10 = vcmp.eq.f32.partialorder %v1207_v11, 8.507059e+37 }
 0x56a   :  { %v1225_v29 = vor.u32 1.1754944e-38, %v1224_v5  ;;  %vm1223_vm11 = vcmp.eq.f32.partialorder %v1222_v14, 8.507059e+37 }
 0x56b   :  { %v1716_v23 = vpop.eup %1715 }
 0x56c   :  { %v1197_v31 = vadd.f32 1.0, %v1716_v23 }
 0x56d   :  { %v1718_v56 = vpop.eup %1717 }
 0x56e   :  { %v1720_v61 = vpop.eup %1719  ;;  %v1199_v62 = vmul.f32 %v1718_v56, %v1195_v36  ;;  %1721 = vrcp.f32 %v1197_v31  ;;  %vm1204_vm4 = vweird.f32 %v1718_v56  ;;  %v1239_v7 = vand.u32 2147483648, %v1197_v31 }
 0x56f   :  { %v1214_v63 = vmul.f32 %v1720_v61, %v1196_v37  ;;  %1723 = vtanh.f32 %v1185_v60  ;;  %vm1219_vm5 = vweird.f32 %v1720_v61  ;;  %vm1205_vm8 = vmor %vm1203_vm6, %vm1204_vm4  ;;  %vm1233_vm13 = vweird.f32 %v1197_v31 }
 0x570   :  { %v1200_v59 = vsub.f32 1.0, %v1199_v62  ;;  %vm1220_vm9 = vmor %vm1218_vm7, %vm1219_vm5  ;;  %v1237_v8 = vand.u32 2147483647, %v1197_v31  ;;  %v1240_v16 = vor.u32 1.1754944e-38, %v1239_v7 }
 0x571   :  { %v1215_v0 = vsub.f32 1.0, %v1214_v63 }
 0x572   :  { %v1201_v6 = vmul.f32 %v1718_v56, %v1200_v59  ;;  %vm1238_vm15 = vcmp.eq.f32.partialorder %v1237_v8, 8.507059e+37 }
 0x573   :  { %v1216_v13 = vmul.f32 %v1720_v61, %v1215_v0 }
 0x574   :  { %v1722_v26 = vpop.eup %1721  ;;  %v1202_v30 = vadd.f32 %v1718_v56, %v1201_v6 }
 0x575   :  { %v1229_v40 = vmul.f32 %v1722_v26, %v1197_v31  ;;  %v1217_v43 = vadd.f32 %v1720_v61, %v1216_v13  ;;  %v1724_v51 = vpop.eup %1723  ;;  %vm1234_vm12 = vweird.f32 %v1722_v26 }
 0x576   :  { %v1206_v50 = vsel %vm1205_vm8, %v1718_v56, %v1202_v30  ;;  %vm1235_vm14 = vmor %vm1233_vm13, %vm1234_vm12 }
 0x577   :  { %v1230_v47 = vsub.f32 1.0, %v1229_v40  ;;  %v1211_v52 = vsel %vm1208_vm10, %v1210_v48, %v1206_v50  ;;  %v1221_v22 = vsel %vm1220_vm9, %v1720_v61, %v1217_v43 }
 0x578   :  { %v1226_v15 = vsel %vm1223_vm11, %v1225_v29, %v1221_v22  ;;  %v1245_v49 = vmul.f32 %v1724_v51, %v1211_v52 }
 0x579   :  { %v1244_v55 = vmul.f32 %v1226_v15, %v2198_v27  ;;  %v1231_v3 = vmul.f32 %v1722_v26, %v1230_v47  ;;  %v1598_v27 = vld [vmem:[%s2241_s3] ss:$0 sm:$0xff] }
 0x57b   :  { %v1246_v18 = vadd.f32 %v1245_v49, %v1244_v55  ;;  %v1232_v35 = vadd.f32 %v1722_v26, %v1231_v3 }
 0x57d   :  { %1725 = vtanh.f32 %v1246_v18  ;;  %v1236_v12 = vsel %vm1235_vm14, %v1722_v26, %v1232_v35 }
 0x57e   :  { %v1241_v21 = vsel %vm1238_vm15, %v1240_v16, %v1236_v12 }
 0x583   :  { %v1726_v17 = vpop.eup %1725 }
 0x584   :  { %v1248_v28 = vmul.f32 %v1726_v17, %v1241_v21 }
 0x586   :  { %v1255_v32 = vpack.c.bf16 %v1248_v28, %v1248_v28 }
 0x588   :  { %1332 = vmatmul.bf16.vlgmr.msra.gmra.mxu0 %v1255_v32 }
 0x605   :  { %v1333_v33 = vpop.f32.mrf.mxu0 }
 0x606   :  { %v1334_v34 = vadd.f32 %v1598_v27, %v1333_v33 }
 0x608   :  { %1337 = vst [vmem:[#allocation7] sm:$0xff] %v1334_v34 }
 0x609   :  { %1348 = dma.vmem_to_hbm [thread:$0]  %s1344_s17, 128, %s1346_s20, [#allocation6]  }
 0x60d   :  { %v1335_v41 = vpop.f32.mrf.mxu0 }
 0x60e   :  { %1777 = dma.done.wait [#allocation6], 128  }
 0x60f   :  { %1778 = vsyncadd [#allocation6], 4294967168 }
 0x610   :  { %1353 = vsyncpa [#allocation5], 1 }
 0x611   :  { %1354 = vsyncpa [#allocation6], 1 }

</bundles_post_ra>
